<compile_context>
chip_gen: v6e
topology: v6e:2x2x1
jax: 0.10.0
libtpu: 0.0.40
codegen_flags: <defaults>
</compile_context>

<pallas_src>
import math

import jax
import jax.numpy as jnp
from jax.experimental import pallas as pl
from jax.experimental.pallas import tpu as pltpu

d_model = 32  # matches the module-level constant in the PyTorch file


def _erf(x):
    # Abramowitz & Stegun 7.1.26 polynomial erf (|err| < 1.5e-7), built from
    # exp / mul / select only so it lowers cleanly on every TPU generation.
    p = 0.3275911
    a1, a2, a3, a4, a5 = (0.254829592, -0.284496736, 1.421413741,
                          -1.453152027, 1.061405429)
    sign = jnp.where(x >= 0, jnp.float32(1.0), jnp.float32(-1.0))
    z = jnp.abs(x)
    t = pl.reciprocal(1.0 + p * z, approx=False)   # EUP-side reciprocal, exact
    poly = ((((a5 * t + a4) * t + a3) * t + a2) * t + a1) * t
    return sign * (1.0 - poly * jnp.exp(-z * z))


def _gelu_exact(x):
    # torch.nn.GELU() default (approximate='none'): 0.5*x*(1+erf(x/sqrt(2)))
    return 0.5 * x * (1.0 + _erf(x * jnp.float32(1.0 / math.sqrt(2.0))))


def _conv_mod_kernel(x_ref, sp_ref, w_ref, out_ref):
    """sp_ref rows: [dw_tap-1, dw_tap0, dw_tap+1, b_dw, b_a, b_v, b_proj, pad].

    w_ref rows   : [W_a' ; W_v' ; W_proj] stacked along dim 0, each (D_out, D_in),
                   with LayerNorm gamma already folded into W_a'/W_v' input dims.
    """
    bb, L, D = x_ref.shape
    x = x_ref[...].astype(jnp.float32).reshape(bb * L, D)

    # ---- LayerNorm over channels (eps=1e-5, biased variance); the affine
    # (gamma, beta) is folded into W_a'/W_v'/b_a/b_v by the wrapper.
    inv_d = jnp.float32(1.0 / D)
    mu = jnp.sum(x, axis=-1, keepdims=True) * inv_d
    xc = x - mu
    var = jnp.sum(xc * xc, axis=-1, keepdims=True) * inv_d
    xn = xc * jax.lax.rsqrt(var + jnp.float32(1e-5))

    cdims = (((1,), (1,)), ((), ()))          # contract channels vs W's in-dim
    prec = jax.lax.Precision.HIGHEST          # K=32 -> MXU cost is negligible

    # ---- fused a/v 1x1 convs: one contraction, 64-lane result, then slice.
    av = jax.lax.dot_general(xn, w_ref[0:2 * D, :], cdims, precision=prec,
                             preferred_element_type=jnp.float32)
    a = _gelu_exact(av[:, :D] + sp_ref[4:5, :])
    v = av[:, D:] + sp_ref[5:6, :]

    # ---- depthwise conv (k=3, padding=1) along L: XLU rolls + iota masks.
    a3 = a.reshape(bb, L, D)
    row = jax.lax.broadcasted_iota(jnp.int32, (bb, L, D), 1)
    r1, i1 = pltpu.roll(a3, 1, axis=1), pltpu.roll(row, 1, axis=1)
    r2, i2 = pltpu.roll(a3, L - 1, axis=1), pltpu.roll(row, L - 1, axis=1)
    zero = jnp.float32(0.0)
    # Select the "prev"/"next" rows by comparing each rolled element's source
    # row index with the destination row index.  Out-of-range taps (l=0 for
    # prev, l=L-1 for next) mask to zero exactly, and the selection is correct
    # regardless of the rotate-direction convention (requires L >= 3).
    prev = jnp.where(i1 == row - 1, r1, zero) + jnp.where(i2 == row - 1, r2, zero)
    nxt = jnp.where(i1 == row + 1, r1, zero) + jnp.where(i2 == row + 1, r2, zero)
    a3 = (prev * sp_ref[0:1, :] + a3 * sp_ref[1:2, :] + nxt * sp_ref[2:3, :]
          + sp_ref[3:4, :])

    # ---- modulation + output 1x1 projection.
    y = jax.lax.dot_general(a3.reshape(bb * L, D) * v, w_ref[2 * D:3 * D, :],
                            cdims, precision=prec,
                            preferred_element_type=jnp.float32)
    y = y + sp_ref[6:7, :]

    # ---- write the (bb, D, L) layout directly (lane-dense when L >= 128); the
    # transpose rides the otherwise-idle XLU slot instead of an extra HBM pass.
    out_ref[...] = jnp.transpose(y.reshape(bb, L, D), (0, 2, 1)).astype(out_ref.dtype)


def _vmem_budget_bytes():
    """~2/3 of the chip's physical VMEM (never the full 64 MiB of a v7x TC)."""
    try:
        cap = int(pltpu.get_tpu_info().vmem_capacity_bytes)
    except Exception:
        cap = 64 * 1024 * 1024                       # conservative fallback
    return int(min(cap * 2 // 3, 96 * 1024 * 1024))


def _pick_block_b(B, L, D, target_bytes):
    """Largest batch slab whose activation tile fits `target_bytes`, while
    keeping the grid >= 4 steps (>= 2 pipeline steps per v7x TensorCore)."""
    want_grid = min(4, B)
    best = 1
    for bb in range(1, B + 1):
        if B % bb:
            continue
        if bb != 1 and bb * L * D * 4 > target_bytes:
            continue
        if B // bb < want_grid:
            continue
        best = bb
    return best


def conv_mod(x, params, *, block_b=None):
    """x: [B, L, d_model] -> [B, d_model, L] (same as the PyTorch module)."""
    (gamma, beta, w_a1, b_a1, w_dw, b_dw, w_v, b_v, w_p, b_p) = params
    B, L, D = x.shape
    assert L >= 3, "kernel assumes at least 3 sequence positions"

    # Fold the LayerNorm affine into the (tiny, DxD) 1x1-conv weights once:
    #   (xhat*gamma + beta) @ W.T + b  ==  xhat @ (W*gamma).T + (W @ beta + b)
    w_a_f = w_a1 * gamma[None, :]
    b_a_f = b_a1 + w_a1 @ beta
    w_v_f = w_v * gamma[None, :]
    b_v_f = b_v + w_v @ beta

    # 3 kernel operands: x, an (8, D) pack of per-channel vectors, a (3D, D)
    # stack of the 1x1 weights (a- and v-branch fused into rows 0..2D-1).
    # NOTE: w_dw here is (tap, channel); a real PyTorch checkpoint stores the
    # depthwise Conv1d weight as (C, 1, 3) and must be squeezed + transposed.
    sp = jnp.stack([w_dw[0], w_dw[1], w_dw[2], b_dw, b_a_f, b_v_f, b_p,
                    jnp.zeros((D,), jnp.float32)], axis=0)
    w_all = jnp.concatenate([w_a_f, w_v_f, w_p], axis=0)

    budget = _vmem_budget_bytes()
    if block_b is None:
        # ~16 tile-sized f32 live tensors: double-buffered x & out plus the
        # in-kernel intermediates (~1.5-2 KiB/token at D=32).
        block_b = _pick_block_b(B, L, D, target_bytes=budget // 16)
    assert B % block_b == 0, "block_b must divide B"
    grid = (B // block_b,)

    # TODO(synk): for very long L, add an L-tile grid axis with a +/-1-row halo
    # so v7x's 64 MiB VMEM keeps fat double-buffered tiles without shrinking
    # block_b.
    grid_spec = pltpu.PrefetchScalarGridSpec(
        num_scalar_prefetch=0,
        grid=grid,
        in_specs=[
            pl.BlockSpec((block_b, L, D), lambda b: (b, 0, 0)),   # x
            pl.BlockSpec((8, D), lambda b: (0, 0)),               # packed vectors
            pl.BlockSpec((3 * D, D), lambda b: (0, 0)),           # stacked weights
        ],
        out_specs=pl.BlockSpec((block_b, D, L), lambda b: (b, 0, 0)),
    )

    return pl.pallas_call(
        _conv_mod_kernel,
        grid_spec=grid_spec,
        out_shape=jax.ShapeDtypeStruct((B, D, L), jnp.float32),
        compiler_params=pltpu.CompilerParams(
            dimension_semantics=("parallel",),
            vmem_limit_bytes=budget,
        ),
    )(x, sp, w_all)


def _reference(x, params):
    (gamma, beta, w_a1, b_a1, w_dw, b_dw, w_v, b_v, w_p, b_p) = params
    hi = jax.lax.Precision.HIGHEST
    mu = jnp.mean(x, -1, keepdims=True)
    var = jnp.mean((x - mu) ** 2, -1, keepdims=True)
    xn = (x - mu) / jnp.sqrt(var + 1e-5) * gamma + beta
    a = jnp.einsum("bld,od->blo", xn, w_a1, precision=hi) + b_a1
    a = 0.5 * a * (1.0 + jax.lax.erf(a * (1.0 / math.sqrt(2.0))))  # exact GELU
    prev = jnp.pad(a, ((0, 0), (1, 0), (0, 0)))[:, :-1, :]
    nxt = jnp.pad(a, ((0, 0), (0, 1), (0, 0)))[:, 1:, :]
    a = prev * w_dw[0] + a * w_dw[1] + nxt * w_dw[2] + b_dw
    v = jnp.einsum("bld,od->blo", xn, w_v, precision=hi) + b_v
    y = jnp.einsum("bld,od->blo", a * v, w_p, precision=hi) + b_p
    return jnp.transpose(y, (0, 2, 1))


if __name__ == "__main__":
    B, L, D = 8, 64, d_model
    key = jax.random.PRNGKey(0)
    ks = jax.random.split(key, 11)

    x = jax.random.normal(ks[0], (B, L, D), dtype=jnp.float32)
    gamma = 1.0 + 0.1 * jax.random.normal(ks[1], (D,), dtype=jnp.float32)
    beta = 0.1 * jax.random.normal(ks[2], (D,), dtype=jnp.float32)
    w_a1 = 0.2 * jax.random.normal(ks[3], (D, D), dtype=jnp.float32)   # (out, in)
    b_a1 = 0.1 * jax.random.normal(ks[4], (D,), dtype=jnp.float32)
    w_dw = 0.3 * jax.random.normal(ks[5], (3, D), dtype=jnp.float32)   # (tap, chan)
    b_dw = 0.1 * jax.random.normal(ks[6], (D,), dtype=jnp.float32)
    w_v = 0.2 * jax.random.normal(ks[7], (D, D), dtype=jnp.float32)
    b_v = 0.1 * jax.random.normal(ks[8], (D,), dtype=jnp.float32)
    w_p = 0.2 * jax.random.normal(ks[9], (D, D), dtype=jnp.float32)
    b_p = 0.1 * jax.random.normal(ks[10], (D,), dtype=jnp.float32)
    params = (gamma, beta, w_a1, b_a1, w_dw, b_dw, w_v, b_v, w_p, b_p)

    y = conv_mod(x, params)            # auto block_b -> grid of 4 (2 steps/TC)
    jax.block_until_ready(y)

    y_ref = _reference(x, params)
    assert y.shape == (B, D, L)
    err = float(jnp.max(jnp.abs(y - y_ref)))
    assert jnp.allclose(y, y_ref, atol=1e-3, rtol=1e-3), f"max abs err={err}"

    print("KERNEL_OK")
</pallas_src>

<mosaic_0001>
module attributes {stable_mosaic.version = 11 : i64} {
  func.func @_conv_mod_kernel(%arg0: i32, %arg1: memref<2x64x32xf32, #tpu.memory_space<vmem>>, %arg2: memref<8x32xf32, #tpu.memory_space<vmem>>, %arg3: memref<96x32xf32, #tpu.memory_space<vmem>>, %arg4: memref<2x32x64xf32, #tpu.memory_space<vmem>>) attributes {dimension_semantics = [#tpu.dimension_semantics<parallel>], iteration_bounds = array<i64: 4>, scalar_prefetch = 0 : i64, scratch_operands = 0 : i64, tpu.core_type = #tpu.core_type<tc>, window_params = [{transform_indices = @transform_0, window_bounds = array<i64: 2, 64, 32>}, {pipeline_mode = #tpu.pipeline_mode<synchronous>, transform_indices = @transform_1, window_bounds = array<i64: 8, 32>}, {pipeline_mode = #tpu.pipeline_mode<synchronous>, transform_indices = @transform_2, window_bounds = array<i64: 96, 32>}, {transform_indices = @transform_3, window_bounds = array<i64: 2, 32, 64>}]} {
    %c0 = arith.constant 0 : index
    %c0_0 = arith.constant 0 : index
    %c0_1 = arith.constant 0 : index
    %0 = vector.load %arg1[%c0, %c0_0, %c0_1] : memref<2x64x32xf32, #tpu.memory_space<vmem>>, vector<2x64x32xf32>
    %1 = vector.shape_cast %0 : vector<2x64x32xf32> to vector<128x32xf32>
    %cst = arith.constant dense<0.000000e+00> : vector<128xf32>
    %2 = vector.multi_reduction <add>, %1, %cst [1] : vector<128x32xf32> to vector<128xf32>
    %3 = vector.shape_cast %2 : vector<128xf32> to vector<128x1xf32>
    %cst_2 = arith.constant 3.125000e-02 : f32
    %4 = vector.broadcast %cst_2 : f32 to vector<128x1xf32>
    %5 = arith.mulf %3, %4 : vector<128x1xf32>
    %6 = vector.broadcast %5 : vector<128x1xf32> to vector<128x32xf32>
    %7 = arith.subf %1, %6 : vector<128x32xf32>
    %8 = arith.mulf %7, %7 : vector<128x32xf32>
    %cst_3 = arith.constant dense<0.000000e+00> : vector<128xf32>
    %9 = vector.multi_reduction <add>, %8, %cst_3 [1] : vector<128x32xf32> to vector<128xf32>
    %10 = vector.shape_cast %9 : vector<128xf32> to vector<128x1xf32>
    %cst_4 = arith.constant 3.125000e-02 : f32
    %11 = vector.broadcast %cst_4 : f32 to vector<128x1xf32>
    %12 = arith.mulf %10, %11 : vector<128x1xf32>
    %cst_5 = arith.constant 9.99999974E-6 : f32
    %13 = vector.broadcast %cst_5 : f32 to vector<128x1xf32>
    %14 = arith.addf %12, %13 : vector<128x1xf32>
    %15 = math.rsqrt %14 : vector<128x1xf32>
    %16 = vector.broadcast %15 : vector<128x1xf32> to vector<128x32xf32>
    %17 = arith.mulf %7, %16 : vector<128x32xf32>
    %c0_6 = arith.constant 0 : index
    %c0_7 = arith.constant 0 : index
    %18 = vector.load %arg3[%c0_6, %c0_7] : memref<96x32xf32, #tpu.memory_space<vmem>>, vector<64x32xf32>
    %cst_8 = arith.constant dense<0.000000e+00> : vector<128x64xf32>
    %19 = tpu.matmul %17, %18, %cst_8 {dimension_numbers = #tpu.dot_dimension_numbers<[1], [1], [0], [0], [0, 0, 1, 0], [], []>, precision = #tpu.contract_precision<fp32>} : vector<128x32xf32>, vector<64x32xf32>, vector<128x64xf32> -> vector<128x64xf32>
    %20 = vector.extract_strided_slice %19 {offsets = [0, 0], sizes = [128, 32], strides = [1, 1]} : vector<128x64xf32> to vector<128x32xf32>
    %c4 = arith.constant 4 : index
    %c0_9 = arith.constant 0 : index
    %21 = vector.load %arg2[%c4, %c0_9] : memref<8x32xf32, #tpu.memory_space<vmem>>, vector<1x32xf32>
    %22 = vector.broadcast %21 : vector<1x32xf32> to vector<128x32xf32>
    %23 = arith.addf %20, %22 : vector<128x32xf32>
    %cst_10 = arith.constant 5.000000e-01 : f32
    %24 = vector.broadcast %cst_10 : f32 to vector<128x32xf32>
    %25 = arith.mulf %24, %23 : vector<128x32xf32>
    %cst_11 = arith.constant 0.707106769 : f32
    %26 = vector.broadcast %cst_11 : f32 to vector<128x32xf32>
    %27 = arith.mulf %23, %26 : vector<128x32xf32>
    %cst_12 = arith.constant 0.000000e+00 : f32
    %28 = vector.broadcast %cst_12 : f32 to vector<128x32xf32>
    %29 = arith.cmpf oge, %27, %28 : vector<128x32xf32>
    %cst_13 = arith.constant 1.000000e+00 : f32
    %cst_14 = arith.constant -1.000000e+00 : f32
    %30 = vector.broadcast %cst_13 : f32 to vector<128x32xf32>
    %31 = vector.broadcast %cst_14 : f32 to vector<128x32xf32>
    %32 = arith.select %29, %30, %31 : vector<128x32xi1>, vector<128x32xf32>
    %33 = math.absf %27 : vector<128x32xf32>
    %cst_15 = arith.constant 0.327591091 : f32
    %34 = vector.broadcast %cst_15 : f32 to vector<128x32xf32>
    %35 = arith.mulf %34, %33 : vector<128x32xf32>
    %cst_16 = arith.constant 1.000000e+00 : f32
    %36 = vector.broadcast %cst_16 : f32 to vector<128x32xf32>
    %37 = arith.addf %36, %35 : vector<128x32xf32>
    %38 = tpu.reciprocal %37 : vector<128x32xf32> -> vector<128x32xf32>
    %cst_17 = arith.constant 1.06140542 : f32
    %39 = vector.broadcast %cst_17 : f32 to vector<128x32xf32>
    %40 = arith.mulf %39, %38 : vector<128x32xf32>
    %cst_18 = arith.constant -1.45315206 : f32
    %41 = vector.broadcast %cst_18 : f32 to vector<128x32xf32>
    %42 = arith.addf %40, %41 : vector<128x32xf32>
    %43 = arith.mulf %42, %38 : vector<128x32xf32>
    %cst_19 = arith.constant 1.42141378 : f32
    %44 = vector.broadcast %cst_19 : f32 to vector<128x32xf32>
    %45 = arith.addf %43, %44 : vector<128x32xf32>
    %46 = arith.mulf %45, %38 : vector<128x32xf32>
    %cst_20 = arith.constant -0.284496725 : f32
    %47 = vector.broadcast %cst_20 : f32 to vector<128x32xf32>
    %48 = arith.addf %46, %47 : vector<128x32xf32>
    %49 = arith.mulf %48, %38 : vector<128x32xf32>
    %cst_21 = arith.constant 0.254829586 : f32
    %50 = vector.broadcast %cst_21 : f32 to vector<128x32xf32>
    %51 = arith.addf %49, %50 : vector<128x32xf32>
    %52 = arith.mulf %51, %38 : vector<128x32xf32>
    %cst_22 = arith.constant 0.000000e+00 : f32
    %53 = vector.broadcast %cst_22 : f32 to vector<128x32xf32>
    %54 = arith.subf %53, %33 : vector<128x32xf32>
    %55 = arith.mulf %54, %33 : vector<128x32xf32>
    %56 = math.exp %55 : vector<128x32xf32>
    %57 = arith.mulf %52, %56 : vector<128x32xf32>
    %cst_23 = arith.constant 1.000000e+00 : f32
    %58 = vector.broadcast %cst_23 : f32 to vector<128x32xf32>
    %59 = arith.subf %58, %57 : vector<128x32xf32>
    %60 = arith.mulf %32, %59 : vector<128x32xf32>
    %cst_24 = arith.constant 1.000000e+00 : f32
    %61 = vector.broadcast %cst_24 : f32 to vector<128x32xf32>
    %62 = arith.addf %61, %60 : vector<128x32xf32>
    %63 = arith.mulf %25, %62 : vector<128x32xf32>
    %64 = vector.extract_strided_slice %19 {offsets = [0, 32], sizes = [128, 32], strides = [1, 1]} : vector<128x64xf32> to vector<128x32xf32>
    %c5 = arith.constant 5 : index
    %c0_25 = arith.constant 0 : index
    %65 = vector.load %arg2[%c5, %c0_25] : memref<8x32xf32, #tpu.memory_space<vmem>>, vector<1x32xf32>
    %66 = vector.broadcast %65 : vector<1x32xf32> to vector<128x32xf32>
    %67 = arith.addf %64, %66 : vector<128x32xf32>
    %68 = vector.shape_cast %63 : vector<128x32xf32> to vector<2x64x32xf32>
    %69 = tpu.iota {dimensions = array<i32: 1>} : vector<2x64x32xi32>
    %c1_i32 = arith.constant 1 : i32
    %70 = tpu.dynamic_rotate %68 by %c1_i32 dim 1 : vector<2x64x32xf32>, i32 -> vector<2x64x32xf32>
    %c1_i32_26 = arith.constant 1 : i32
    %71 = tpu.dynamic_rotate %69 by %c1_i32_26 dim 1 : vector<2x64x32xi32>, i32 -> vector<2x64x32xi32>
    %c63_i32 = arith.constant 63 : i32
    %72 = tpu.dynamic_rotate %68 by %c63_i32 dim 1 : vector<2x64x32xf32>, i32 -> vector<2x64x32xf32>
    %c63_i32_27 = arith.constant 63 : i32
    %73 = tpu.dynamic_rotate %69 by %c63_i32_27 dim 1 : vector<2x64x32xi32>, i32 -> vector<2x64x32xi32>
    %c1_i32_28 = arith.constant 1 : i32
    %74 = vector.broadcast %c1_i32_28 : i32 to vector<2x64x32xi32>
    %75 = arith.subi %69, %74 : vector<2x64x32xi32>
    %76 = arith.cmpi eq, %71, %75 : vector<2x64x32xi32>
    %cst_29 = arith.constant 0.000000e+00 : f32
    %77 = vector.broadcast %cst_29 : f32 to vector<2x64x32xf32>
    %78 = arith.select %76, %70, %77 : vector<2x64x32xi1>, vector<2x64x32xf32>
    %c1_i32_30 = arith.constant 1 : i32
    %79 = vector.broadcast %c1_i32_30 : i32 to vector<2x64x32xi32>
    %80 = arith.subi %69, %79 : vector<2x64x32xi32>
    %81 = arith.cmpi eq, %73, %80 : vector<2x64x32xi32>
    %cst_31 = arith.constant 0.000000e+00 : f32
    %82 = vector.broadcast %cst_31 : f32 to vector<2x64x32xf32>
    %83 = arith.select %81, %72, %82 : vector<2x64x32xi1>, vector<2x64x32xf32>
    %84 = arith.addf %78, %83 : vector<2x64x32xf32>
    %c1_i32_32 = arith.constant 1 : i32
    %85 = vector.broadcast %c1_i32_32 : i32 to vector<2x64x32xi32>
    %86 = arith.addi %69, %85 : vector<2x64x32xi32>
    %87 = arith.cmpi eq, %71, %86 : vector<2x64x32xi32>
    %cst_33 = arith.constant 0.000000e+00 : f32
    %88 = vector.broadcast %cst_33 : f32 to vector<2x64x32xf32>
    %89 = arith.select %87, %70, %88 : vector<2x64x32xi1>, vector<2x64x32xf32>
    %c1_i32_34 = arith.constant 1 : i32
    %90 = vector.broadcast %c1_i32_34 : i32 to vector<2x64x32xi32>
    %91 = arith.addi %69, %90 : vector<2x64x32xi32>
    %92 = arith.cmpi eq, %73, %91 : vector<2x64x32xi32>
    %cst_35 = arith.constant 0.000000e+00 : f32
    %93 = vector.broadcast %cst_35 : f32 to vector<2x64x32xf32>
    %94 = arith.select %92, %72, %93 : vector<2x64x32xi1>, vector<2x64x32xf32>
    %95 = arith.addf %89, %94 : vector<2x64x32xf32>
    %c0_36 = arith.constant 0 : index
    %c0_37 = arith.constant 0 : index
    %96 = vector.load %arg2[%c0_36, %c0_37] : memref<8x32xf32, #tpu.memory_space<vmem>>, vector<1x32xf32>
    %97 = vector.shape_cast %96 : vector<1x32xf32> to vector<1x1x32xf32>
    %98 = vector.broadcast %97 : vector<1x1x32xf32> to vector<2x64x32xf32>
    %99 = arith.mulf %84, %98 : vector<2x64x32xf32>
    %c1 = arith.constant 1 : index
    %c0_38 = arith.constant 0 : index
    %100 = vector.load %arg2[%c1, %c0_38] : memref<8x32xf32, #tpu.memory_space<vmem>>, vector<1x32xf32>
    %101 = vector.shape_cast %100 : vector<1x32xf32> to vector<1x1x32xf32>
    %102 = vector.broadcast %101 : vector<1x1x32xf32> to vector<2x64x32xf32>
    %103 = arith.mulf %68, %102 : vector<2x64x32xf32>
    %104 = arith.addf %99, %103 : vector<2x64x32xf32>
    %c2 = arith.constant 2 : index
    %c0_39 = arith.constant 0 : index
    %105 = vector.load %arg2[%c2, %c0_39] : memref<8x32xf32, #tpu.memory_space<vmem>>, vector<1x32xf32>
    %106 = vector.shape_cast %105 : vector<1x32xf32> to vector<1x1x32xf32>
    %107 = vector.broadcast %106 : vector<1x1x32xf32> to vector<2x64x32xf32>
    %108 = arith.mulf %95, %107 : vector<2x64x32xf32>
    %109 = arith.addf %104, %108 : vector<2x64x32xf32>
    %c3 = arith.constant 3 : index
    %c0_40 = arith.constant 0 : index
    %110 = vector.load %arg2[%c3, %c0_40] : memref<8x32xf32, #tpu.memory_space<vmem>>, vector<1x32xf32>
    %111 = vector.shape_cast %110 : vector<1x32xf32> to vector<1x1x32xf32>
    %112 = vector.broadcast %111 : vector<1x1x32xf32> to vector<2x64x32xf32>
    %113 = arith.addf %109, %112 : vector<2x64x32xf32>
    %114 = vector.shape_cast %113 : vector<2x64x32xf32> to vector<128x32xf32>
    %115 = arith.mulf %114, %67 : vector<128x32xf32>
    %c64 = arith.constant 64 : index
    %c0_41 = arith.constant 0 : index
    %116 = vector.load %arg3[%c64, %c0_41] : memref<96x32xf32, #tpu.memory_space<vmem>>, vector<32x32xf32>
    %cst_42 = arith.constant dense<0.000000e+00> : vector<128x32xf32>
    %117 = tpu.matmul %115, %116, %cst_42 {dimension_numbers = #tpu.dot_dimension_numbers<[1], [1], [0], [0], [0, 0, 1, 0], [], []>, precision = #tpu.contract_precision<fp32>} : vector<128x32xf32>, vector<32x32xf32>, vector<128x32xf32> -> vector<128x32xf32>
    %c6 = arith.constant 6 : index
    %c0_43 = arith.constant 0 : index
    %118 = vector.load %arg2[%c6, %c0_43] : memref<8x32xf32, #tpu.memory_space<vmem>>, vector<1x32xf32>
    %119 = vector.broadcast %118 : vector<1x32xf32> to vector<128x32xf32>
    %120 = arith.addf %117, %119 : vector<128x32xf32>
    %121 = vector.shape_cast %120 : vector<128x32xf32> to vector<2x64x32xf32>
    %122 = tpu.transpose %121, [0, 2, 1] : vector<2x64x32xf32> -> vector<2x32x64xf32>
    %c0_44 = arith.constant 0 : index
    %c0_45 = arith.constant 0 : index
    %c0_46 = arith.constant 0 : index
    %123 = vector.load %arg4[%c0_44, %c0_45, %c0_46] : memref<2x32x64xf32, #tpu.memory_space<vmem>>, vector<2x32x64xf32>
    tpu.vector_store %arg4[%c0_44, %c0_45, %c0_46], %122 {strides = array<i32>} : memref<2x32x64xf32, #tpu.memory_space<vmem>>, vector<2x32x64xf32>,
    return
  }
  func.func @transform_0(%arg0: i32) -> (i32, i32, i32) {
    %c0_i32 = arith.constant 0 : i32
    %c0_i32_0 = arith.constant 0 : i32
    %c0_i32_1 = arith.constant 0 : i32
    return %arg0, %c0_i32, %c0_i32_0 : i32, i32, i32
  }
  func.func @transform_1(%arg0: i32) -> (i32, i32) {
    %c0_i32 = arith.constant 0 : i32
    %c0_i32_0 = arith.constant 0 : i32
    %c0_i32_1 = arith.constant 0 : i32
    return %c0_i32, %c0_i32_0 : i32, i32
  }
  func.func @transform_2(%arg0: i32) -> (i32, i32) {
    %c0_i32 = arith.constant 0 : i32
    %c0_i32_0 = arith.constant 0 : i32
    %c0_i32_1 = arith.constant 0 : i32
    return %c0_i32, %c0_i32_0 : i32, i32
  }
  func.func @transform_3(%arg0: i32) -> (i32, i32, i32) {
    %c0_i32 = arith.constant 0 : i32
    %c0_i32_0 = arith.constant 0 : i32
    %c0_i32_1 = arith.constant 0 : i32
    return %arg0, %c0_i32, %c0_i32_0 : i32, i32, i32
  }
}

</mosaic_0001>

<bundles_post_ra>
// kernel: tpu_custom_call.1
= control target key start
LH: loop header
LB: loop body
LE: loop exit
PB: predicated region body
PF: predicated region fallthrough
CT: control target
= control target key end

     0   :  { %8 = vsyncpa [#allocation3], 0  ;;  %s7405_s0 = inlined_call_operand.vmem [shape: f32[8,64,32], index: 0, kind: input, shape index: {}]   ;;  %s7406_s1 = inlined_call_operand.vmem [shape: f32[8,32], index: 1, kind: input, shape index: {}]   ;;  %s7407_s2 = inlined_call_operand.vmem [shape: f32[96,32], index: 2, kind: input, shape index: {}]   ;;  %s7408_s3 = inlined_call_operand.hbm [shape: f32[8,32,64], index: 3, kind: output, shape index: {}]  }
   0x1   :  { %10 = vsyncpa [#allocation3 + $0x1], 0  ;;  %s4878_s12 = smov 0   ;;  %s4880_s13 = smov 0  }
   0x2   :  { %s4882_s14 = smov 0   ;;  %s4884_s15 = smov 0  }
   0x3 LB: > { %s4899_s16 = sadd.s32 4294967295, %s4850_s15   ;;  %s3920_s17 = sadd.s32 4294967294, %s4850_s15   ;;  %s4850_s15 = sphi %s4884_s15, %s7717_s15   ;;  %s4846_s14 = sphi %s4882_s14, %s7716_s14   ;;  %s4842_s13 = sphi %s4880_s13, %s7715_s13   ;;  %s4838_s12 = sphi %s4878_s12, %s7714_s12  }
   0x4   : > { %s4903_s18 = sadd.s32 1, %s4850_s15   ;;  %s91_s19 = sadd.s32 1, %s4846_s14 }
   0x5   : > { %s88_s20 = ssub.s32 %s4850_s15, %s4903_s18  ;;  %p101_p0 = scmp.ne.s32.totalorder %s4846_s14, %s4842_s13 }
   0x6   : > { %p89_p1 = scmp.eq.s32.totalorder %s88_s20, 0  ;;  %p102_p2 = scmp.eq.s32.totalorder %s4899_s16, 3 }
   0x7   : > { %p107_p3 = scmp.ne.s32.totalorder %s4842_s13, %s4838_s12  ;;  %p108_p4 = scmp.eq.s32.totalorder %s3920_s17, 3 }
   0x8   : > { %s4914_s21 = scalar_select %p89_p1, %s4846_s14, %s91_s19  }
   0x9   : > { %p4916_p5 = por %p102_p2, %p101_p0  ;;  %p4920_p6 = por %p108_p4, %p107_p3 }
   0xa   : > { %p3923_p7 = scmp.ge.s32.totalorder %s4850_s15, 1  ;;  %p142_p8 = scmp.lt.s32.totalorder %s4850_s15, 5 }
   0xc   : > { %p143_p9 = pnand %p3923_p7, %p142_p8 }
   0xe   : > { %146 = sbr.rel (%p143_p9) target bundleno = 1276 (0x4fc), region = 32 }
  0x13   : > { %s3925_s24 = sshll.u32 %s4899_s16, 1  ;;  %vm191_vm0 = vcmask 261120   ;;  %v407_v32 = vld [vmem:[%s7407_s2 + $0x38] sm:$0xff]  ;;  %v406_v33 = vld [vmem:[%s7407_s2 + $0x30] sm:$0xff]  ;;  %s4852_s29 = smov 32  }
  0x14   : > { %p168_p10 = scmp.lt.s32.totalorder %s3925_s24, 7  ;;  %v478_v34 = vsel %vm191_vm0, %v407_v32, 0  ;;  %v475_v35 = vsel %vm191_vm0, %v406_v33, 0  ;;  %s4853_s5 = smov 96  }
  0x15   : > { %v5020_v36 = vand.u32 4294901760, %v478_v34  ;;  %v5022_v37 = vand.u32 4294901760, %v475_v35  ;;  %s164_s8 = sand.u32 1, %s4842_s13   ;;  %s3951_s11 = sshll.u32 %s4899_s16, 10 }
  0x16   : > { %s7719_s24 = smov (!%p168_p10, %s3925_s24), 7  ;;  %s3924_s9 = sshll.u32 %s164_s8, 6 }
  0x17   : > { %s3949_s25 = sshll.u32 %s7719_s24, 6  ;;  %v5025_v38 = vsub.f32 %v478_v34, %v5020_v36  ;;  %v5028_v39 = vsub.f32 %v475_v35, %v5022_v37  ;;  %4216 = vmatprep.subr.mxu0 %v5020_v36  ;;  %s166_s10 = scalar_lea.vmem [#allocation2], %s3924_s9 }
  0x18   : > { %s4930_s28 = scalar_lea.vmem %s7405_s0, %s3949_s25  ;;  %4217 = vmatpush3.xpose.msra.mxu0 %v5020_v36  ;;  %s3858_s17 = sshll.u32 %s166_s10, 4  ;;  %s7362_s17 = int_to_ptr.vmem [resolvable:$true] %s3858_s17 }
  0x19   : > { %v4933_v0 = vld [vmem:[%s4930_s28] sm:$0xff]  ;;  %v4936_v1 = vld [vmem:[%s4930_s28 + $0x10] sm:$0xff]  ;;  %v4939_v2 = vld [vmem:[%s4930_s28 + $0x8] sm:$0xff]  ;;  %v5033_v40 = vand.u32 4294901760, %v5025_v38  ;;  %v5036_v41 = vand.u32 4294901760, %v5028_v39  ;;  %4218 = vmatprep.subr.mxu0 %v5022_v37  ;;  %s7360_s24 = scalar_lea.hbm %s7408_s3, %s3951_s11  ;;  %s7365_s25 = scalar_lea.sflag [#allocation3], %s164_s8 }
  0x1a   : > { %v192_v3 = vsel %vm191_vm0, %v4933_v0, 0.0  ;;  %v198_v4 = vsel %vm191_vm0, %v4936_v1, 0.0  ;;  %v4946_v5 = vld [vmem:[%s4930_s28 + $0x18] sm:$0xff]  ;;  %v195_v6 = vsel %vm191_vm0, %v4939_v2, 0.0  ;;  %v4953_v8 = vld [vmem:[%s4930_s28 + $0x20] sm:$0xff]  ;;  %v4956_v9 = vld [vmem:[%s4930_s28 + $0x28] sm:$0xff] }
  0x1b   : > { %193 = vadd.xlane.f32.xlu0 %v192_v3  ;;  %199 = vadd.xlane.f32.xlu1 %v198_v4  ;;  %v201_v7 = vsel %vm191_vm0, %v4946_v5, 0.0  ;;  %v204_v10 = vsel %vm191_vm0, %v4953_v8, 0.0  ;;  %v207_v11 = vsel %vm191_vm0, %v4956_v9, 0.0  ;;  %v4963_v12 = vld [vmem:[%s4930_s28 + $0x30] sm:$0xff]  ;;  %v4966_v13 = vld [vmem:[%s4930_s28 + $0x38] sm:$0xff]  ;;  %v4973_v16 = vld [vmem:[%s4930_s28 + $0x40] sm:$0xff]  ;;  %v733_v42 = vsub.f32 %v5025_v38, %v5033_v40 }
  0x1c   : > { %v210_v14 = vsel %vm191_vm0, %v4963_v12, 0.0  ;;  %v213_v15 = vsel %vm191_vm0, %v4966_v13, 0.0  ;;  %v4976_v17 = vld [vmem:[%s4930_s28 + $0x48] sm:$0xff]  ;;  %v216_v18 = vsel %vm191_vm0, %v4973_v16, 0.0  ;;  %v4983_v20 = vld [vmem:[%s4930_s28 + $0x50] sm:$0xff]  ;;  %v4986_v21 = vld [vmem:[%s4930_s28 + $0x58] sm:$0xff]  ;;  %v740_v43 = vsub.f32 %v5028_v39, %v5036_v41  ;;  %4219 = vmatpush3.xpose.msra.mxu0 %v5022_v37 }
  0x1d   : > { %v219_v19 = vsel %vm191_vm0, %v4976_v17, 0.0  ;;  %v222_v22 = vsel %vm191_vm0, %v4983_v20, 0.0  ;;  %v225_v23 = vsel %vm191_vm0, %v4986_v21, 0.0  ;;  %v4993_v24 = vld [vmem:[%s4930_s28 + $0x60] sm:$0xff]  ;;  %v4996_v25 = vld [vmem:[%s4930_s28 + $0x68] sm:$0xff]  ;;  %v5003_v28 = vld [vmem:[%s4930_s28 + $0x70] sm:$0xff] }
  0x1e   : > { %v228_v26 = vsel %vm191_vm0, %v4993_v24, 0.0  ;;  %v231_v27 = vsel %vm191_vm0, %v4996_v25, 0.0  ;;  %v5006_v29 = vld [vmem:[%s4930_s28 + $0x78] sm:$0xff]  ;;  %v234_v30 = vsel %vm191_vm0, %v5003_v28, 0.0  ;;  %v734_v44 = vand.u32 4294901760, %v733_v42  ;;  %s4790_s16 = scalar_lea.vmem %s7362_s17, 1024 }
  0x1f   : > { %196 = vadd.xlane.f32.xlu0 %v195_v6  ;;  %202 = vadd.xlane.f32.xlu1 %v201_v7  ;;  %v237_v31 = vsel %vm191_vm0, %v5006_v29, 0.0  ;;  %v741_v45 = vand.u32 4294901760, %v740_v43  ;;  %p4791_p11 = scmp.ne.s32.totalorder %s7362_s17, %s4790_s16  ;;  %s4855_s26 = smov [#allocation2]  }
  0x20   : > { %4256 = vmatprep.subr.mxu1 %v734_v44  ;;  %s4794_s27 = sshll.u32 %s4855_s26, 4  ;;  %s4795_s27 = int_to_ptr.vmem [resolvable:$false] %s4794_s27 }
  0x21   : > { %4257 = vmatpush3.xpose.msra.mxu1 %v734_v44  ;;  %p4792_p12 = pnand %p4791_p11, %p4916_p5  ;;  %s4796_s28 = scalar_lea.vmem %s4795_s27, 2048 }
  0x22   : > { %4258 = vmatprep.subr.mxu1 %v741_v45  ;;  %p4797_p0 = scmp.lt.s32.totalorder %s7362_s17, %s4795_s27  ;;  %p4798_p1 = scmp.lt.s32.totalorder %s4796_s28, %s4790_s16 }
  0x23   : > { %205 = vadd.xlane.f32.xlu0 %v204_v10  ;;  %208 = vadd.xlane.f32.xlu1 %v207_v11  ;;  %p4793_p13 = pneg %p4792_p12 }
  0x24   : > { %p4799_p2 = por %p4798_p1, %p4797_p0 }
  0x25   : > { %4259 = vmatpush3.xpose.msra.mxu1 %v741_v45 }
  0x26   : > { %p4800_p3 = pnand %p4799_p2, %p4793_p13 }
  0x27   : > { %211 = vadd.xlane.f32.xlu0 %v210_v14  ;;  %214 = vadd.xlane.f32.xlu1 %v213_v15 }
  0x2b   : > { %217 = vadd.xlane.f32.xlu0 %v216_v18  ;;  %220 = vadd.xlane.f32.xlu1 %v219_v19 }
  0x2f   : > { %223 = vadd.xlane.f32.xlu0 %v222_v22  ;;  %226 = vadd.xlane.f32.xlu1 %v225_v23 }
  0x33   : > { %229 = vadd.xlane.f32.xlu0 %v228_v26  ;;  %232 = vadd.xlane.f32.xlu1 %v231_v27  ;;  %v404_v26 = vld [vmem:[%s7407_s2 + $0x20] sm:$0xff] }
  0x34   : > { %v469_v42 = vsel %vm191_vm0, %v404_v26, 0 }
  0x37   : > { %235 = vadd.xlane.f32.xlu0 %v234_v30  ;;  %238 = vadd.xlane.f32.xlu1 %v237_v31 }
  0xa4   : > { %v194_v46 = vpop.xlane.xlu0 %193  ;;  %v200_v47 = vpop.xlane.xlu1 %199 }
  0xa5   : > { %v240_v48 = vmul.f32 0.03125, %v194_v46  ;;  %v242_v49 = vmul.f32 0.03125, %v200_v47  ;;  %v5110_v46 = vand.u32 4294901760, %v469_v42  ;;  %v403_v47 = vld [vmem:[%s7407_s2 + $0x18] sm:$0xff] }
  0xa7   : > { %v5045_v50 = vsub.f32 %v4933_v0, %v240_v48  ;;  %v5048_v51 = vsub.f32 %v4936_v1, %v242_v49 }
  0xa8   : > { %v197_v52 = vpop.xlane.xlu0 %196  ;;  %v203_v53 = vpop.xlane.xlu1 %202 }
  0xa9   : > { %v241_v54 = vmul.f32 0.03125, %v197_v52  ;;  %v243_v55 = vmul.f32 0.03125, %v203_v53  ;;  %v272_v56 = vmul.f32 %v5045_v50, %v5045_v50  ;;  %v274_v57 = vmul.f32 %v5048_v51, %v5048_v51 }
  0xab   : > { %v5055_v58 = vsub.f32 %v4939_v2, %v241_v54  ;;  %v5058_v59 = vsub.f32 %v4946_v5, %v243_v55  ;;  %v288_v60 = vsel %vm191_vm0, %v272_v56, 0.0  ;;  %v294_v63 = vsel %vm191_vm0, %v274_v57, 0.0  ;;  %v405_v2 = vld [vmem:[%s7407_s2 + $0x28] sm:$0xff] }
  0xac   : > { %289 = vadd.xlane.f32.xlu0 %v288_v60  ;;  %v206_v61 = vpop.xlane.xlu0 %205  ;;  %v209_v62 = vpop.xlane.xlu1 %208  ;;  %v472_v5 = vsel %vm191_vm0, %v405_v2, 0  ;;  %v5124_v57 = vsub.f32 %v469_v42, %v5110_v46  ;;  %v466_v60 = vsel %vm191_vm0, %v403_v47, 0 }
  0xad   : > { %v244_v0 = vmul.f32 0.03125, %v206_v61  ;;  %v245_v1 = vmul.f32 0.03125, %v209_v62  ;;  %v273_v3 = vmul.f32 %v5055_v58, %v5055_v58  ;;  %v275_v4 = vmul.f32 %v5058_v59, %v5058_v59 }
  0xae   : > { %v5078_v18 = vand.u32 4294901760, %v472_v5 }
  0xaf   : > { %v5071_v6 = vsub.f32 %v4953_v8, %v244_v0  ;;  %v5074_v7 = vsub.f32 %v4956_v9, %v245_v1  ;;  %v291_v10 = vsel %vm191_vm0, %v273_v3, 0.0  ;;  %v297_v15 = vsel %vm191_vm0, %v275_v4, 0.0  ;;  %v402_v1 = vld [vmem:[%s7407_s2 + $0x10] sm:$0xff] }
  0xb0   : > { %295 = vadd.xlane.f32.xlu0 %v294_v63  ;;  %292 = vadd.xlane.f32.xlu1 %v291_v10  ;;  %v212_v11 = vpop.xlane.xlu0 %211  ;;  %v215_v14 = vpop.xlane.xlu1 %214  ;;  %v5085_v9 = vsub.f32 %v472_v5, %v5078_v18  ;;  %v5133_v63 = vand.u32 4294901760, %v5124_v57  ;;  %v5135_v0 = vand.u32 4294901760, %v466_v60 }
  0xb1   : > { %v246_v19 = vmul.f32 0.03125, %v212_v11  ;;  %v247_v22 = vmul.f32 0.03125, %v215_v14  ;;  %v276_v23 = vmul.f32 %v5071_v6, %v5071_v6  ;;  %v277_v8 = vmul.f32 %v5074_v7, %v5074_v7  ;;  %4220 = vmatprep.subr.mxu0 %v5078_v18 }
  0xb2   : > { %4221 = vmatpush3.xpose.msra.mxu0 %v5078_v18  ;;  %v5101_v35 = vand.u32 4294901760, %v5085_v9  ;;  %v754_v14 = vsub.f32 %v5124_v57, %v5133_v63 }
  0xb3   : > { %v5092_v27 = vsub.f32 %v4963_v12, %v246_v19  ;;  %v5095_v30 = vsub.f32 %v4966_v13, %v247_v22  ;;  %v300_v31 = vsel %vm191_vm0, %v276_v23, 0.0  ;;  %v303_v34 = vsel %vm191_vm0, %v277_v8, 0.0  ;;  %4222 = vmatprep.subr.mxu0 %v5110_v46 }
  0xb4   : > { %298 = vadd.xlane.f32.xlu1 %v297_v15  ;;  %301 = vadd.xlane.f32.xlu0 %v300_v31  ;;  %v218_v32 = vpop.xlane.xlu0 %217  ;;  %v221_v33 = vpop.xlane.xlu1 %220  ;;  %v747_v45 = vsub.f32 %v5085_v9, %v5101_v35  ;;  %v5152_v15 = vsub.f32 %v466_v60, %v5135_v0  ;;  %v755_v8 = vand.u32 4294901760, %v754_v14  ;;  %v400_v60 = vld [vmem:[%s7407_s2] sm:$0xff] }
  0xb5   : > { %v248_v12 = vmul.f32 0.03125, %v218_v32  ;;  %v249_v43 = vmul.f32 0.03125, %v221_v33  ;;  %v278_v13 = vmul.f32 %v5092_v27, %v5092_v27  ;;  %v279_v44 = vmul.f32 %v5095_v30, %v5095_v30  ;;  %v401_v32 = vld [vmem:[%s7407_s2 + $0x8] sm:$0xff] }
  0xb6   : > { %v748_v56 = vand.u32 4294901760, %v747_v45  ;;  %4223 = vmatpush3.xpose.msra.mxu0 %v5110_v46  ;;  %v5161_v26 = vand.u32 4294901760, %v5152_v15 }
  0xb7   : > { %v5116_v48 = vsub.f32 %v4973_v16, %v248_v12  ;;  %v5119_v49 = vsub.f32 %v4976_v17, %v249_v43  ;;  %v306_v52 = vsel %vm191_vm0, %v278_v13, 0.0  ;;  %v309_v55 = vsel %vm191_vm0, %v279_v44, 0.0  ;;  %4224 = vmatprep.subr.mxu0 %v5135_v0 }
  0xb8   : > { %304 = vadd.xlane.f32.xlu1 %v303_v34  ;;  %307 = vadd.xlane.f32.xlu0 %v306_v52  ;;  %v224_v53 = vpop.xlane.xlu0 %223  ;;  %v227_v54 = vpop.xlane.xlu1 %226  ;;  %v761_v44 = vsub.f32 %v5152_v15, %v5161_v26 }
  0xb9   : > { %v250_v61 = vmul.f32 0.03125, %v224_v53  ;;  %v251_v16 = vmul.f32 0.03125, %v227_v54  ;;  %v280_v17 = vmul.f32 %v5116_v48, %v5116_v48  ;;  %v281_v62 = vmul.f32 %v5119_v49, %v5119_v49  ;;  %4260 = vmatprep.subr.mxu1 %v748_v56 }
  0xba   : > { %4261 = vmatpush3.xpose.msra.mxu1 %v748_v56  ;;  %4225 = vmatpush3.xpose.msra.mxu0 %v5135_v0  ;;  %v762_v54 = vand.u32 4294901760, %v761_v44 }
  0xbb   : > { %v5142_v3 = vsub.f32 %v4983_v20, %v250_v61  ;;  %v5145_v4 = vsub.f32 %v4986_v21, %v251_v16  ;;  %v312_v2 = vsel %vm191_vm0, %v280_v17, 0.0  ;;  %v315_v11 = vsel %vm191_vm0, %v281_v62, 0.0  ;;  %4262 = vmatprep.subr.mxu1 %v755_v8 }
  0xbc   : > { %310 = vadd.xlane.f32.xlu1 %v309_v55  ;;  %313 = vadd.xlane.f32.xlu0 %v312_v2  ;;  %v230_v5 = vpop.xlane.xlu0 %229  ;;  %v233_v10 = vpop.xlane.xlu1 %232  ;;  %v463_v20 = vsel %vm191_vm0, %v402_v1, 0  ;;  %v457_v2 = vsel %vm191_vm0, %v400_v60, 0 }
  0xbd   : > { %v252_v19 = vmul.f32 0.03125, %v230_v5  ;;  %v253_v21 = vmul.f32 0.03125, %v233_v10  ;;  %v282_v22 = vmul.f32 %v5142_v3, %v5142_v3  ;;  %v283_v23 = vmul.f32 %v5145_v4, %v5145_v4 }
  0xbe   : > { %v5163_v31 = vand.u32 4294901760, %v463_v20  ;;  %4263 = vmatpush3.xpose.msra.mxu1 %v755_v8  ;;  %v5215_v10 = vand.u32 4294901760, %v457_v2 }
  0xbf   : > { %v5170_v33 = vsub.f32 %v4993_v24, %v252_v19  ;;  %v5173_v34 = vsub.f32 %v4996_v25, %v253_v21  ;;  %v318_v42 = vsel %vm191_vm0, %v282_v22, 0.0  ;;  %v321_v13 = vsel %vm191_vm0, %v283_v23, 0.0  ;;  %4264 = vmatprep.subr.mxu1 %v762_v54 }
  0xc0   : > { %316 = vadd.xlane.f32.xlu1 %v315_v11  ;;  %319 = vadd.xlane.f32.xlu0 %v318_v42  ;;  %v236_v12 = vpop.xlane.xlu0 %235  ;;  %v239_v43 = vpop.xlane.xlu1 %238  ;;  %v5180_v45 = vsub.f32 %v463_v20, %v5163_v31  ;;  %v460_v24 = vsel %vm191_vm0, %v401_v32, 0  ;;  %v5224_v19 = vsub.f32 %v457_v2, %v5215_v10 }
  0xc1   : > { %v254_v47 = vmul.f32 0.03125, %v236_v12  ;;  %v255_v52 = vmul.f32 0.03125, %v239_v43  ;;  %v284_v25 = vmul.f32 %v5170_v33, %v5170_v33  ;;  %v285_v53 = vmul.f32 %v5173_v34, %v5173_v34  ;;  %4226 = vmatprep.subr.mxu0 %v5163_v31 }
  0xc2   : > { %v5189_v55 = vand.u32 4294901760, %v5180_v45  ;;  %v5191_v56 = vand.u32 4294901760, %v460_v24  ;;  %4227 = vmatpush3.xpose.msra.mxu0 %v5163_v31  ;;  %4265 = vmatpush3.xpose.msra.mxu1 %v762_v54  ;;  %v5231_v23 = vand.u32 4294901760, %v5224_v19 }
  0xc3   : > { %v5198_v61 = vsub.f32 %v5003_v28, %v254_v47  ;;  %v5201_v16 = vsub.f32 %v5006_v29, %v255_v52  ;;  %v324_v17 = vsel %vm191_vm0, %v284_v25, 0.0  ;;  %v327_v5 = vsel %vm191_vm0, %v285_v53, 0.0 }
  0xc4   : > { %322 = vadd.xlane.f32.xlu1 %v321_v13  ;;  %325 = vadd.xlane.f32.xlu0 %v324_v17  ;;  %v768_v62 = vsub.f32 %v5180_v45, %v5189_v55  ;;  %v5207_v1 = vsub.f32 %v460_v24, %v5191_v56  ;;  %v782_v32 = vsub.f32 %v5224_v19, %v5231_v23  ;;  %v3929_v13 = vld [vmem:[%s7406_s1 + $0x5] ss:$0 sm:$0xff] }
  0xc5   : > { %v286_v28 = vmul.f32 %v5198_v61, %v5198_v61  ;;  %v287_v29 = vmul.f32 %v5201_v16, %v5201_v16  ;;  %4228 = vmatprep.subr.mxu0 %v5191_v56 }
  0xc6   : > { %v769_v11 = vand.u32 4294901760, %v768_v62  ;;  %v5219_v14 = vand.u32 4294901760, %v5207_v1  ;;  %4229 = vmatpush3.xpose.msra.mxu0 %v5191_v56  ;;  %v783_v42 = vand.u32 4294901760, %v782_v32 }
  0xc7   : > { %v330_v20 = vsel %vm191_vm0, %v286_v28, 0.0  ;;  %4230 = vmatprep.subr.mxu0 %v5215_v10  ;;  %v333_v22 = vsel %vm191_vm0, %v287_v29, 0.0 }
  0xc8   : > { %328 = vadd.xlane.f32.xlu1 %v327_v5  ;;  %331 = vadd.xlane.f32.xlu0 %v330_v20  ;;  %v775_v21 = vsub.f32 %v5207_v1, %v5219_v14 }
  0xc9   : > { %4266 = vmatprep.subr.mxu1 %v769_v11 }
  0xca   : > { %4267 = vmatpush3.xpose.msra.mxu1 %v769_v11  ;;  %v776_v8 = vand.u32 4294901760, %v775_v21  ;;  %4231 = vmatpush3.xpose.msra.mxu0 %v5215_v10 }
  0xcb   : > { %4296 = vmatprep.subr.mxu0 %v5025_v38 }
  0xcc   : > { %334 = vadd.xlane.f32.xlu1 %v333_v22  ;;  %4268 = vmatprep.subr.mxu1 %v776_v8 }
  0xce   : > { %4269 = vmatpush3.xpose.msra.mxu1 %v776_v8 }
  0xcf   : > { %4270 = vmatprep.subr.mxu1 %v783_v42 }
  0xd2   : > { %4271 = vmatpush3.xpose.msra.mxu1 %v783_v42 }
  0xd3   : > { %4336 = vmatprep.subr.mxu1 %v5020_v36 }
  0xde   : > { %2105 = vrot.lane.b32.xlu0 %v3929_v13, %s4852_s29 }
 0x135   : > { %v290_v12 = vpop.xlane.xlu0 %289 }
 0x136   : > { %v336_v43 = vmul.f32 0.03125, %v290_v12 }
 0x138   : > { %v352_v44 = vadd.f32 1e-05, %v336_v43 }
 0x139   : > { %v293_v24 = vpop.xlane.xlu1 %292  ;;  %v296_v47 = vpop.xlane.xlu0 %295 }
 0x13a   : > { %4693 = vrsqrt.f32 %v352_v44  ;;  %v337_v52 = vmul.f32 0.03125, %v293_v24  ;;  %v338_v25 = vmul.f32 0.03125, %v296_v47 }
 0x13c   : > { %v353_v53 = vadd.f32 1e-05, %v337_v52  ;;  %v354_v54 = vadd.f32 1e-05, %v338_v25 }
 0x13d   : > { %v299_v60 = vpop.xlane.xlu1 %298  ;;  %v302_v17 = vpop.xlane.xlu0 %301 }
 0x13e   : > { %4695 = vrsqrt.f32 %v353_v53  ;;  %v339_v62 = vmul.f32 0.03125, %v299_v60  ;;  %v340_v2 = vmul.f32 0.03125, %v302_v17 }
 0x13f   : > { %4697 = vrsqrt.f32 %v354_v54 }
 0x140   : > { %v355_v5 = vadd.f32 1e-05, %v339_v62  ;;  %v356_v28 = vadd.f32 1e-05, %v340_v2 }
 0x141   : > { %v305_v29 = vpop.xlane.xlu1 %304  ;;  %v308_v11 = vpop.xlane.xlu0 %307 }
 0x142   : > { %4699 = vrsqrt.f32 %v355_v5  ;;  %v341_v20 = vmul.f32 0.03125, %v305_v29  ;;  %v342_v21 = vmul.f32 0.03125, %v308_v11 }
 0x143   : > { %4701 = vrsqrt.f32 %v356_v28 }
 0x144   : > { %v357_v22 = vadd.f32 1e-05, %v341_v20  ;;  %v358_v8 = vadd.f32 1e-05, %v342_v21 }
 0x145   : > { %v311_v32 = vpop.xlane.xlu1 %310  ;;  %v314_v42 = vpop.xlane.xlu0 %313 }
 0x146   : > { %4703 = vrsqrt.f32 %v357_v22  ;;  %v343_v12 = vmul.f32 0.03125, %v311_v32  ;;  %v344_v43 = vmul.f32 0.03125, %v314_v42 }
 0x147   : > { %v4694_v13 = vpop.eup %4693  ;;  %4705 = vrsqrt.f32 %v358_v8 }
 0x148   : > { %v359_v44 = vadd.f32 1e-05, %v343_v12  ;;  %v360_v24 = vadd.f32 1e-05, %v344_v43  ;;  %v384_v47 = vmul.f32 %v4694_v13, %v5045_v50 }
 0x149   : > { %v317_v52 = vpop.xlane.xlu1 %316  ;;  %v320_v25 = vpop.xlane.xlu0 %319 }
 0x14a   : > { %4707 = vrsqrt.f32 %v359_v44  ;;  %v345_v53 = vmul.f32 0.03125, %v317_v52  ;;  %v346_v54 = vmul.f32 0.03125, %v320_v25  ;;  %v409_v60 = vsel %vm191_vm0, %v384_v47, 0 }
 0x14b   : > { %v4696_v17 = vpop.eup %4695  ;;  %4709 = vrsqrt.f32 %v360_v24  ;;  %v5243_v62 = vand.u32 4294901760, %v409_v60 }
 0x14c   : > { %v4698_v2 = vpop.eup %4697  ;;  %v361_v5 = vadd.f32 1e-05, %v345_v53  ;;  %v362_v28 = vadd.f32 1e-05, %v346_v54  ;;  %v385_v29 = vmul.f32 %v4696_v17, %v5055_v58 }
 0x14d   : > { %v323_v11 = vpop.xlane.xlu1 %322  ;;  %4272 = vmatprep.mubr.f32.mxu1 %v5243_v62  ;;  %v326_v50 = vpop.xlane.xlu0 %325  ;;  %v386_v20 = vmul.f32 %v4698_v2, %v5048_v51  ;;  %v5249_v21 = vsub.f32 %v409_v60, %v5243_v62 }
 0x14e   : > { %4711 = vrsqrt.f32 %v361_v5  ;;  %v347_v22 = vmul.f32 0.03125, %v323_v11  ;;  %v348_v8 = vmul.f32 0.03125, %v326_v50  ;;  %v412_v32 = vsel %vm191_vm0, %v385_v29, 0 }
 0x14f   : > { %v4700_v42 = vpop.eup %4699  ;;  %4713 = vrsqrt.f32 %v362_v28  ;;  %v5252_v12 = vand.u32 4294901760, %v412_v32  ;;  %v415_v58 = vsel %vm191_vm0, %v386_v20, 0  ;;  %v555_v43 = vand.u32 4294901760, %v5249_v21 }
 0x150   : > { %v4702_v13 = vpop.eup %4701  ;;  %v363_v44 = vadd.f32 1e-05, %v347_v22  ;;  %v364_v24 = vadd.f32 1e-05, %v348_v8  ;;  %v5256_v51 = vand.u32 4294901760, %v415_v58  ;;  %v387_v47 = vmul.f32 %v4700_v42, %v5058_v59 }
 0x151   : > { %v329_v52 = vpop.xlane.xlu1 %328  ;;  %4273 = vmatmul.mubr.f32.vlgmr.msra.gmra.mxu1 %v5252_v12  ;;  %v332_v25 = vpop.xlane.xlu0 %331  ;;  %v556_v53 = vsub.f32 %v5249_v21, %v555_v43  ;;  %v388_v54 = vmul.f32 %v4702_v13, %v5071_v6  ;;  %v5265_v60 = vsub.f32 %v412_v32, %v5252_v12 }
 0x152   : > { %4715 = vrsqrt.f32 %v363_v44  ;;  %v349_v17 = vmul.f32 0.03125, %v329_v52  ;;  %v350_v2 = vmul.f32 0.03125, %v332_v25  ;;  %4275 = vmatprep.mubr.f32.mxu1 %v5256_v51  ;;  %4337 = vmatpush3.xpose.msra.mxu1 %v5020_v36  ;;  %v418_v59 = vsel %vm191_vm0, %v387_v47, 0 }
 0x153   : > { %v4704_v5 = vpop.eup %4703  ;;  %4717 = vrsqrt.f32 %v364_v24  ;;  %v557_v28 = vand.u32 4294901760, %v556_v53  ;;  %v5270_v29 = vand.u32 4294901760, %v418_v59  ;;  %4338 = vmatprep.subr.mxu1 %v5022_v37  ;;  %v421_v6 = vsel %vm191_vm0, %v388_v54, 0 }
 0x154   : > { %v4706_v11 = vpop.eup %4705  ;;  %v365_v50 = vadd.f32 1e-05, %v349_v17  ;;  %v366_v20 = vadd.f32 1e-05, %v350_v2  ;;  %v5274_v22 = vand.u32 4294901760, %v421_v6  ;;  %v7416_v8 = vand.u32 4294901760, %v5265_v60 }
 0x155   : > { %v335_v32 = vpop.xlane.xlu1 %334  ;;  %4232 = vmatprep.mubr.f32.mxu0 %v557_v28  ;;  %4276 = vmatmul.mubr.f32.gmra.mxu1 %v5270_v29  ;;  %v389_v42 = vmul.f32 %v4704_v5, %v5074_v7  ;;  %v5280_v13 = vsub.f32 %v415_v58, %v5256_v51  ;;  %v390_v44 = vmul.f32 %v4706_v11, %v5092_v27 }
 0x156   : > { %4719 = vrsqrt.f32 %v365_v50  ;;  %v351_v24 = vmul.f32 0.03125, %v335_v32  ;;  %4278 = vmatprep.mubr.f32.mxu1 %v5274_v22  ;;  %4339 = vmatpush3.xpose.msra.mxu1 %v5022_v37  ;;  %v566_v47 = vsub.f32 %v5265_v60, %v7416_v8  ;;  %v5289_v52 = vsub.f32 %v418_v59, %v5270_v29 }
 0x157   : > { %v4708_v25 = vpop.eup %4707  ;;  %4721 = vrsqrt.f32 %v366_v20  ;;  %v424_v7 = vsel %vm191_vm0, %v389_v42, 0  ;;  %4340 = vmatprep.subr.mxu1 %v5078_v18  ;;  %v7413_v27 = vand.u32 4294901760, %v5280_v13  ;;  %v427_v58 = vsel %vm191_vm0, %v390_v44, 0 }
 0x158   : > { %v4710_v53 = vpop.eup %4709  ;;  %v367_v54 = vadd.f32 1e-05, %v351_v24  ;;  %v567_v17 = vand.u32 4294901760, %v566_v47  ;;  %v5295_v2 = vand.u32 4294901760, %v424_v7  ;;  %v5297_v5 = vand.u32 4294901760, %v427_v58 }
 0x159   : > { %v576_v59 = vsub.f32 %v5280_v13, %v7413_v27  ;;  %v7410_v28 = vand.u32 4294901760, %v5289_v52  ;;  %v391_v11 = vmul.f32 %v4708_v25, %v5095_v30  ;;  %v5305_v50 = vsub.f32 %v421_v6, %v5274_v22 }
 0x15a   : > { %4723 = vrsqrt.f32 %v367_v54  ;;  %4233 = vmatmul.mubr.f32.vlgmr.msra.gmra.mxu0 %v567_v17  ;;  %4279 = vmatmul.mubr.f32.gmra.mxu1 %v5295_v2  ;;  %v392_v20 = vmul.f32 %v4710_v53, %v5116_v48  ;;  %v5310_v32 = vsub.f32 %v424_v7, %v5295_v2  ;;  %v5313_v42 = vsub.f32 %v427_v58, %v5297_v5 }
 0x15b   : > { %v4712_v44 = vpop.eup %4711  ;;  %4297 = vmatpush3.xpose.msra.mxu0 %v5025_v38  ;;  %v577_v24 = vand.u32 4294901760, %v576_v59  ;;  %4281 = vmatprep.mubr.f32.mxu1 %v5297_v5  ;;  %v586_v30 = vsub.f32 %v5289_v52, %v7410_v28  ;;  %v430_v6 = vsel %vm191_vm0, %v391_v11, 0  ;;  %v7409_v48 = vand.u32 4294901760, %v5305_v50 }
 0x15c   : > { %v4714_v47 = vpop.eup %4713  ;;  %4341 = vmatpush3.xpose.msra.mxu1 %v5078_v18  ;;  %4298 = vmatprep.subr.mxu0 %v5028_v39  ;;  %v5324_v25 = vand.u32 4294901760, %v430_v6  ;;  %v433_v38 = vsel %vm191_vm0, %v392_v20, 0  ;;  %v7411_v7 = vand.u32 4294901760, %v5310_v32  ;;  %v393_v58 = vmul.f32 %v4712_v44, %v5119_v49 }
 0x15d   : > { %4235 = vmatprep.mubr.f32.mxu0 %v577_v24  ;;  %v587_v53 = vand.u32 4294901760, %v586_v30  ;;  %4342 = vmatprep.subr.mxu1 %v5110_v46  ;;  %v596_v54 = vsub.f32 %v5305_v50, %v7409_v48  ;;  %v5333_v17 = vand.u32 4294901760, %v433_v38  ;;  %v7412_v59 = vand.u32 4294901760, %v5313_v42 }
 0x15e   : > { %4282 = vmatmul.mubr.f32.gmra.mxu1 %v5324_v25  ;;  %v606_v11 = vsub.f32 %v5310_v32, %v7411_v7  ;;  %v436_v49 = vsel %vm191_vm0, %v393_v58, 0  ;;  %v394_v20 = vmul.f32 %v4714_v47, %v5142_v3  ;;  %v5343_v44 = vsub.f32 %v430_v6, %v5324_v25 }
 0x15f   : > { %v4716_v24 = vpop.eup %4715  ;;  %4236 = vmatmul.mubr.f32.gmra.mxu0 %v587_v53  ;;  %v597_v30 = vand.u32 4294901760, %v596_v54  ;;  %4284 = vmatprep.mubr.f32.mxu1 %v5333_v17  ;;  %v5346_v48 = vand.u32 4294901760, %v436_v49  ;;  %v616_v28 = vsub.f32 %v5313_v42, %v7412_v59  ;;  %v5352_v7 = vsub.f32 %v433_v38, %v5333_v17 }
 0x160   : > { %v4718_v58 = vpop.eup %4717  ;;  %4299 = vmatpush3.xpose.msra.mxu0 %v5028_v39  ;;  %4343 = vmatpush3.xpose.msra.mxu1 %v5110_v46  ;;  %v607_v3 = vand.u32 4294901760, %v606_v11  ;;  %v439_v6 = vsel %vm191_vm0, %v394_v20, 0  ;;  %v7414_v47 = vand.u32 4294901760, %v5343_v44  ;;  %v395_v53 = vmul.f32 %v4716_v24, %v5145_v4 }
 0x161   : > { %4238 = vmatprep.mubr.f32.mxu0 %v597_v30  ;;  %4300 = vmatprep.subr.mxu0 %v5085_v9  ;;  %v617_v54 = vand.u32 4294901760, %v616_v28  ;;  %v5360_v59 = vand.u32 4294901760, %v439_v6  ;;  %v7415_v38 = vand.u32 4294901760, %v5352_v7  ;;  %v396_v27 = vmul.f32 %v4718_v58, %v5170_v33 }
 0x162   : > { %4285 = vmatmul.mubr.f32.gmra.mxu1 %v5346_v48  ;;  %4344 = vmatprep.subr.mxu1 %v5135_v0  ;;  %v626_v39 = vsub.f32 %v5343_v44, %v7414_v47  ;;  %v442_v4 = vsel %vm191_vm0, %v395_v53, 0  ;;  %v5371_v11 = vsub.f32 %v436_v49, %v5346_v48 }
 0x163   : > { %v4720_v28 = vpop.eup %4719  ;;  %4239 = vmatmul.mubr.f32.gmra.mxu0 %v607_v3  ;;  %4287 = vmatprep.mubr.f32.mxu1 %v5360_v59  ;;  %v5374_v20 = vand.u32 4294901760, %v442_v4  ;;  %v636_v33 = vsub.f32 %v5352_v7, %v7415_v38  ;;  %v445_v24 = vsel %vm191_vm0, %v396_v27, 0  ;;  %v5381_v30 = vsub.f32 %v439_v6, %v5360_v59 }
 0x164   : > { %v4722_v58 = vpop.eup %4721  ;;  %4301 = vmatpush3.xpose.msra.mxu0 %v5085_v9  ;;  %4241 = vmatprep.mubr.f32.mxu0 %v617_v54  ;;  %v627_v49 = vand.u32 4294901760, %v626_v39  ;;  %v5384_v53 = vand.u32 4294901760, %v445_v24  ;;  %v7417_v3 = vand.u32 4294901760, %v5371_v11  ;;  %v397_v47 = vmul.f32 %v4720_v28, %v5173_v34 }
 0x165   : > { %4345 = vmatpush3.xpose.msra.mxu1 %v5135_v0  ;;  %4302 = vmatprep.subr.mxu0 %v5124_v57  ;;  %v637_v38 = vand.u32 4294901760, %v636_v33  ;;  %v7418_v27 = vand.u32 4294901760, %v5381_v30  ;;  %v398_v6 = vmul.f32 %v4722_v58, %v5198_v61  ;;  %v5393_v8 = vsub.f32 %v442_v4, %v5374_v20 }
 0x166   : > { %4288 = vmatmul.mubr.f32.gmra.mxu1 %v5374_v20  ;;  %4346 = vmatprep.subr.mxu1 %v5163_v31  ;;  %v646_v9 = vsub.f32 %v5371_v11, %v7417_v3  ;;  %v448_v34 = vsel %vm191_vm0, %v397_v47, 0  ;;  %v5402_v54 = vsub.f32 %v445_v24, %v5384_v53 }
 0x167   : > { %v4724_v39 = vpop.eup %4723  ;;  %4242 = vmatmul.mubr.f32.gmra.mxu0 %v627_v49  ;;  %4290 = vmatprep.mubr.f32.mxu1 %v5384_v53  ;;  %v5405_v61 = vand.u32 4294901760, %v448_v34  ;;  %v656_v4 = vsub.f32 %v5381_v30, %v7418_v27  ;;  %v451_v28 = vsel %vm191_vm0, %v398_v6, 0  ;;  %v665_v33 = vand.u32 4294901760, %v5393_v8 }
 0x168   : > { %4303 = vmatpush3.xpose.msra.mxu0 %v5124_v57  ;;  %4244 = vmatprep.mubr.f32.mxu0 %v637_v38  ;;  %v647_v47 = vand.u32 4294901760, %v646_v9  ;;  %v5413_v24 = vand.u32 4294901760, %v451_v28  ;;  %v399_v58 = vmul.f32 %v4724_v39, %v5201_v16  ;;  %v675_v49 = vand.u32 4294901760, %v5402_v54 }
 0x169   : > { %4347 = vmatpush3.xpose.msra.mxu1 %v5163_v31  ;;  %4304 = vmatprep.subr.mxu0 %v5152_v15  ;;  %v657_v3 = vand.u32 4294901760, %v656_v4  ;;  %v666_v6 = vsub.f32 %v5393_v8, %v665_v33  ;;  %v5423_v27 = vsub.f32 %v448_v34, %v5405_v61 }
 0x16a   : > { %4291 = vmatmul.mubr.f32.gmra.mxu1 %v5405_v61  ;;  %4348 = vmatprep.subr.mxu1 %v5191_v56  ;;  %v454_v57 = vsel %vm191_vm0, %v399_v58, 0  ;;  %v676_v16 = vsub.f32 %v5402_v54, %v675_v49  ;;  %v5432_v38 = vsub.f32 %v451_v28, %v5413_v24 }
 0x16b   : > { %4245 = vmatmul.mubr.f32.gmra.mxu0 %v647_v47  ;;  %4293 = vmatprep.mubr.f32.mxu1 %v5413_v24  ;;  %v667_v9 = vand.u32 4294901760, %v666_v6  ;;  %v5435_v39 = vand.u32 4294901760, %v454_v57  ;;  %v685_v34 = vand.u32 4294901760, %v5423_v27 }
 0x16c   : > { %4305 = vmatpush3.xpose.msra.mxu0 %v5152_v15  ;;  %4247 = vmatprep.mubr.f32.mxu0 %v657_v3  ;;  %v677_v4 = vand.u32 4294901760, %v676_v16  ;;  %v695_v58 = vand.u32 4294901760, %v5432_v38 }
 0x16d   : > { %4349 = vmatpush3.xpose.msra.mxu1 %v5191_v56  ;;  %4306 = vmatprep.subr.mxu0 %v5180_v45  ;;  %v686_v28 = vsub.f32 %v5423_v27, %v685_v34  ;;  %v5446_v47 = vsub.f32 %v454_v57, %v5435_v39 }
 0x16e   : > { %4294 = vmatmul.mubr.f32.gmra.mxu1 %v5435_v39  ;;  %4350 = vmatprep.subr.mxu1 %v5215_v10  ;;  %v696_v15 = vsub.f32 %v5432_v38, %v695_v58 }
 0x16f   : > { %4248 = vmatmul.mubr.f32.gmra.mxu0 %v667_v9  ;;  %4352 = vmatprep.mubr.f32.mxu1 %v555_v43  ;;  %v687_v3 = vand.u32 4294901760, %v686_v28  ;;  %v705_v6 = vand.u32 4294901760, %v5446_v47  ;;  %v7521_v43 = vand.u32 4294901760, %v5265_v60 }
 0x170   : > { %4307 = vmatpush3.xpose.msra.mxu0 %v5180_v45  ;;  %4250 = vmatprep.mubr.f32.mxu0 %v677_v4  ;;  %v697_v57 = vand.u32 4294901760, %v696_v15  ;;  %v7522_v45 = vand.u32 4294901760, %v5280_v13  ;;  %v7523_v4 = vand.u32 4294901760, %v5289_v52 }
 0x171   : > { %4351 = vmatpush3.xpose.msra.mxu1 %v5215_v10  ;;  %4308 = vmatprep.subr.mxu0 %v5207_v1  ;;  %v706_v16 = vsub.f32 %v5446_v47, %v705_v6 }
 0x172   : > { %4416 = vmatprep.subr.mxu1 %v5020_v36 }
 0x173   : > { %4251 = vmatmul.mubr.f32.gmra.mxu0 %v687_v3  ;;  %v707_v9 = vand.u32 4294901760, %v706_v16 }
 0x174   : > { %4309 = vmatpush3.xpose.msra.mxu0 %v5207_v1  ;;  %4353 = vmatmul.mubr.f32.vlgmr.msra.gmra.mxu1 %v7521_v43  ;;  %v7524_v1 = vand.u32 4294901760, %v5305_v50 }
 0x175   : > { %4253 = vmatprep.mubr.f32.mxu0 %v697_v57  ;;  %4355 = vmatprep.mubr.f32.mxu1 %v7522_v45 }
 0x176   : > { %4417 = vmatpush3.xpose.msra.mxu1 %v5020_v36  ;;  %4310 = vmatprep.subr.mxu0 %v5224_v19  ;;  %v7525_v36 = vand.u32 4294901760, %v5310_v32 }
 0x177   : > { %4254 = vmatmul.mubr.f32.gmra.mxu0 %v707_v9  ;;  %4418 = vmatprep.subr.mxu1 %v5022_v37 }
 0x178   : > { %4311 = vmatpush3.xpose.msra.mxu0 %v5224_v19  ;;  %4356 = vmatmul.mubr.f32.gmra.mxu1 %v7523_v4  ;;  %v7526_v19 = vand.u32 4294901760, %v5313_v42 }
 0x179   : > { %4312 = vmatprep.mubr.f32.mxu0 %v5249_v21  ;;  %4358 = vmatprep.mubr.f32.mxu1 %v7524_v1 }
 0x17a   : > { %4419 = vmatpush3.xpose.msra.mxu1 %v5022_v37  ;;  %4376 = vmatprep.subr.mxu0 %v5033_v40  ;;  %v7527_v37 = vand.u32 4294901760, %v5343_v44 }
 0x17b   : > { %4313 = vmatmul.mubr.f32.vlgmr.msra.gmra.mxu0 %v5265_v60  ;;  %4420 = vmatprep.subr.mxu1 %v5078_v18 }
 0x17c   : > { %4359 = vmatmul.mubr.f32.gmra.mxu1 %v7525_v36  ;;  %4377 = vmatpush3.xpose.msra.mxu0 %v5033_v40  ;;  %v7528_v40 = vand.u32 4294901760, %v5352_v7 }
 0x17d   : > { %4315 = vmatprep.mubr.f32.mxu0 %v5280_v13  ;;  %4361 = vmatprep.mubr.f32.mxu1 %v7526_v19 }
 0x17e   : > { %4421 = vmatpush3.xpose.msra.mxu1 %v5078_v18  ;;  %4378 = vmatprep.subr.mxu0 %v5036_v41  ;;  %v7529_v18 = vand.u32 4294901760, %v5371_v11 }
 0x17f   : > { %4316 = vmatmul.mubr.f32.gmra.mxu0 %v5289_v52  ;;  %4422 = vmatprep.subr.mxu1 %v5110_v46 }
 0x180   : > { %4362 = vmatmul.mubr.f32.gmra.mxu1 %v7527_v37  ;;  %4379 = vmatpush3.xpose.msra.mxu0 %v5036_v41  ;;  %v7530_v41 = vand.u32 4294901760, %v5381_v30 }
 0x181   : > { %4318 = vmatprep.mubr.f32.mxu0 %v5305_v50  ;;  %4364 = vmatprep.mubr.f32.mxu1 %v7528_v40 }
 0x182   : > { %4423 = vmatpush3.xpose.msra.mxu1 %v5110_v46  ;;  %4380 = vmatprep.subr.mxu0 %v5101_v35 }
 0x183   : > { %4319 = vmatmul.mubr.f32.gmra.mxu0 %v5310_v32  ;;  %4424 = vmatprep.subr.mxu1 %v5135_v0 }
 0x184   : > { %4365 = vmatmul.mubr.f32.gmra.mxu1 %v7529_v18  ;;  %4381 = vmatpush3.xpose.msra.mxu0 %v5101_v35 }
 0x185   : > { %4321 = vmatprep.mubr.f32.mxu0 %v5313_v42  ;;  %4367 = vmatprep.mubr.f32.mxu1 %v7530_v41 }
 0x186   : > { %4425 = vmatpush3.xpose.msra.mxu1 %v5135_v0  ;;  %4382 = vmatprep.subr.mxu0 %v5133_v63 }
 0x187   : > { %4322 = vmatmul.mubr.f32.gmra.mxu0 %v5343_v44  ;;  %4426 = vmatprep.subr.mxu1 %v5163_v31 }
 0x188   : > { %4368 = vmatmul.mubr.f32.gmra.mxu1 %v665_v33  ;;  %4383 = vmatpush3.xpose.msra.mxu0 %v5133_v63 }
 0x189   : > { %4324 = vmatprep.mubr.f32.mxu0 %v5352_v7  ;;  %4370 = vmatprep.mubr.f32.mxu1 %v675_v49 }
 0x18a   : > { %4427 = vmatpush3.xpose.msra.mxu1 %v5163_v31  ;;  %4384 = vmatprep.subr.mxu0 %v5161_v26 }
 0x18b   : > { %4325 = vmatmul.mubr.f32.gmra.mxu0 %v5371_v11  ;;  %4428 = vmatprep.subr.mxu1 %v5191_v56 }
 0x18c   : > { %4371 = vmatmul.mubr.f32.gmra.mxu1 %v685_v34  ;;  %4385 = vmatpush3.xpose.msra.mxu0 %v5161_v26 }
 0x18d   : > { %4327 = vmatprep.mubr.f32.mxu0 %v5381_v30  ;;  %4373 = vmatprep.mubr.f32.mxu1 %v695_v58 }
 0x18e   : > { %4429 = vmatpush3.xpose.msra.mxu1 %v5191_v56  ;;  %4386 = vmatprep.subr.mxu0 %v5189_v55 }
 0x18f   : > { %4328 = vmatmul.mubr.f32.gmra.mxu0 %v5393_v8  ;;  %4430 = vmatprep.subr.mxu1 %v5215_v10 }
 0x190   : > { %4374 = vmatmul.mubr.f32.gmra.mxu1 %v705_v6  ;;  %4387 = vmatpush3.xpose.msra.mxu0 %v5189_v55 }
 0x191   : > { %4330 = vmatprep.mubr.f32.mxu0 %v5402_v54  ;;  %4432 = vmatprep.mubr.f32.mxu1 %v5243_v62 }
 0x192   : > { %4431 = vmatpush3.xpose.msra.mxu1 %v5215_v10  ;;  %4388 = vmatprep.subr.mxu0 %v5219_v14 }
 0x193   : > { %4331 = vmatmul.mubr.f32.gmra.mxu0 %v5423_v27 }
 0x194   : > { %4389 = vmatpush3.xpose.msra.mxu0 %v5219_v14  ;;  %4333 = vmatprep.mubr.f32.mxu0 %v5432_v38 }
 0x195   : > { %4433 = vmatmul.mubr.f32.vlgmr.msra.gmra.mxu1 %v5252_v12  ;;  %4390 = vmatprep.subr.mxu0 %v5231_v23 }
 0x196   : > { %4435 = vmatprep.mubr.f32.mxu1 %v5256_v51 }
 0x197   : > { %4334 = vmatmul.mubr.f32.gmra.mxu0 %v5446_v47 }
 0x198   : > { %4391 = vmatpush3.xpose.msra.mxu0 %v5231_v23  ;;  %4392 = vmatprep.mubr.f32.mxu0 %v5243_v62 }
 0x199   : > { %4436 = vmatmul.mubr.f32.gmra.mxu1 %v5270_v29 }
 0x19a   : > { %4438 = vmatprep.mubr.f32.mxu1 %v5274_v22 }
 0x19b   : > { %4393 = vmatmul.mubr.f32.vlgmr.msra.gmra.mxu0 %v5252_v12 }
 0x19c   : > { %4395 = vmatprep.mubr.f32.mxu0 %v5256_v51 }
 0x19d   : > { %4439 = vmatmul.mubr.f32.gmra.mxu1 %v5295_v2 }
 0x19e   : > { %4441 = vmatprep.mubr.f32.mxu1 %v5297_v5 }
 0x19f   : > { %4396 = vmatmul.mubr.f32.gmra.mxu0 %v5270_v29 }
 0x1a0   : > { %4398 = vmatprep.mubr.f32.mxu0 %v5274_v22 }
 0x1a1   : > { %4442 = vmatmul.mubr.f32.gmra.mxu1 %v5324_v25 }
 0x1a2   : > { %4444 = vmatprep.mubr.f32.mxu1 %v5333_v17 }
 0x1a3   : > { %4399 = vmatmul.mubr.f32.gmra.mxu0 %v5295_v2 }
 0x1a4   : > { %4401 = vmatprep.mubr.f32.mxu0 %v5297_v5 }
 0x1a5   : > { %4445 = vmatmul.mubr.f32.gmra.mxu1 %v5346_v48 }
 0x1a6   : > { %4447 = vmatprep.mubr.f32.mxu1 %v5360_v59 }
 0x1a7   : > { %4402 = vmatmul.mubr.f32.gmra.mxu0 %v5324_v25 }
 0x1a8   : > { %4404 = vmatprep.mubr.f32.mxu0 %v5333_v17 }
 0x1a9   : > { %4448 = vmatmul.mubr.f32.gmra.mxu1 %v5374_v20 }
 0x1aa   : > { %4450 = vmatprep.mubr.f32.mxu1 %v5384_v53 }
 0x1ab   : > { %4405 = vmatmul.mubr.f32.gmra.mxu0 %v5346_v48 }
 0x1ac   : > { %4407 = vmatprep.mubr.f32.mxu0 %v5360_v59 }
 0x1ad   : > { %4451 = vmatmul.mubr.f32.gmra.mxu1 %v5405_v61 }
 0x1ae   : > { %4453 = vmatprep.mubr.f32.mxu1 %v5413_v24 }
 0x1af   : > { %4408 = vmatmul.mubr.f32.gmra.mxu0 %v5374_v20 }
 0x1b0   : > { %4410 = vmatprep.mubr.f32.mxu0 %v5384_v53 }
 0x1b1   : > { %4454 = vmatmul.mubr.f32.gmra.mxu1 %v5435_v39 }
 0x1b3   : > { %4411 = vmatmul.mubr.f32.gmra.mxu0 %v5405_v61 }
 0x1b4   : > { %4413 = vmatprep.mubr.f32.mxu0 %v5413_v24 }
 0x1b7   : > { %4414 = vmatmul.mubr.f32.gmra.mxu0 %v5435_v39 }
 0x211   : > { %v5575_v35 = vpop.f32.mrf.mxu1 }
 0x213   : > { %v5577_v46 = vpop.f32.mrf.mxu1 }
 0x215   : > { %v4277_v63 = vpop.f32.mrf.mxu1 }
 0x217   : > { %v832_v0 = vpop.f32.mrf.mxu1 }
 0x21a   : > { %v5579_v26 = vpop.f32.mrf.mxu0  ;;  %v4280_v31 = vpop.f32.mrf.mxu1 }
 0x21c   : > { %v5581_v55 = vpop.f32.mrf.mxu0  ;;  %v844_v56 = vpop.f32.mrf.mxu1 }
 0x21e   : > { %v4283_v10 = vpop.f32.mrf.mxu1 }
 0x21f   : > { %v4237_v14 = vpop.f32.mrf.mxu0 }
 0x220   : > { %v5583_v23 = vadd.f32 %v4277_v63, %v4237_v14  ;;  %v856_v62 = vpop.f32.mrf.mxu1 }
 0x221   : > { %v579_v21 = vpop.f32.mrf.mxu0 }
 0x222   : > { %v5585_v12 = vadd.f32 %v832_v0, %v579_v21  ;;  %v4286_v51 = vpop.f32.mrf.mxu1 }
 0x223   : > { %v4240_v60 = vpop.f32.mrf.mxu0 }
 0x224   : > { %v5587_v29 = vadd.f32 %v4280_v31, %v4240_v60  ;;  %v868_v22 = vpop.f32.mrf.mxu1 }
 0x225   : > { %v599_v8 = vpop.f32.mrf.mxu0 }
 0x226   : > { %v845_v13 = vadd.f32 %v844_v56, %v599_v8  ;;  %v4289_v52 = vpop.f32.mrf.mxu1 }
 0x227   : > { %v4243_v2 = vpop.f32.mrf.mxu0 }
 0x228   : > { %v863_v5 = vadd.f32 %v4283_v10, %v4243_v2  ;;  %v880_v50 = vpop.f32.mrf.mxu1 }
 0x229   : > { %v619_v32 = vpop.f32.mrf.mxu0 }
 0x22a   : > { %v857_v42 = vadd.f32 %v856_v62, %v619_v32  ;;  %v4292_v48 = vpop.f32.mrf.mxu1 }
 0x22b   : > { %v4246_v25 = vpop.f32.mrf.mxu0 }
 0x22c   : > { %v875_v7 = vadd.f32 %v4286_v51, %v4246_v25  ;;  %v892_v17 = vpop.f32.mrf.mxu1 }
 0x22d   : > { %v639_v59 = vpop.f32.mrf.mxu0 }
 0x22e   : > { %v869_v44 = vadd.f32 %v868_v22, %v639_v59  ;;  %v4295_v11 = vpop.f32.mrf.mxu1 }
 0x22f   : > { %v4249_v20 = vpop.f32.mrf.mxu0 }
 0x230   : > { %v887_v30 = vadd.f32 %v4289_v52, %v4249_v20  ;;  %v904_v53 = vpop.f32.mrf.mxu1 }
 0x231   : > { %v659_v27 = vpop.f32.mrf.mxu0 }
 0x232   : > { %v881_v54 = vadd.f32 %v880_v50, %v659_v27 }
 0x233   : > { %v4252_v61 = vpop.f32.mrf.mxu0 }
 0x234   : > { %v899_v33 = vadd.f32 %v4292_v48, %v4252_v61  ;;  %v5589_v24 = vpop.f32.mrf.mxu1 }
 0x235   : > { %v679_v49 = vpop.f32.mrf.mxu0 }
 0x236   : > { %v893_v38 = vadd.f32 %v892_v17, %v679_v49  ;;  %v5591_v39 = vpop.f32.mrf.mxu1 }
 0x237   : > { %v4255_v34 = vpop.f32.mrf.mxu0 }
 0x238   : > { %v911_v58 = vadd.f32 %v4295_v11, %v4255_v34  ;;  %v5593_v28 = vpop.f32.mrf.mxu1 }
 0x239   : > { %v699_v47 = vpop.f32.mrf.mxu0 }
 0x23a   : > { %v905_v15 = vadd.f32 %v904_v53, %v699_v47  ;;  %v5595_v3 = vpop.f32.mrf.mxu1 }
 0x23b   : > { %v4314_v6 = vpop.f32.mrf.mxu0 }
 0x23c   : > { %v5597_v57 = vpop.f32.mrf.mxu1 }
 0x23d   : > { %v998_v16 = vpop.f32.mrf.mxu0 }
 0x23e   : > { %v1216_v9 = vpop.f32.mrf.mxu1 }
 0x23f   : > { %v4317_v43 = vpop.f32.mrf.mxu0 }
 0x240   : > { %v4363_v45 = vpop.f32.mrf.mxu1 }
 0x241   : > { %v1012_v4 = vpop.f32.mrf.mxu0 }
 0x242   : > { %v1232_v1 = vpop.f32.mrf.mxu1 }
 0x243   : > { %v4320_v36 = vpop.f32.mrf.mxu0 }
 0x244   : > { %v4366_v19 = vpop.f32.mrf.mxu1 }
 0x245   : > { %v1026_v37 = vpop.f32.mrf.mxu0 }
 0x246   : > { %v1027_v40 = vadd.f32 %v1026_v37, %v845_v13  ;;  %v1248_v18 = vpop.f32.mrf.mxu1 }
 0x247   : > { %v4323_v41 = vpop.f32.mrf.mxu0 }
 0x248   : > { %v1048_v63 = vadd.f32 %v4323_v41, %v863_v5  ;;  %v4369_v0 = vpop.f32.mrf.mxu1  ;;  %v5599_v31 = vadd.f32 %v1216_v9, %v1027_v40 }
 0x249   : > { %v1040_v56 = vpop.f32.mrf.mxu0 }
 0x24a   : > { %v1041_v10 = vadd.f32 %v1040_v56, %v857_v42  ;;  %v1264_v14 = vpop.f32.mrf.mxu1  ;;  %v5601_v62 = vadd.f32 %v4363_v45, %v1048_v63  ;;  %v1020_v45 = vadd.f32 %v4317_v43, %v5583_v23 }
 0x24b   : > { %v4326_v21 = vpop.f32.mrf.mxu0 }
 0x24c   : > { %v1062_v51 = vadd.f32 %v4326_v21, %v875_v7  ;;  %v4372_v60 = vpop.f32.mrf.mxu1  ;;  %v5603_v22 = vadd.f32 %v1232_v1, %v1041_v10  ;;  %v827_v7 = vadd.f32 %v5575_v35, %v5579_v26  ;;  %v1013_v26 = vadd.f32 %v1012_v4, %v5585_v12  ;;  %v5639_v12 = vld [vmem:[%s7406_s1 + $0x4] ss:$0 sm:$0xff] }
 0x24d   : > { %v1054_v8 = vpop.f32.mrf.mxu0  ;;  %v1209_v40 = vadd.f32 %v5593_v28, %v1020_v45 }
 0x24e   : > { %v1055_v52 = vadd.f32 %v1054_v8, %v869_v44  ;;  %v1280_v2 = vpop.f32.mrf.mxu1  ;;  %v5605_v13 = vadd.f32 %v4366_v19, %v1062_v51  ;;  %v821_v44 = vadd.f32 %v5577_v46, %v5581_v55  ;;  %v1034_v46 = vadd.f32 %v4320_v36, %v5587_v29 }
 0x24f   : > { %v4329_v50 = vpop.f32.mrf.mxu0 }
 0x250   : > { %v1076_v5 = vadd.f32 %v4329_v50, %v887_v30  ;;  %v4375_v32 = vpop.f32.mrf.mxu1  ;;  %v5607_v48 = vadd.f32 %v1248_v18, %v1055_v52  ;;  %v1006_v30 = vadd.f32 %v4314_v6, %v827_v7  ;;  %v999_v47 = vadd.f32 %v998_v16, %v821_v44 }
 0x251   : > { %v1068_v25 = vpop.f32.mrf.mxu0  ;;  %v1225_v4 = vadd.f32 %v5597_v57, %v1034_v46 }
 0x252   : > { %v1069_v42 = vadd.f32 %v1068_v25, %v881_v54  ;;  %v1296_v17 = vpop.f32.mrf.mxu1  ;;  %v5609_v59 = vadd.f32 %v4369_v0, %v1076_v5  ;;  %v2124_v54 = vlaneseq  ;;  %v1185_v43 = vadd.f32 %v5591_v39, %v999_v47 }
 0x253   : > { %v4332_v11 = vpop.f32.mrf.mxu0  ;;  %v7426_v47 = vmov -1.0  }
 0x254   : > { %v1090_v20 = vadd.f32 %v4332_v11, %v899_v33  ;;  %v5613_v53 = vadd.f32 %v1264_v14, %v1069_v42  ;;  %v5622_v35 = vshrl.u32 %v2124_v54, 7 }
 0x255   : > { %v1082_v27 = vpop.f32.mrf.mxu0  ;;  %v4434_v61 = vpop.f32.mrf.mxu1 }
 0x256   : > { %v1083_v49 = vadd.f32 %v1082_v27, %v893_v38  ;;  %v5617_v34 = vadd.f32 %v4372_v60, %v1090_v20  ;;  %7531 = vst [vmem:[#allocation5_spill] sm:$0xff] %v5622_v35  ;;  %v1193_v38 = vadd.f32 %v5589_v24, %v1006_v30  ;;  %v5630_v16 = vadd.s32 8, %v5622_v35  ;;  %v5641_v24 = vpop.permute.xlu0 %2105 }
 0x257   : > { %v4335_v9 = vpop.f32.mrf.mxu0  ;;  %v1568_v33 = vpop.f32.mrf.mxu1  ;;  %v7422_v36 = vrot.slane %v5622_v35, 7  ;;  %v5648_v0 = vadd.s32 16, %v5622_v35  ;;  %vm2149_vm1 = vcmp.lt.s32.totalorder %v5622_v35, 1  ;;  %vm2198_vm2 = vcmp.lt.s32.totalorder %v5622_v35, 7 }
 0x258   : > { %v1104_v1 = vadd.f32 %v4335_v9, %v911_v58  ;;  %v5620_v19 = vadd.f32 %v1280_v2, %v1083_v49  ;;  %7532 = vst [vmem:[#allocation6_spill] sm:$0xff] %v5630_v16  ;;  %v7420_v39 = vrot.slane %v5630_v16, 7  ;;  %v7421_v10 = vrot.slane %v5630_v16, 1 }
 0x259   : > { %v1096_v55 = vpop.f32.mrf.mxu0  ;;  %v4437_v41 = vpop.f32.mrf.mxu1  ;;  %7533 = vst [vmem:[#allocation7_spill] sm:$0xff] %v5648_v0  ;;  %v5657_v57 = vadd.s32 24, %v5622_v35  ;;  %v7419_v2 = vrot.slane %v5648_v0, 1  ;;  %v5671_v50 = vadd.s32 1, %v5630_v16  ;;  %v5691_v54 = vadd.s32 32, %v5622_v35 }
 0x25a   : > { %v1097_v6 = vadd.f32 %v1096_v55, %v905_v15  ;;  %v5627_v37 = vadd.f32 %v4375_v32, %v1104_v1  ;;  %v1201_v15 = vadd.f32 %v5595_v3, %v1013_v26  ;;  %v5654_v3 = vadd.s32 4294967295, %v5630_v16 }
 0x25b   : > { %v4394_v23 = vpop.f32.mrf.mxu0  ;;  %7534 = vst [vmem:[#allocation8_spill] sm:$0xff] %v5657_v57  ;;  %v5667_v52 = vsel %vm2149_vm1, %v7422_v36, %v7420_v39  ;;  %7536 = vst [vmem:[#allocation10_spill] sm:$0xff] %v5671_v50  ;;  %v1580_v32 = vpop.f32.mrf.mxu1  ;;  %v5688_v30 = vsel %vm2198_vm2, %v7421_v10, %v7419_v2 }
 0x25c   : > { %v1406_v58 = vadd.f32 %v4394_v23, %v1193_v38  ;;  %v5634_v18 = vadd.f32 %v1296_v17, %v1097_v6  ;;  %7535 = vst [vmem:[#allocation9_spill] sm:$0xff] %v5667_v52  ;;  %7537 = vst [vmem:[#allocation11_spill] sm:$0xff] %v5688_v30 }
 0x25d   : > { %v1399_v29 = vpop.f32.mrf.mxu0  ;;  %7538 = vst [vmem:[#allocation12_spill] sm:$0xff] %v5691_v54 }
 0x25e   : > { %v1575_v28 = vadd.f32 %v4434_v61, %v1406_v58  ;;  %v1400_v63 = vadd.f32 %v1399_v29, %v1185_v43 }
 0x25f   : > { %v4397_v56 = vpop.f32.mrf.mxu0 }
 0x260   : > { %v1668_v14 = vadd.f32 %v5639_v12, %v1575_v28  ;;  %v1569_v21 = vadd.f32 %v1568_v33, %v1400_v63  ;;  %v1418_v51 = vadd.f32 %v4397_v56, %v1209_v40  ;;  %v2109_v60 = vadd.f32 %v5641_v24, %v1575_v28  ;;  %v4440_v33 = vpop.f32.mrf.mxu1 }
 0x261   : > { %v1411_v8 = vpop.f32.mrf.mxu0 }
 0x262   : > { %v1700_v25 = vmul.f32 0.70710677, %v1668_v14  ;;  %v1667_v42 = vadd.f32 %v5639_v12, %v1569_v21  ;;  %v5675_v17 = vadd.f32 %v4437_v41, %v1418_v51  ;;  %2509 = vrot.lane.b32.xlu1 %v2109_v60, %s4853_s5  ;;  %v5679_v7 = vmul.f32 0.5, %v1668_v14 }
 0x263   : > { %v1412_v20 = vadd.f32 %v1411_v8, %v1201_v15  ;;  %v4400_v44 = vpop.f32.mrf.mxu0  ;;  %v2108_v27 = vadd.f32 %v5641_v24, %v1569_v21  ;;  %v1592_v8 = vpop.f32.mrf.mxu1 }
 0x264   : > { %vm1716_vm3 = vcmp.ge.f32.partialorder %v1700_v25, 0.0  ;;  %v1748_v61 = vand.u32 2147483647, %v1700_v25  ;;  %v1699_v49 = vmul.f32 0.70710677, %v1667_v42  ;;  %v5696_v45 = vmul.f32 0.5, %v1667_v42 }
 0x265   : > { %v5694_v9 = vsel %vm1716_vm3, 1.0, %v7426_v47  ;;  %v1670_v1 = vadd.f32 %v5639_v12, %v5675_v17  ;;  %v5700_v26 = vadd.f32 %v1580_v32, %v1412_v20  ;;  %v1423_v38 = vpop.f32.mrf.mxu0  ;;  %v1430_v40 = vadd.f32 %v4400_v44, %v1225_v4 }
 0x266   : > { %v1764_v46 = vmul.f32 0.3275911, %v1748_v61  ;;  %v1956_v55 = vsub.f32 0.0, %v1748_v61  ;;  %vm1715_vm4 = vcmp.ge.f32.partialorder %v1699_v49, 0.0  ;;  %v1747_v6 = vand.u32 2147483647, %v1699_v49  ;;  %2507 = vrot.lane.b32.xlu1 %v2108_v27, %s4853_s5 }
 0x267   : > { %v5704_v23 = vsel %vm1715_vm4, 1.0, %v7426_v47  ;;  %v1702_v58 = vmul.f32 0.70710677, %v1670_v1  ;;  %v1669_v43 = vadd.f32 %v5639_v12, %v5700_v26  ;;  %v5708_v63 = vmul.f32 0.5, %v1670_v1  ;;  %v4403_v32 = vpop.f32.mrf.mxu0 }
 0x268   : > { %v1780_v29 = vadd.f32 1.0, %v1764_v46  ;;  %v1972_v15 = vmul.f32 %v1956_v55, %v1748_v61  ;;  %v1763_v41 = vmul.f32 0.3275911, %v1747_v6  ;;  %v1955_v28 = vsub.f32 0.0, %v1747_v6  ;;  %v4443_v46 = vpop.f32.mrf.mxu1 }
 0x269   : > { %vm1718_vm5 = vcmp.ge.f32.partialorder %v1702_v58, 0.0  ;;  %v1750_v56 = vand.u32 2147483647, %v1702_v58  ;;  %v1701_v14 = vmul.f32 0.70710677, %v1669_v43  ;;  %v5713_v20 = vmul.f32 0.5, %v1669_v43 }
 0x26a   : > { %4725 = vrcp.f32 %v1780_v29  ;;  %v1989_v21 = vmul.f32 1.442695, %v1972_v15  ;;  %v1779_v51 = vadd.f32 1.0, %v1763_v41  ;;  %v1971_v60 = vmul.f32 %v1955_v28, %v1747_v6  ;;  %v1435_v29 = vpop.f32.mrf.mxu0 }
 0x26b   : > { %v5711_v25 = vsel %vm1718_vm5, 1.0, %v7426_v47  ;;  %v1766_v42 = vmul.f32 0.3275911, %v1750_v56  ;;  %v1958_v4 = vsub.f32 0.0, %v1750_v56  ;;  %vm1717_vm6 = vcmp.ge.f32.partialorder %v1701_v14, 0.0 }
 0x26c   : > { %4727 = vpow2.f32 %v1989_v21  ;;  %v1987_v44 = vmul.f32 1.442695, %v1971_v60  ;;  %v1749_v27 = vand.u32 2147483647, %v1701_v14  ;;  %v1599_v1 = vadd.f32 %v4440_v33, %v1430_v40  ;;  %v1604_v60 = vpop.f32.mrf.mxu1 }
 0x26d   : > { %4729 = vrcp.f32 %v1779_v51  ;;  %v1782_v61 = vadd.f32 1.0, %v1766_v42  ;;  %v1974_v49 = vmul.f32 %v1958_v4, %v1750_v56  ;;  %v1424_v58 = vadd.f32 %v1423_v38, %v5599_v31  ;;  %v4406_v42 = vpop.f32.mrf.mxu0 }
 0x26e   : > { %4731 = vpow2.f32 %v1987_v44  ;;  %v1765_v55 = vmul.f32 0.3275911, %v1749_v27  ;;  %v1957_v6 = vsub.f32 0.0, %v1749_v27  ;;  %v1672_v43 = vadd.f32 %v5639_v12, %v1599_v1 }
 0x26f   : > { %4733 = vrcp.f32 %v1782_v61  ;;  %v1993_v15 = vmul.f32 1.442695, %v1974_v49  ;;  %v2111_v41 = vadd.f32 %v5641_v24, %v5675_v17  ;;  %v5719_v51 = vadd.f32 %v1592_v8, %v1424_v58 }
 0x270   : > { %v1781_v28 = vadd.f32 1.0, %v1765_v55  ;;  %v1973_v21 = vmul.f32 %v1957_v6, %v1749_v27  ;;  %v1442_v33 = vadd.f32 %v4403_v32, %v5601_v62  ;;  %v5724_v40 = vsel %vm1717_vm6, 1.0, %v7426_v47 }
 0x271   : > { %4735 = vpow2.f32 %v1993_v15  ;;  %v1704_v31 = vmul.f32 0.70710677, %v1672_v43  ;;  %2513 = vrot.lane.b32.xlu0 %v2111_v41, %s4853_s5  ;;  %v1436_v38 = vadd.f32 %v1435_v29, %v5603_v22  ;;  %v1671_v17 = vadd.f32 %v5639_v12, %v5719_v51 }
 0x272   : > { %4737 = vrcp.f32 %v1781_v28  ;;  %v1991_v56 = vmul.f32 1.442695, %v1973_v21  ;;  %v5730_v8 = vadd.f32 %v4443_v46, %v1442_v33  ;;  %v2113_v14 = vadd.f32 %v5641_v24, %v1599_v1 }
 0x273   : > { %vm1720_vm7 = vcmp.ge.f32.partialorder %v1704_v31, 0.0  ;;  %v1752_v62 = vand.u32 2147483647, %v1704_v31  ;;  %v5732_v32 = vadd.f32 %v1604_v60, %v1436_v38  ;;  %v5735_v4 = vmul.f32 0.5, %v1672_v43  ;;  %v4446_v38 = vpop.f32.mrf.mxu1 }
 0x274   : > { %4739 = vpow2.f32 %v1991_v56  ;;  %v5738_v22 = vsel %vm1720_vm7, 1.0, %v7426_v47  ;;  %v1703_v44 = vmul.f32 0.70710677, %v1671_v17  ;;  %v1674_v49 = vadd.f32 %v5639_v12, %v5730_v8 }
 0x275   : > { %v1768_v27 = vmul.f32 0.3275911, %v1752_v62  ;;  %v1960_v61 = vsub.f32 0.0, %v1752_v62  ;;  %v1673_v46 = vadd.f32 %v5639_v12, %v5732_v32  ;;  %2517 = vrot.lane.b32.xlu0 %v2113_v14, %s4853_s5  ;;  %v2110_v55 = vadd.f32 %v5641_v24, %v5700_v26 }
 0x276   : > { %vm1719_vm8 = vcmp.ge.f32.partialorder %v1703_v44, 0.0  ;;  %v1751_v1 = vand.u32 2147483647, %v1703_v44  ;;  %v1454_v6 = vadd.f32 %v4406_v42, %v5605_v13  ;;  %v5750_v43 = vmul.f32 0.5, %v1671_v17 }
 0x277   : > { %v5748_v58 = vpop.eup %4725  ;;  %v1784_v29 = vadd.f32 1.0, %v1768_v27  ;;  %v1976_v15 = vmul.f32 %v1960_v61, %v1752_v62  ;;  %v5753_v41 = vsel %vm1719_vm8, 1.0, %v7426_v47  ;;  %v5756_v31 = vmul.f32 0.5, %v1674_v49  ;;  %2511 = vrot.lane.b32.xlu1 %v2110_v55, %s4853_s5 }
 0x278   : > { %v1812_v28 = vmul.f32 1.0614054, %v5748_v58  ;;  %v1767_v21 = vmul.f32 0.3275911, %v1751_v1  ;;  %v1959_v33 = vsub.f32 0.0, %v1751_v1  ;;  %v5763_v44 = vadd.f32 %v4446_v38, %v1454_v6 }
 0x279   : > { %v5759_v26 = vpop.eup %4727  ;;  %4741 = vrcp.f32 %v1784_v29  ;;  %v1997_v13 = vmul.f32 1.442695, %v1976_v15  ;;  %v1706_v56 = vmul.f32 0.70710677, %v1674_v49  ;;  %v1705_v60 = vmul.f32 0.70710677, %v1673_v46 }
 0x27a   : > { %v5761_v17 = vpop.eup %4729  ;;  %v1828_v62 = vadd.f32 -1.4531521, %v1812_v28  ;;  %v1783_v14 = vadd.f32 1.0, %v1767_v21  ;;  %v1975_v42 = vmul.f32 %v1959_v33, %v1751_v1  ;;  %v5771_v15 = vmul.f32 0.5, %v1673_v46 }
 0x27b   : > { %v5765_v27 = vpop.eup %4731  ;;  %v1811_v61 = vmul.f32 1.0614054, %v5761_v17  ;;  %4743 = vpow2.f32 %v1997_v13  ;;  %vm1722_vm9 = vcmp.ge.f32.partialorder %v1706_v56, 0.0  ;;  %v1754_v55 = vand.u32 2147483647, %v1706_v56 }
 0x27c   : > { %v5768_v2 = vpop.eup %4733  ;;  %v1844_v29 = vmul.f32 %v5748_v58, %v1828_v62  ;;  %4745 = vrcp.f32 %v1783_v14  ;;  %v1995_v49 = vmul.f32 1.442695, %v1975_v42  ;;  %v1676_v21 = vadd.f32 %v5639_v12, %v5763_v44 }
 0x27d   : > { %v1827_v28 = vadd.f32 -1.4531521, %v1811_v61  ;;  %v1814_v1 = vmul.f32 1.0614054, %v5768_v2  ;;  %v1770_v6 = vmul.f32 0.3275911, %v1754_v55 }
 0x27e   : > { %v5776_v33 = vpop.eup %4735  ;;  %v1860_v13 = vadd.f32 1.4214138, %v1844_v29  ;;  %v5779_v38 = vsel %vm1722_vm9, 1.0, %v7426_v47  ;;  %v1962_v56 = vsub.f32 0.0, %v1754_v55  ;;  %vm1721_vm10 = vcmp.ge.f32.partialorder %v1705_v60, 0.0 }
 0x27f   : > { %v5781_v62 = vpop.eup %4737  ;;  %v1843_v46 = vmul.f32 %v5761_v17, %v1827_v28  ;;  %v1830_v14 = vadd.f32 -1.4531521, %v1814_v1  ;;  %v1786_v42 = vadd.f32 1.0, %v1770_v6  ;;  %v5785_v61 = vsel %vm1721_vm10, 1.0, %v7426_v47  ;;  %v1447_v28 = vpop.f32.mrf.mxu0 }
 0x280   : > { %v1876_v39 = vmul.f32 %v5748_v58, %v1860_v13  ;;  %v1813_v10 = vmul.f32 1.0614054, %v5781_v62  ;;  %v1978_v36 = vmul.f32 %v1962_v56, %v1754_v55  ;;  %v1753_v29 = vand.u32 2147483647, %v1705_v60 }
 0x281   : > { %v5789_v5 = vpop.eup %4739  ;;  %v1859_v11 = vadd.f32 1.4214138, %v1843_v46  ;;  %v1846_v16 = vmul.f32 %v5768_v2, %v1830_v14  ;;  %4747 = vrcp.f32 %v1786_v42  ;;  %v5792_v54 = vmul.f32 0.5, %v1676_v21 }
 0x282   : > { %v1892_v1 = vadd.f32 -0.28449672, %v1876_v39  ;;  %v1829_v6 = vadd.f32 -1.4531521, %v1813_v10  ;;  %4749 = vpow2.f32 %v1995_v49  ;;  %v2001_v47 = vmul.f32 1.442695, %v1978_v36 }
 0x283   : > { %v1875_v0 = vmul.f32 %v5761_v17, %v1859_v11  ;;  %v1862_v13 = vadd.f32 1.4214138, %v1846_v16  ;;  %v1769_v57 = vmul.f32 0.3275911, %v1753_v29  ;;  %v1961_v30 = vsub.f32 0.0, %v1753_v29 }
 0x284   : > { %v1908_v60 = vmul.f32 %v5748_v58, %v1892_v1  ;;  %v1845_v55 = vmul.f32 %v5781_v62, %v1829_v6  ;;  %v1708_v56 = vmul.f32 0.70710677, %v1676_v21  ;;  %v1448_v46 = vadd.f32 %v1447_v28, %v5607_v48  ;;  %v1616_v6 = vpop.f32.mrf.mxu1 }
 0x285   : > { %v1891_v14 = vadd.f32 -0.28449672, %v1875_v0  ;;  %v1878_v42 = vmul.f32 %v5768_v2, %v1862_v13  ;;  %v1785_v35 = vadd.f32 1.0, %v1769_v57  ;;  %v1977_v39 = vmul.f32 %v1961_v30, %v1753_v29 }
 0x286   : > { %v5799_v10 = vpop.eup %4741  ;;  %v1924_v36 = vadd.f32 0.2548296, %v1908_v60  ;;  %v1861_v49 = vadd.f32 1.4214138, %v1845_v55  ;;  %4751 = vpow2.f32 %v2001_v47  ;;  %vm1724_vm11 = vcmp.ge.f32.partialorder %v1708_v56, 0.0 }
 0x287   : > { %v1907_v16 = vmul.f32 %v5761_v17, %v1891_v14  ;;  %v1894_v11 = vadd.f32 -0.28449672, %v1878_v42  ;;  %v1816_v1 = vmul.f32 1.0614054, %v5799_v10  ;;  %4753 = vrcp.f32 %v1785_v35 }
 0x288   : > { %v5803_v21 = vpop.eup %4743  ;;  %v1940_v48 = vmul.f32 %v5748_v58, %v1924_v36  ;;  %v1877_v0 = vmul.f32 %v5781_v62, %v1861_v49  ;;  %v1999_v57 = vmul.f32 1.442695, %v1977_v39  ;;  %v5807_v30 = vadd.f32 %v1616_v6, %v1448_v46 }
 0x289   : > { %v5809_v29 = vpop.eup %4745  ;;  %v1923_v47 = vadd.f32 0.2548296, %v1907_v16  ;;  %v1910_v28 = vmul.f32 %v5768_v2, %v1894_v11  ;;  %v1832_v13 = vadd.f32 -1.4531521, %v1816_v1  ;;  %v1756_v60 = vand.u32 2147483647, %v1708_v56 }
 0x28a   : > { %v2020_v55 = vmul.f32 %v5759_v26, %v1940_v48  ;;  %v1893_v14 = vadd.f32 -0.28449672, %v1877_v0  ;;  %v1815_v35 = vmul.f32 1.0614054, %v5809_v29  ;;  %v7539_v42 = vmov -1.0  }
 0x28b   : > { %v5816_v58 = vsel %vm1724_vm11, 1.0, %v7539_v42  ;;  %v1939_v39 = vmul.f32 %v5761_v17, %v1923_v47  ;;  %v1926_v46 = vadd.f32 0.2548296, %v1910_v28  ;;  %v1848_v36 = vmul.f32 %v5799_v10, %v1832_v13 }
 0x28c   : > { %v1772_v49 = vmul.f32 0.3275911, %v1756_v60  ;;  %v2036_v16 = vsub.f32 1.0, %v2020_v55  ;;  %v1909_v11 = vmul.f32 %v5781_v62, %v1893_v14  ;;  %v1831_v1 = vadd.f32 -1.4531521, %v1815_v35 }
 0x28d   : > { %v1964_v6 = vsub.f32 0.0, %v1756_v60  ;;  %v2019_v26 = vmul.f32 %v5765_v27, %v1939_v39  ;;  %v1942_v48 = vmul.f32 %v5768_v2, %v1926_v46  ;;  %v1864_v0 = vadd.f32 1.4214138, %v1848_v36 }
 0x28e   : > { %v1788_v50 = vadd.f32 1.0, %v1772_v49  ;;  %v5823_v56 = vpop.eup %4747  ;;  %v2052_v52 = vmul.f32 %v2036_v16, %v5694_v9  ;;  %v1925_v17 = vadd.f32 0.2548296, %v1909_v11  ;;  %v1847_v47 = vmul.f32 %v5809_v29, %v1831_v1 }
 0x28f   : > { %v1980_v28 = vmul.f32 %v1964_v6, %v1756_v60  ;;  %v4750_v13 = vpop.eup %4749  ;;  %v2035_v55 = vsub.f32 1.0, %v2019_v26  ;;  %v2022_v14 = vmul.f32 %v5776_v33, %v1942_v48  ;;  %v1880_v35 = vmul.f32 %v5799_v10, %v1864_v0 }
 0x290   : > { %v1818_v27 = vmul.f32 1.0614054, %v5823_v56  ;;  %v2068_v39 = vadd.f32 1.0, %v2052_v52  ;;  %v1941_v2 = vmul.f32 %v5781_v62, %v1925_v17  ;;  %v1863_v46 = vadd.f32 1.4214138, %v1847_v47 }
 0x291   : > { %4755 = vrcp.f32 %v1788_v50  ;;  %v2051_v36 = vmul.f32 %v2035_v55, %v5704_v23  ;;  %v2038_v9 = vsub.f32 1.0, %v2022_v14  ;;  %v1896_v49 = vadd.f32 -0.28449672, %v1880_v35 }
 0x292   : > { %v1834_v16 = vadd.f32 -1.4531521, %v1818_v27  ;;  %v5833_v60 = vmul.f32 %v2068_v39, %v5679_v7  ;;  %v2021_v11 = vmul.f32 %v5789_v5, %v1941_v2  ;;  %v1879_v33 = vmul.f32 %v5809_v29, %v1863_v46 }
 0x293   : > { %v2005_v1 = vmul.f32 1.442695, %v1980_v28  ;;  %v5837_v6 = vpop.eup %4751  ;;  %v2067_v52 = vadd.f32 1.0, %v2051_v36  ;;  %v2054_v62 = vmul.f32 %v2038_v9, %v5711_v25  ;;  %v1912_v50 = vmul.f32 %v5799_v10, %v1896_v49 }
 0x294   : > { %v1850_v23 = vmul.f32 %v5823_v56, %v1834_v16  ;;  %v5842_v26 = vpop.eup %4753  ;;  %v7438_v48 = vrot.slane %v5833_v60, 7  ;;  %v2037_v7 = vsub.f32 1.0, %v2021_v11  ;;  %v1895_v0 = vadd.f32 -0.28449672, %v1879_v33 }
 0x295   : > { %4757 = vpow2.f32 %v1999_v57  ;;  %v5846_v5 = vmul.f32 %v2067_v52, %v5696_v45  ;;  %v2070_v17 = vadd.f32 1.0, %v2054_v62  ;;  %v1928_v47 = vadd.f32 0.2548296, %v1912_v50 }
 0x296   : > { %v1866_v28 = vadd.f32 1.4214138, %v1850_v23  ;;  %v7439_v55 = vrot.slane %v5833_v60, 1  ;;  %v2053_v25 = vmul.f32 %v2037_v7, %v5724_v40  ;;  %v1911_v14 = vmul.f32 %v5809_v29, %v1895_v0 }
 0x297   : > { %v1817_v35 = vmul.f32 1.0614054, %v5842_v26  ;;  %v7440_v27 = vrot.slane %v5846_v5, 7  ;;  %v5854_v39 = vmul.f32 %v2070_v17, %v5708_v63  ;;  %v1944_v57 = vmul.f32 %v5799_v10, %v1928_v47 }
 0x298   : > { %4759 = vpow2.f32 %v2005_v1  ;;  %v2069_v45 = vadd.f32 1.0, %v2053_v25  ;;  %v1927_v2 = vadd.f32 0.2548296, %v1911_v14  ;;  %v1882_v46 = vmul.f32 %v5823_v56, %v1866_v28 }
 0x299   : > { %v1833_v36 = vadd.f32 -1.4531521, %v1817_v35  ;;  %v7443_v40 = vrot.slane %v5854_v39, 7  ;;  %v2024_v49 = vmul.f32 %v5803_v21, %v1944_v57  ;;  %v1675_v16 = vadd.f32 %v5639_v12, %v5807_v30 }
 0x29a   : > { %v5864_v63 = vmul.f32 %v2069_v45, %v5713_v20  ;;  %v1943_v10 = vmul.f32 %v5809_v29, %v1927_v2  ;;  %v1898_v11 = vadd.f32 -0.28449672, %v1882_v46  ;;  %v2115_v50 = vadd.f32 %v5641_v24, %v5730_v8  ;;  %v4409_v20 = vpop.f32.mrf.mxu0 }
 0x29b   : > { %v1849_v33 = vmul.f32 %v5842_v26, %v1833_v36  ;;  %v2040_v52 = vsub.f32 1.0, %v2024_v49  ;;  %v1707_v62 = vmul.f32 0.70710677, %v1675_v16  ;;  %v5873_v0 = vmul.f32 0.5, %v1675_v16 }
 0x29c   : > { %v2023_v23 = vmul.f32 %v4750_v13, %v1943_v10  ;;  %v1914_v7 = vmul.f32 %v5823_v56, %v1898_v11  ;;  %v7437_v29 = vrot.slane %v5864_v63, 1  ;;  %2521 = vrot.lane.b32.xlu0 %v2115_v50, %s4853_s5  ;;  %v1459_v16 = vpop.f32.mrf.mxu0 }
 0x29d   : > { %v2056_v47 = vmul.f32 %v2040_v52, %v5738_v22  ;;  %v1865_v28 = vadd.f32 1.4214138, %v1849_v33  ;;  %v1755_v25 = vand.u32 2147483647, %v1707_v62  ;;  %vm1723_vm12 = vcmp.ge.f32.partialorder %v1707_v62, 0.0  ;;  %v4449_v33 = vpop.f32.mrf.mxu1 }
 0x29e   : > { %v5875_v17 = vpop.eup %4755  ;;  %v2039_v14 = vsub.f32 1.0, %v2023_v23  ;;  %v1930_v8 = vadd.f32 0.2548296, %v1914_v7  ;;  %v2112_v22 = vadd.f32 %v5641_v24, %v5719_v51 }
 0x29f   : > { %v1820_v35 = vmul.f32 1.0614054, %v5875_v17  ;;  %v2072_v13 = vadd.f32 1.0, %v2056_v47  ;;  %v1881_v57 = vmul.f32 %v5842_v26, %v1865_v28  ;;  %v1771_v45 = vmul.f32 0.3275911, %v1755_v25 }
 0x2a0   : > { %v1963_v2 = vsub.f32 0.0, %v1755_v25  ;;  %v2055_v46 = vmul.f32 %v2039_v14, %v5753_v41  ;;  %v1946_v36 = vmul.f32 %v5823_v56, %v1930_v8  ;;  %2515 = vrot.lane.b32.xlu1 %v2112_v22, %s4853_s5  ;;  %v1466_v56 = vadd.f32 %v4409_v20, %v5609_v59 }
 0x2a1   : > { %v1836_v49 = vadd.f32 -1.4531521, %v1820_v35  ;;  %v5887_v11 = vmul.f32 %v2072_v13, %v5735_v4  ;;  %v1897_v52 = vadd.f32 -0.28449672, %v1881_v57  ;;  %v1787_v50 = vadd.f32 1.0, %v1771_v45  ;;  %v4412_v13 = vpop.f32.mrf.mxu0  ;;  %v1628_v45 = vpop.f32.mrf.mxu1 }
 0x2a2   : > { %v4758_v10 = vpop.eup %4757  ;;  %v1979_v23 = vmul.f32 %v1963_v2, %v1755_v25  ;;  %v2071_v7 = vadd.f32 1.0, %v2055_v46  ;;  %v2026_v47 = vmul.f32 %v5837_v6, %v1946_v36  ;;  %v5897_v4 = vsel %vm1723_vm12, 1.0, %v7539_v42 }
 0x2a3   : > { %v1852_v41 = vmul.f32 %v5875_v17, %v1836_v49  ;;  %v1913_v28 = vmul.f32 %v5842_v26, %v1897_v52  ;;  %4761 = vrcp.f32 %v1787_v50  ;;  %v1635_v59 = vadd.f32 %v4449_v33, %v1466_v56 }
 0x2a4   : > { %v5900_v25 = vmul.f32 %v2071_v7, %v5750_v43  ;;  %v2042_v6 = vsub.f32 1.0, %v2026_v47  ;;  %v2003_v35 = vmul.f32 1.442695, %v1979_v23  ;;  %v1460_v20 = vadd.f32 %v1459_v16, %v5613_v53  ;;  %v4452_v7 = vpop.f32.mrf.mxu1 }
 0x2a5   : > { %v4760_v14 = vpop.eup %4759  ;;  %v1868_v8 = vadd.f32 1.4214138, %v1852_v41  ;;  %v1929_v57 = vadd.f32 0.2548296, %v1913_v28  ;;  %v2117_v2 = vadd.f32 %v5641_v24, %v5763_v44  ;;  %v1678_v52 = vadd.f32 %v5639_v12, %v1635_v59 }
 0x2a6   : > { %v2058_v36 = vmul.f32 %v2042_v6, %v5779_v38  ;;  %v5912_v33 = vadd.f32 %v1628_v45, %v1460_v20  ;;  %v2114_v16 = vadd.f32 %v5641_v24, %v5732_v32  ;;  %v1478_v50 = vadd.f32 %v4412_v13, %v5617_v34  ;;  %v1471_v38 = vpop.f32.mrf.mxu0 }
 0x2a7   : > { %v1884_v43 = vmul.f32 %v5875_v17, %v1868_v8  ;;  %v1945_v22 = vmul.f32 %v5842_v26, %v1929_v57  ;;  %2525 = vrot.lane.b32.xlu0 %v2117_v2, %s4853_s5  ;;  %4763 = vpow2.f32 %v2003_v35  ;;  %v1710_v47 = vmul.f32 0.70710677, %v1678_v52 }
 0x2a8   : > { %v2074_v53 = vadd.f32 1.0, %v2058_v36  ;;  %v1677_v26 = vadd.f32 %v5639_v12, %v5912_v33  ;;  %v5924_v28 = vmul.f32 0.5, %v1678_v52  ;;  %2519 = vrot.lane.b32.xlu1 %v2114_v16, %s4853_s5  ;;  %v5927_v32 = vadd.f32 %v4452_v7, %v1478_v50 }
 0x2a9   : > { %v1900_v44 = vadd.f32 -0.28449672, %v1884_v43  ;;  %v2025_v23 = vmul.f32 %v4758_v10, %v1945_v22  ;;  %vm1726_vm13 = vcmp.ge.f32.partialorder %v1710_v47, 0.0  ;;  %v1758_v10 = vand.u32 2147483647, %v1710_v47 }
 0x2aa   : > { %v5921_v41 = vmul.f32 %v2074_v53, %v5756_v31  ;;  %v1472_v6 = vadd.f32 %v1471_v38, %v5620_v19  ;;  %v5932_v31 = vmul.f32 0.5, %v1677_v26  ;;  %v1709_v2 = vmul.f32 0.70710677, %v1677_v26  ;;  %v1640_v53 = vpop.f32.mrf.mxu1 }
 0x2ab   : > { %v1916_v56 = vmul.f32 %v5875_v17, %v1900_v44  ;;  %v2041_v34 = vsub.f32 1.0, %v2025_v23  ;;  %v1774_v45 = vmul.f32 0.3275911, %v1758_v10  ;;  %v1966_v20 = vsub.f32 0.0, %v1758_v10 }
 0x2ac   : > { %v5937_v43 = vsel %vm1726_vm13, 1.0, %v7539_v42  ;;  %v1680_v19 = vadd.f32 %v5639_v12, %v5927_v32  ;;  %v2119_v22 = vadd.f32 %v5641_v24, %v1635_v59  ;;  %vm1725_vm14 = vcmp.ge.f32.partialorder %v1709_v2, 0.0 }
 0x2ad   : > { %v1932_v13 = vadd.f32 0.2548296, %v1916_v56  ;;  %v2057_v57 = vmul.f32 %v2041_v34, %v5785_v61  ;;  %v1790_v44 = vadd.f32 1.0, %v1774_v45  ;;  %v1982_v16 = vmul.f32 %v1966_v20, %v1758_v10 }
 0x2ae   : > { %v5945_v38 = vsel %vm1725_vm14, 1.0, %v7539_v42  ;;  %v5947_v23 = vadd.f32 %v1640_v53, %v1472_v6  ;;  %2529 = vrot.lane.b32.xlu0 %v2119_v22, %s4853_s5  ;;  %v1712_v10 = vmul.f32 0.70710677, %v1680_v19  ;;  %v5956_v45 = vmul.f32 0.5, %v1680_v19 }
 0x2af   : > { %v1948_v36 = vmul.f32 %v5875_v17, %v1932_v13  ;;  %v2073_v52 = vadd.f32 1.0, %v2057_v57  ;;  %v1757_v17 = vand.u32 2147483647, %v1709_v2  ;;  %4765 = vrcp.f32 %v1790_v44 }
 0x2b0   : > { %v5942_v50 = vpop.eup %4761  ;;  %v2009_v47 = vmul.f32 1.442695, %v1982_v16  ;;  %vm1728_vm15 = vcmp.ge.f32.partialorder %v1712_v10, 0.0  ;;  %v1760_v22 = vand.u32 2147483647, %v1712_v10  ;;  %v2116_v19 = vadd.f32 %v5641_v24, %v5807_v30 }
 0x2b1   : > { %v2028_v61 = vmul.f32 %v4760_v14, %v1948_v36  ;;  %v5951_v7 = vmul.f32 %v2073_v52, %v5771_v15  ;;  %v1819_v59 = vmul.f32 1.0614054, %v5942_v50  ;;  %v1773_v56 = vmul.f32 0.3275911, %v1757_v17  ;;  %v4415_v14 = vpop.f32.mrf.mxu0 }
 0x2b2   : > { %v1965_v34 = vsub.f32 0.0, %v1757_v17  ;;  %4767 = vpow2.f32 %v2009_v47  ;;  %v1679_v52 = vadd.f32 %v5639_v12, %v5947_v23  ;;  %v1968_v47 = vsub.f32 0.0, %v1760_v22  ;;  %2523 = vrot.lane.b32.xlu1 %v2116_v19, %s4853_s5 }
 0x2b3   : > { %v2044_v26 = vsub.f32 1.0, %v2028_v61  ;;  %v1835_v6 = vadd.f32 -1.4531521, %v1819_v59  ;;  %v1789_v15 = vadd.f32 1.0, %v1773_v56  ;;  %v1483_v61 = vpop.f32.mrf.mxu0  ;;  %v4455_v59 = vpop.f32.mrf.mxu1 }
 0x2b4   : > { %v1981_v2 = vmul.f32 %v1965_v34, %v1757_v17  ;;  %v5962_v53 = vpop.eup %4763  ;;  %v5967_v17 = vsel %vm1728_vm15, 1.0, %v7539_v42  ;;  %v5972_v34 = vmul.f32 0.5, %v1679_v52  ;;  %v1711_v10 = vmul.f32 0.70710677, %v1679_v52 }
 0x2b5   : > { %v2060_v20 = vmul.f32 %v2044_v26, %v5816_v58  ;;  %v1851_v36 = vmul.f32 %v5942_v50, %v1835_v6  ;;  %4769 = vrcp.f32 %v1789_v15  ;;  %v1776_v26 = vmul.f32 0.3275911, %v1760_v22  ;;  %v1652_v13 = vpop.f32.mrf.mxu1 }
 0x2b6   : > { %v2007_v16 = vmul.f32 1.442695, %v1981_v2  ;;  %v1490_v6 = vadd.f32 %v4415_v14, %v5627_v37  ;;  %v1984_v15 = vmul.f32 %v1968_v47, %v1760_v22  ;;  %v1484_v2 = vadd.f32 %v1483_v61, %v5634_v18 }
 0x2b7   : > { %v2076_v44 = vadd.f32 1.0, %v2060_v20  ;;  %v1867_v58 = vadd.f32 1.4214138, %v1851_v36  ;;  %v1792_v20 = vadd.f32 1.0, %v1776_v26  ;;  %vm1727_vm3 = vcmp.ge.f32.partialorder %v1711_v10, 0.0 }
 0x2b8   : > { %4771 = vpow2.f32 %v2007_v16  ;;  %v1759_v35 = vand.u32 2147483647, %v1711_v10  ;;  %v2013_v52 = vmul.f32 1.442695, %v1984_v15  ;;  %v1659_v37 = vadd.f32 %v4455_v59, %v1490_v6 }
 0x2b9   : > { %v5970_v56 = vmul.f32 %v2076_v44, %v5792_v54  ;;  %v1883_v30 = vmul.f32 %v5942_v50, %v1867_v58  ;;  %4773 = vrcp.f32 %v1792_v20  ;;  %v1653_v14 = vadd.f32 %v1652_v13, %v1484_v2 }
 0x2ba   : > { %v1775_v19 = vmul.f32 0.3275911, %v1759_v35  ;;  %v1967_v62 = vsub.f32 0.0, %v1759_v35  ;;  %v5982_v22 = vsel %vm1727_vm3, 1.0, %v7539_v42  ;;  %v2121_v18 = vadd.f32 %v5641_v24, %v5927_v32 }
 0x2bb   : > { %v1899_v44 = vadd.f32 -0.28449672, %v1883_v30  ;;  %v2118_v16 = vadd.f32 %v5641_v24, %v5912_v33  ;;  %v1682_v10 = vadd.f32 %v5639_v12, %v1659_v37  ;;  %v1681_v59 = vadd.f32 %v5639_v12, %v1653_v14 }
 0x2bc   : > { %v5988_v61 = vpop.eup %4765  ;;  %v1791_v26 = vadd.f32 1.0, %v1775_v19  ;;  %v1983_v47 = vmul.f32 %v1967_v62, %v1759_v35  ;;  %4775 = vpow2.f32 %v2013_v52  ;;  %2533 = vrot.lane.b32.xlu0 %v2121_v18, %s4853_s5  ;;  %v2123_v32 = vadd.f32 %v5641_v24, %v1659_v37  ;;  %v2574_v19 = vld [vmem:[%s7407_s2 + $0x58] sm:$0xff] }
 0x2bd   : > { %v1915_v58 = vmul.f32 %v5942_v50, %v1899_v44  ;;  %v1822_v6 = vmul.f32 1.0614054, %v5988_v61  ;;  %2527 = vrot.lane.b32.xlu1 %v2118_v16, %s4853_s5  ;;  %v1714_v30 = vmul.f32 0.70710677, %v1682_v10  ;;  %v2120_v62 = vadd.f32 %v5641_v24, %v5947_v23 }
 0x2be   : > { %4777 = vrcp.f32 %v1791_v26  ;;  %v2011_v33 = vmul.f32 1.442695, %v1983_v47  ;;  %v5999_v12 = vmul.f32 0.5, %v1682_v10  ;;  %v1713_v15 = vmul.f32 0.70710677, %v1681_v59 }
 0x2bf   : > { %v1931_v13 = vadd.f32 0.2548296, %v1915_v58  ;;  %v1838_v20 = vadd.f32 -1.4531521, %v1822_v6  ;;  %v6001_v2 = vpop.eup %4767  ;;  %vm1730_vm4 = vcmp.ge.f32.partialorder %v1714_v30, 0.0  ;;  %v6003_v52 = vmul.f32 0.5, %v1681_v59 }
 0x2c0   : > { %4779 = vpow2.f32 %v2011_v33  ;;  %v1762_v44 = vand.u32 2147483647, %v1714_v30  ;;  %v6013_v58 = vsel %vm1730_vm4, 1.0, %v7539_v42  ;;  %2537 = vrot.lane.b32.xlu0 %v2123_v32, %s4853_s5  ;;  %v2122_v18 = vadd.f32 %v5641_v24, %v1653_v14  ;;  %v7540_v6 = vld [vmem:[#allocation9_spill] sm:$0xff] }
 0x2c1   : > { %v1947_v35 = vmul.f32 %v5942_v50, %v1931_v13  ;;  %v1854_v50 = vmul.f32 %v5988_v61, %v1838_v20  ;;  %2531 = vrot.lane.b32.xlu1 %v2120_v62, %s4853_s5  ;;  %vm1729_vm5 = vcmp.ge.f32.partialorder %v1713_v15, 0.0  ;;  %v1761_v13 = vand.u32 2147483647, %v1713_v15  ;;  %v7541_v62 = vld [vmem:[#allocation10_spill] sm:$0xff] }
 0x2c2   : > { %v6008_v37 = vpop.eup %4769  ;;  %v1778_v26 = vmul.f32 0.3275911, %v1762_v44  ;;  %v1970_v47 = vsub.f32 0.0, %v1762_v44  ;;  %vm2240_vm6 = vcmp.eq.s32.totalorder %v7540_v6, %v5654_v3  ;;  %vm2312_vm7 = vcmp.eq.s32.totalorder %v7540_v6, %v7541_v62 }
 0x2c3   : > { %v2027_v23 = vmul.f32 %v5962_v53, %v1947_v35  ;;  %v1821_v16 = vmul.f32 1.0614054, %v6008_v37  ;;  %v1870_v59 = vadd.f32 1.4214138, %v1854_v50  ;;  %v2638_v53 = vsel %vm191_vm0, %v2574_v19, 0 }
 0x2c4   : > { %v1794_v30 = vadd.f32 1.0, %v1778_v26  ;;  %v1986_v32 = vmul.f32 %v1970_v47, %v1762_v44  ;;  %v6022_v35 = vand.u32 4294901760, %v2638_v53  ;;  %v1969_v50 = vsub.f32 0.0, %v1761_v13 }
 0x2c5   : > { %v2043_v10 = vsub.f32 1.0, %v2027_v23  ;;  %v1837_v33 = vadd.f32 -1.4531521, %v1821_v16  ;;  %v6026_v24 = vpop.eup %4771  ;;  %v1886_v20 = vmul.f32 %v5988_v61, %v1870_v59  ;;  %v1777_v23 = vmul.f32 0.3275911, %v1761_v13  ;;  %2535 = vrot.lane.b32.xlu1 %v2122_v18, %s4853_s5 }
 0x2c6   : > { %v6031_v19 = vpop.eup %4773  ;;  %4781 = vrcp.f32 %v1794_v30  ;;  %v2017_v44 = vmul.f32 1.442695, %v1986_v32  ;;  %4456 = vmatprep.subr.mxu0 %v6022_v35  ;;  %v6036_v26 = vsub.f32 %v2638_v53, %v6022_v35  ;;  %v1985_v30 = vmul.f32 %v1969_v50, %v1761_v13 }
 0x2c7   : > { %v2059_v14 = vmul.f32 %v2043_v10, %v5897_v4  ;;  %v1853_v16 = vmul.f32 %v6008_v37, %v1837_v33  ;;  %v2573_v4 = vld [vmem:[%s7407_s2 + $0x50] sm:$0xff]  ;;  %v1902_v10 = vadd.f32 -0.28449672, %v1886_v20  ;;  %v1824_v59 = vmul.f32 1.0614054, %v6031_v19  ;;  %4457 = vmatpush3.xpose.msra.mxu0 %v6022_v35 }
 0x2c8   : > { %v1793_v18 = vadd.f32 1.0, %v1777_v23  ;;  %v6045_v33 = vsel %vm1729_vm5, 1.0, %v7539_v42  ;;  %v6048_v53 = vand.u32 4294901760, %v6036_v26  ;;  %v2635_v15 = vsel %vm191_vm0, %v2573_v4, 0 }
 0x2c9   : > { %v2075_v47 = vadd.f32 1.0, %v2059_v14  ;;  %v1869_v54 = vadd.f32 1.4214138, %v1853_v16  ;;  %v1918_v14 = vmul.f32 %v5988_v61, %v1902_v10  ;;  %v1840_v20 = vadd.f32 -1.4531521, %v1824_v59  ;;  %v6054_v36 = vpop.eup %4775 }
 0x2ca   : > { %7542 = vst [vmem:[#allocation9_spill] sm:$0xff] %v6048_v53  ;;  %4783 = vrcp.f32 %v1793_v18  ;;  %v2897_v42 = vsub.f32 %v6036_v26, %v6048_v53  ;;  %v6071_v46 = vand.u32 4294901760, %v2635_v15 }
 0x2cb   : > { %v6051_v32 = vmul.f32 %v2075_v47, %v5873_v0  ;;  %v1885_v23 = vmul.f32 %v6008_v37, %v1869_v54  ;;  %4785 = vpow2.f32 %v2017_v44  ;;  %v6060_v13 = vpop.eup %4777  ;;  %v1934_v0 = vadd.f32 0.2548296, %v1918_v14  ;;  %v7544_v14 = vld [vmem:[#allocation5_spill] sm:$0xff] }
 0x2cc   : > { %v1856_v16 = vmul.f32 %v6031_v19, %v1840_v20  ;;  %v6064_v47 = vmul.f32 1.442695, %v1985_v30  ;;  %v1823_v54 = vmul.f32 1.0614054, %v6060_v13  ;;  %v2898_v44 = vand.u32 4294901760, %v2897_v42  ;;  %7543 = vst [vmem:[#allocation10_spill] sm:$0xff] %v6071_v46  ;;  %4458 = vmatprep.subr.mxu0 %v6071_v46 }
 0x2cd   : > { %v1901_v59 = vadd.f32 -0.28449672, %v1885_v23  ;;  %v6068_v18 = vpop.eup %4779  ;;  %v1950_v57 = vmul.f32 %v5988_v61, %v1934_v0  ;;  %v2162_v30 = vsel %vm2149_vm1, %v7440_v27, %v7438_v48  ;;  %v2209_v61 = vsel %vm2198_vm2, %v7439_v55, %v7437_v29  ;;  %4459 = vmatpush3.xpose.msra.mxu0 %v6071_v46  ;;  %v7546_v29 = vld [vmem:[#allocation11_spill] sm:$0xff] }
 0x2ce   : > { %v1872_v4 = vadd.f32 1.4214138, %v1856_v16  ;;  %v1839_v23 = vadd.f32 -1.4531521, %v1823_v54  ;;  %4488 = vmatprep.subr.mxu1 %v2898_v44  ;;  %v2248_v42 = vsel %vm2240_vm6, %v2162_v30, 0.0  ;;  %v2320_v54 = vsel %vm2312_vm7, %v2162_v30, 0.0 }
 0x2cf   : > { %v1917_v20 = vmul.f32 %v6008_v37, %v1901_v59  ;;  %v2030_v0 = vmul.f32 %v6001_v2, %v1950_v57  ;;  %4489 = vmatpush3.xpose.msra.mxu1 %v2898_v44  ;;  %v6093_v59 = vsub.f32 %v2635_v15, %v6071_v46  ;;  %vm2264_vm8 = vcmp.eq.s32.totalorder %v7546_v29, %v5654_v3  ;;  %v6107_v57 = vld [vmem:[%s7406_s1] ss:$0 sm:$0xff] }
 0x2d0   : > { %v1888_v16 = vmul.f32 %v6031_v19, %v1872_v4  ;;  %v1855_v50 = vmul.f32 %v6060_v13, %v1839_v23  ;;  %vm2336_vm9 = vcmp.eq.s32.totalorder %v7546_v29, %v7541_v62  ;;  %v2272_v4 = vsel %vm2264_vm8, %v2209_v61, 0.0 }
 0x2d1   : > { %7545 = vst [vmem:[#allocation5_spill] sm:$0xff] %v6093_v59  ;;  %v1933_v10 = vadd.f32 0.2548296, %v1917_v20  ;;  %v2046_v2 = vsub.f32 1.0, %v2030_v0  ;;  %v6110_v44 = vand.u32 4294901760, %v6093_v59  ;;  %v2288_v23 = vadd.f32 %v2272_v4, %v2248_v42 }
 0x2d2   : > { %v1904_v15 = vadd.f32 -0.28449672, %v1888_v16  ;;  %v1871_v20 = vadd.f32 1.4214138, %v1855_v50  ;;  %v2344_v48 = vsel %vm2336_vm9, %v2209_v61, 0.0  ;;  %4787 = vpow2.f32 %v6064_v47 }
 0x2d3   : > { %7547 = vst [vmem:[#allocation11_spill] sm:$0xff] %v6110_v44  ;;  %v1949_v30 = vmul.f32 %v6008_v37, %v1933_v10  ;;  %v6122_v0 = vld [vmem:[%s7406_s1 + $0x1] ss:$0 sm:$0xff]  ;;  %v6124_v16 = vpop.eup %4781  ;;  %v2062_v51 = vmul.f32 %v2046_v2, %v5937_v43  ;;  %v2904_v37 = vsub.f32 %v6093_v59, %v6110_v44  ;;  %v2360_v50 = vadd.f32 %v2344_v48, %v2320_v54  ;;  %v6133_v10 = vld [vmem:[%s7406_s1 + $0x2] ss:$0 sm:$0xff]  ;;  %v2572_v48 = vld [vmem:[%s7407_s2 + $0x48] sm:$0xff] }
 0x2d4   : > { %v1920_v9 = vmul.f32 %v6031_v19, %v1904_v15  ;;  %v1887_v42 = vmul.f32 %v6060_v13, %v1871_v20  ;;  %v1826_v4 = vmul.f32 1.0614054, %v6124_v16  ;;  %v2381_v55 = vmul.f32 %v6107_v57, %v2288_v23 }
 0x2d5   : > { %v2029_v61 = vmul.f32 %v6026_v24, %v1949_v30  ;;  %v2078_v43 = vadd.f32 1.0, %v2062_v51  ;;  %v2905_v15 = vand.u32 4294901760, %v2904_v37  ;;  %v2402_v8 = vmul.f32 %v6122_v0, %v5833_v60 }
 0x2d6   : > { %v1936_v2 = vadd.f32 0.2548296, %v1920_v9  ;;  %v1903_v24 = vadd.f32 -0.28449672, %v1887_v42  ;;  %v1842_v30 = vadd.f32 -1.4531521, %v1826_v4  ;;  %v2439_v20 = vmul.f32 %v6133_v10, %v2360_v50 }
 0x2d7   : > { %v6144_v54 = vpop.eup %4783  ;;  %v2045_v27 = vsub.f32 1.0, %v2029_v61  ;;  %v6150_v51 = vmul.f32 %v2078_v43, %v5924_v28  ;;  %4490 = vmatprep.subr.mxu1 %v2905_v15  ;;  %v2418_v37 = vadd.f32 %v2402_v8, %v2381_v55  ;;  %v2632_v50 = vsel %vm191_vm0, %v2572_v48, 0  ;;  %v6164_v55 = vld [vmem:[%s7406_s1 + $0x3] ss:$0 sm:$0xff]  ;;  %v7559_v48 = vld [vmem:[#allocation12_spill] sm:$0xff] }
 0x2d8   : > { %v6147_v1 = vpop.eup %4785  ;;  %v1952_v9 = vmul.f32 %v6031_v19, %v1936_v2  ;;  %v1825_v23 = vmul.f32 1.0614054, %v6144_v54  ;;  %v1919_v21 = vmul.f32 %v6060_v13, %v1903_v24  ;;  %v1858_v61 = vmul.f32 %v6124_v16, %v1842_v30  ;;  %4491 = vmatpush3.xpose.msra.mxu1 %v2905_v15  ;;  %v2510_v30 = vpop.permute.xlu1 %2509 }
 0x2d9   : > { %v2061_v49 = vmul.f32 %v2045_v27, %v5945_v38  ;;  %v2455_v19 = vadd.f32 %v2439_v20, %v2418_v37  ;;  %v6167_v15 = vand.u32 4294901760, %v2632_v50  ;;  %v6365_v53 = vadd.s32 48, %v7544_v14 }
 0x2da   : > { %v2032_v28 = vmul.f32 %v6054_v36, %v1952_v9  ;;  %v1841_v4 = vadd.f32 -1.4531521, %v1825_v23  ;;  %v1935_v8 = vadd.f32 0.2548296, %v1919_v21  ;;  %v1874_v38 = vadd.f32 1.4214138, %v1858_v61 }
 0x2db   : > { %v2077_v27 = vadd.f32 1.0, %v2061_v49  ;;  %v7548_v36 = vrot.slane %v5864_v63, 7  ;;  %v2476_v23 = vadd.f32 %v6164_v55, %v2455_v19  ;;  %4460 = vmatprep.subr.mxu0 %v6167_v15  ;;  %v6187_v37 = vsub.f32 %v2632_v50, %v6167_v15 }
 0x2dc   : > { %v2048_v43 = vsub.f32 1.0, %v2032_v28  ;;  %v1857_v2 = vmul.f32 %v6144_v54, %v1841_v4  ;;  %v1951_v21 = vmul.f32 %v6060_v13, %v1935_v8  ;;  %v1890_v24 = vmul.f32 %v6124_v16, %v1874_v38  ;;  %4461 = vmatpush3.xpose.msra.mxu0 %v6167_v15  ;;  %v7550_v13 = vld [vmem:[#allocation8_spill] sm:$0xff] }
 0x2dd   : > { %v6175_v47 = vsel %vm2149_vm1, %v7548_v36, %v7443_v40  ;;  %v6179_v49 = vmul.f32 %v2077_v27, %v5932_v31  ;;  %7549 = vst [vmem:[#allocation13_spill] sm:$0xff] %v6187_v37  ;;  %v7551_v4 = vrot.slane %v7550_v13, 7  ;;  %v7552_v27 = vld [vmem:[#allocation7_spill] sm:$0xff]  ;;  %v2556_v50 = vmul.f32 %v2510_v30, %v2476_v23 }
 0x2de   : > { %v2064_v20 = vmul.f32 %v2048_v43, %v5967_v17  ;;  %v1873_v9 = vadd.f32 1.4214138, %v1857_v2  ;;  %v2031_v31 = vmul.f32 %v6068_v18, %v1951_v21  ;;  %v1906_v28 = vadd.f32 -0.28449672, %v1890_v24 }
 0x2df   : > { %v7553_v8 = vrot.slane %v7552_v27, 7  ;;  %v6202_v43 = vand.u32 4294901760, %v6187_v37  ;;  %v7555_v36 = vrot.slane %v5900_v25, 1  ;;  %v7556_v21 = vrot.slane %v5854_v39, 1 }
 0x2e0   : > { %v2080_v38 = vadd.f32 1.0, %v2064_v20  ;;  %v1889_v19 = vmul.f32 %v6144_v54, %v1873_v9  ;;  %v2047_v2 = vsub.f32 1.0, %v2031_v31  ;;  %v1922_v18 = vmul.f32 %v6124_v16, %v1906_v28 }
 0x2e1   : > { %v6198_v17 = vsel %vm2149_vm1, %v7553_v8, %v7551_v4  ;;  %7554 = vst [vmem:[#allocation8_spill] sm:$0xff] %v6202_v43  ;;  %v2205_v24 = vsel %vm2198_vm2, %v7556_v21, %v7555_v36  ;;  %v7444_v4 = vrot.slane %v7550_v13, 1  ;;  %v2584_v30 = vsel %vm191_vm0, %v2556_v50, 0 }
 0x2e2   : > { %v6213_v20 = vmul.f32 %v2080_v38, %v5956_v45  ;;  %v1905_v9 = vadd.f32 -0.28449672, %v1889_v19  ;;  %v2911_v23 = vsub.f32 %v6187_v37, %v6202_v43  ;;  %v2063_v31 = vmul.f32 %v2047_v2, %v5982_v22 }
 0x2e3   : > { %v1938_v28 = vadd.f32 0.2548296, %v1922_v18  ;;  %v6219_v8 = vand.u32 4294901760, %v2584_v30  ;;  %v7442_v61 = vrot.slane %v7559_v48, 1  ;;  %v6250_v21 = vadd.s32 56, %v7544_v14 }
 0x2e4   : > { %7557 = vst [vmem:[#allocation7_spill] sm:$0xff] %v6213_v20  ;;  %v1921_v45 = vmul.f32 %v6144_v54, %v1905_v9  ;;  %v2912_v38 = vand.u32 4294901760, %v2911_v23  ;;  %v2079_v19 = vadd.f32 1.0, %v2063_v31  ;;  %v6239_v9 = vadd.s32 4294967295, %v7550_v13 }
 0x2e5   : > { %7558 = vst [vmem:[#allocation14_spill] sm:$0xff] %v6219_v8  ;;  %v1954_v50 = vmul.f32 %v6124_v16, %v1938_v28  ;;  %v6227_v42 = vsub.f32 %v2584_v30, %v6219_v8  ;;  %v6235_v22 = vsel %vm2198_vm2, %v7444_v4, %v7442_v61  ;;  %v6242_v16 = vadd.s32 1, %v7550_v13  ;;  %v4788_v30 = vpop.eup %4787 }
 0x2e6   : > { %v1937_v18 = vadd.f32 0.2548296, %v1921_v45  ;;  %4492 = vmatprep.subr.mxu1 %v2912_v38  ;;  %v6245_v23 = vmul.f32 %v2079_v19, %v5972_v34  ;;  %vm2242_vm10 = vcmp.eq.s32.totalorder %v6198_v17, %v6239_v9  ;;  %vm2266_vm11 = vcmp.eq.s32.totalorder %v6235_v22, %v6239_v9 }
 0x2e7   : > { %7560 = vst [vmem:[#allocation12_spill] sm:$0xff] %v6227_v42  ;;  %v2034_v31 = vmul.f32 %v6147_v1, %v1954_v50  ;;  %v7441_v28 = vand.u32 4294901760, %v6227_v42  ;;  %4493 = vmatpush3.xpose.msra.mxu1 %v2912_v38  ;;  %vm2314_vm12 = vcmp.eq.s32.totalorder %v6198_v17, %v6242_v16  ;;  %v2404_v38 = vmul.f32 %v6122_v0, %v5854_v39 }
 0x2e8   : > { %v1953_v45 = vmul.f32 %v6144_v54, %v1937_v18  ;;  %v2250_v18 = vsel %vm2242_vm10, %v6175_v47, 0.0  ;;  %v2274_v2 = vsel %vm2266_vm11, %v2205_v24, 0.0  ;;  %vm2338_vm13 = vcmp.eq.s32.totalorder %v6235_v22, %v6242_v16 }
 0x2e9   : > { %v2050_v19 = vsub.f32 1.0, %v2034_v31  ;;  %v6266_v54 = vsub.f32 %v6227_v42, %v7441_v28  ;;  %v2290_v34 = vadd.f32 %v2274_v2, %v2250_v18  ;;  %v2346_v28 = vsel %vm2338_vm13, %v2205_v24, 0.0 }
 0x2ea   : > { %v2033_v50 = vmul.f32 %v4788_v30, %v1953_v45  ;;  %v2322_v30 = vsel %vm2314_vm12, %v6175_v47, 0.0  ;;  %v7561_v1 = vrot.slane %v5846_v5, 7  ;;  %v7562_v36 = vrot.slane %v5921_v41, 7 }
 0x2eb   : > { %v2066_v31 = vmul.f32 %v2050_v19, %v6013_v58  ;;  %v7445_v2 = vrot.slane %v6250_v21, 7  ;;  %v2362_v18 = vadd.f32 %v2346_v28, %v2322_v30  ;;  %v2383_v47 = vmul.f32 %v6107_v57, %v2290_v34 }
 0x2ec   : > { %v2049_v45 = vsub.f32 1.0, %v2033_v50  ;;  %v2164_v58 = vsel %vm2149_vm1, %v7562_v36, %v7561_v1  ;;  %v7563_v61 = vrot.slane %v5833_v60, 1  ;;  %v7564_v50 = vrot.slane %v5846_v5, 1 }
 0x2ed   : > { %v2082_v19 = vadd.f32 1.0, %v2066_v31  ;;  %v7565_v4 = vrot.slane %v7544_v14, 7  ;;  %v7446_v28 = vrot.slane %v7544_v14, 1  ;;  %v6310_v34 = vadd.s32 4294967295, %v7544_v14 }
 0x2ee   : > { %v2211_v24 = vsel %vm2198_vm2, %v7564_v50, %v7563_v61  ;;  %v2065_v40 = vmul.f32 %v2049_v45, %v6045_v33  ;;  %v2420_v31 = vadd.f32 %v2404_v38, %v2383_v47  ;;  %v2441_v61 = vmul.f32 %v6133_v10, %v2362_v18  ;;  %v7567_v50 = vld [vmem:[#allocation6_spill] sm:$0xff]  ;;  %v2514_v47 = vpop.permute.xlu0 %2513 }
 0x2ef   : > { %v6306_v36 = vsel %vm2149_vm1, %v7445_v2, %v7565_v4  ;;  %v6313_v1 = vmul.f32 %v2082_v19, %v5999_v12  ;;  %v6317_v33 = vadd.s32 1, %v7544_v14  ;;  %v7568_v4 = vrot.slane %v7567_v50, 1 }
 0x2f0   : > { %v2081_v30 = vadd.f32 1.0, %v2065_v40  ;;  %vm2239_vm14 = vcmp.eq.s32.totalorder %v6306_v36, %v6310_v34  ;;  %v2457_v38 = vadd.f32 %v2441_v61, %v2420_v31  ;;  %v2401_v19 = vmul.f32 %v6122_v0, %v5846_v5  ;;  %v2571_v31 = vld [vmem:[%s7407_s2 + $0x40] sm:$0xff] }
 0x2f1   : > { %7566 = vst [vmem:[#allocation15_spill] sm:$0xff] %v6317_v33  ;;  %v6326_v2 = vsel %vm2198_vm2, %v7446_v28, %v7568_v4  ;;  %v2247_v40 = vsel %vm2239_vm14, %v2164_v58, 0.0  ;;  %vm7466_vm3 = vcmp.eq.s32.totalorder %v6306_v36, %v6317_v33  ;;  %v6362_v42 = vadd.s32 40, %v7544_v14 }
 0x2f2   : > { %7569 = vst [vmem:[#allocation6_spill] sm:$0xff] %v6326_v2  ;;  %v6337_v18 = vmul.f32 %v2081_v30, %v6003_v52  ;;  %vm7468_vm15 = vcmp.eq.s32.totalorder %v6326_v2, %v6310_v34  ;;  %vm7463_vm4 = vcmp.eq.s32.totalorder %v6326_v2, %v6317_v33  ;;  %v2478_v61 = vadd.f32 %v6164_v55, %v2457_v38 }
 0x2f3   : > { %v2271_v52 = vsel %vm7468_vm15, %v2211_v24, 0.0  ;;  %v2319_v30 = vsel %vm7466_vm3, %v2164_v58, 0.0  ;;  %v2343_v4 = vsel %vm7463_vm4, %v2211_v24, 0.0  ;;  %v2629_v38 = vsel %vm191_vm0, %v2571_v31, 0 }
 0x2f4   : > { %7570 = vst [vmem:[#allocation16_spill] sm:$0xff] %v6337_v18  ;;  %v2287_v28 = vadd.f32 %v2271_v52, %v2247_v40  ;;  %v2359_v43 = vadd.f32 %v2343_v4, %v2319_v30  ;;  %v2558_v44 = vmul.f32 %v2514_v47, %v2478_v61  ;;  %v6369_v24 = vand.u32 4294901760, %v2629_v38 }
 0x2f5   : > { %v7572_v12 = vrot.slane %v5887_v11, 7  ;;  %v7573_v40 = vrot.slane %v5900_v25, 7  ;;  %v7460_v61 = vrot.slane %v7559_v48, 7  ;;  %v7459_v52 = vrot.slane %v6362_v42, 7 }
 0x2f6   : > { %v2380_v58 = vmul.f32 %v6107_v57, %v2287_v28  ;;  %v2438_v37 = vmul.f32 %v6133_v10, %v2359_v43  ;;  %7571 = vst [vmem:[#allocation17_spill] sm:$0xff] %v6369_v24  ;;  %v2590_v31 = vsel %vm191_vm0, %v2558_v44, 0  ;;  %v7574_v30 = vrot.slane %v5951_v7, 1  ;;  %4462 = vmatprep.subr.mxu0 %v6369_v24 }
 0x2f7   : > { %v2154_v47 = vsel %vm2149_vm1, %v7573_v40, %v7572_v12  ;;  %v7575_v28 = vrot.slane %v5887_v11, 1  ;;  %v6386_v4 = vand.u32 4294901760, %v2590_v31  ;;  %v6389_v20 = vsub.f32 %v2629_v38, %v6369_v24  ;;  %4463 = vmatpush3.xpose.msra.mxu0 %v6369_v24 }
 0x2f8   : > { %v2417_v45 = vadd.f32 %v2401_v19, %v2380_v58  ;;  %v6399_v44 = vsel %vm2149_vm1, %v7460_v61, %v7459_v52  ;;  %v7467_v40 = vrot.slane %v6365_v53, 1  ;;  %v6406_v19 = vadd.s32 1, %v6362_v42  ;;  %4520 = vmatprep.subr.mxu0 %v6036_v26  ;;  %v2508_v52 = vpop.permute.xlu1 %2507 }
 0x2f9   : > { %v2201_v43 = vsel %vm2198_vm2, %v7575_v28, %v7574_v30  ;;  %7576 = vst [vmem:[#allocation18_spill] sm:$0xff] %v6386_v4  ;;  %7577 = vst [vmem:[#allocation19_spill] sm:$0xff] %v6389_v20  ;;  %v6403_v30 = vadd.s32 4294967295, %v6362_v42  ;;  %v6411_v58 = vsub.f32 %v2590_v31, %v6386_v4  ;;  %v6414_v12 = vand.u32 4294901760, %v6389_v20 }
 0x2fa   : > { %7578 = vst [vmem:[#allocation20_spill] sm:$0xff] %v6399_v44  ;;  %v2454_v28 = vadd.f32 %v2438_v37, %v2417_v45  ;;  %v7582_v61 = vrot.slane %v6362_v42, 1  ;;  %vm7482_vm4 = vcmp.eq.s32.totalorder %v6399_v44, %v6406_v19  ;;  %v7583_v37 = vrot.slane %v5864_v63, 7 }
 0x2fb   : > { %7579 = vst [vmem:[#allocation21_spill] sm:$0xff] %v6403_v30  ;;  %7580 = vst [vmem:[#allocation22_spill] sm:$0xff] %v6411_v58  ;;  %vm7485_vm5 = vcmp.eq.s32.totalorder %v6399_v44, %v6403_v30  ;;  %v7584_v45 = vrot.slane %v5833_v60, 7  ;;  %v2918_v18 = vsub.f32 %v6389_v20, %v6414_v12  ;;  %v2324_v60 = vsel %vm7482_vm4, %v2154_v47, 0.0 }
 0x2fc   : > { %7581 = vst [vmem:[#allocation23_spill] sm:$0xff] %v6414_v12  ;;  %v6423_v59 = vsel %vm2198_vm2, %v7582_v61, %v7467_v40  ;;  %v2475_v38 = vadd.f32 %v6164_v55, %v2454_v28  ;;  %v2252_v61 = vsel %vm7485_vm5, %v2154_v47, 0.0  ;;  %v7585_v28 = vrot.slane %v7552_v27, 7 }
 0x2fd   : > { %v2160_v31 = vsel %vm2149_vm1, %v7584_v45, %v7583_v37  ;;  %vm7484_vm3 = vcmp.eq.s32.totalorder %v6423_v59, %v6403_v30  ;;  %vm7483_vm15 = vcmp.eq.s32.totalorder %v6423_v59, %v6406_v19  ;;  %v7586_v37 = vrot.slane %v7567_v50, 7 }
 0x2fe   : > { %v2276_v40 = vsel %vm7484_vm3, %v2201_v43, 0.0  ;;  %v2555_v12 = vmul.f32 %v2508_v52, %v2475_v38  ;;  %v2919_v20 = vand.u32 4294901760, %v2918_v18  ;;  %v2348_v30 = vsel %vm7483_vm15, %v2201_v43, 0.0 }
 0x2ff   : > { %v6457_v45 = vsel %vm2149_vm1, %v7586_v37, %v7585_v28  ;;  %v2292_v58 = vadd.f32 %v2276_v40, %v2252_v61  ;;  %v2364_v44 = vadd.f32 %v2348_v30, %v2324_v60  ;;  %v7587_v47 = vrot.slane %v5854_v39, 1 }
 0x300   : > { %v7588_v33 = vrot.slane %v5864_v63, 1  ;;  %v7589_v50 = vrot.slane %v7550_v13, 1  ;;  %v7590_v28 = vrot.slane %v7552_v27, 1  ;;  %v6477_v52 = vadd.s32 4294967295, %v7552_v27  ;;  %4494 = vmatprep.subr.mxu1 %v2919_v20 }
 0x301   : > { %v6480_v43 = vsel %vm191_vm0, %v2555_v12, 0  ;;  %v2385_v40 = vmul.f32 %v6107_v57, %v2292_v58  ;;  %v6486_v30 = vadd.s32 1, %v7552_v27  ;;  %4495 = vmatpush3.xpose.msra.mxu1 %v2919_v20  ;;  %v2443_v61 = vmul.f32 %v6133_v10, %v2364_v44 }
 0x302   : > { %v2207_v2 = vsel %vm2198_vm2, %v7588_v33, %v7587_v47  ;;  %v6474_v18 = vsel %vm2198_vm2, %v7590_v28, %v7589_v50  ;;  %v2406_v33 = vmul.f32 %v6122_v0, %v5887_v11  ;;  %v6489_v38 = vand.u32 4294901760, %v6480_v43  ;;  %4552 = vmatprep.subr.mxu1 %v6022_v35 }
 0x303   : > { %vm7492_vm4 = vcmp.eq.s32.totalorder %v6457_v45, %v6477_v52  ;;  %vm7490_vm15 = vcmp.eq.s32.totalorder %v6474_v18, %v6477_v52  ;;  %vm7489_vm3 = vcmp.eq.s32.totalorder %v6457_v45, %v6486_v30  ;;  %vm7488_vm5 = vcmp.eq.s32.totalorder %v6474_v18, %v6486_v30 }
 0x304   : > { %7591 = vst [vmem:[#allocation24_spill] sm:$0xff] %v6489_v38  ;;  %v2422_v12 = vadd.f32 %v2406_v33, %v2385_v40  ;;  %v2249_v58 = vsel %vm7492_vm4, %v2160_v31, 0.0  ;;  %v2273_v27 = vsel %vm7490_vm15, %v2207_v2, 0.0  ;;  %v2321_v44 = vsel %vm7489_vm3, %v2160_v31, 0.0  ;;  %4496 = vmatprep.mubr.f32.mxu1 %v6489_v38  ;;  %v2518_v33 = vpop.permute.xlu0 %2517 }
 0x305   : > { %v2289_v20 = vadd.f32 %v2273_v27, %v2249_v58  ;;  %v2403_v60 = vmul.f32 %v6122_v0, %v5864_v63  ;;  %v2345_v47 = vsel %vm7488_vm5, %v2207_v2, 0.0  ;;  %4497 = vmatmul.mubr.f32.vlgmr.msra.gmra.mxu1 %v6219_v8  ;;  %v7592_v50 = vrot.slane %v5921_v41, 7 }
 0x306   : > { %v2459_v37 = vadd.f32 %v2443_v61, %v2422_v12  ;;  %v7593_v28 = vrot.slane %v5951_v7, 7  ;;  %v7493_v40 = vrot.slane %v6365_v53, 7  ;;  %v2361_v63 = vadd.f32 %v2345_v47, %v2321_v44  ;;  %4553 = vmatpush3.xpose.msra.mxu1 %v6022_v35 }
 0x307   : > { %v2382_v58 = vmul.f32 %v6107_v57, %v2289_v20  ;;  %v7594_v61 = vrot.slane %v5846_v5, 1  ;;  %v7595_v12 = vrot.slane %v5921_v41, 1  ;;  %v7491_v27 = vrot.slane %v6250_v21, 1  ;;  %4554 = vmatprep.subr.mxu1 %v6071_v46 }
 0x308   : > { %v2150_v31 = vsel %vm2149_vm1, %v7593_v28, %v7592_v50  ;;  %v2480_v8 = vadd.f32 %v6164_v55, %v2459_v37  ;;  %v7596_v50 = vrot.slane %v6250_v21, 7  ;;  %v6543_v5 = vadd.s32 4294967295, %v6250_v21 }
 0x309   : > { %v2213_v2 = vsel %vm2198_vm2, %v7595_v12, %v7594_v61  ;;  %v6546_v44 = vadd.s32 1, %v6250_v21  ;;  %v2419_v47 = vadd.f32 %v2403_v60, %v2382_v58  ;;  %v2440_v28 = vmul.f32 %v6133_v10, %v2361_v63 }
 0x30a   : > { %v6540_v20 = vsel %vm2149_vm1, %v7493_v40, %v7596_v50  ;;  %7598 = vst [vmem:[#allocation26_spill] sm:$0xff] %v6543_v5  ;;  %v7600_v37 = vrot.slane %v7544_v14, 1  ;;  %v2408_v12 = vmul.f32 %v6122_v0, %v5921_v41  ;;  %v2560_v50 = vmul.f32 %v2518_v33, %v2480_v8  ;;  %4555 = vmatpush3.xpose.msra.mxu1 %v6071_v46 }
 0x30b   : > { %7597 = vst [vmem:[#allocation25_spill] sm:$0xff] %v6540_v20  ;;  %7599 = vst [vmem:[#allocation27_spill] sm:$0xff] %v6546_v44  ;;  %vm7505_vm5 = vcmp.eq.s32.totalorder %v6540_v20, %v6543_v5  ;;  %vm7503_vm15 = vcmp.eq.s32.totalorder %v6540_v20, %v6546_v44  ;;  %v2456_v60 = vadd.f32 %v2440_v28, %v2419_v47  ;;  %v7601_v47 = vrot.slane %v5900_v25, 7 }
 0x30c   : > { %v6556_v61 = vsel %vm2198_vm2, %v7491_v27, %v7600_v37  ;;  %v2254_v63 = vsel %vm7505_vm5, %v2150_v31, 0.0  ;;  %v2326_v8 = vsel %vm7503_vm15, %v2150_v31, 0.0  ;;  %v2596_v33 = vsel %vm191_vm0, %v2560_v50, 0  ;;  %v2512_v37 = vpop.permute.xlu1 %2511  ;;  %4556 = vmatprep.subr.mxu1 %v6167_v15 }
 0x30d   : > { %vm7504_vm3 = vcmp.eq.s32.totalorder %v6556_v61, %v6543_v5  ;;  %vm7502_vm4 = vcmp.eq.s32.totalorder %v6556_v61, %v6546_v44  ;;  %v7602_v28 = vrot.slane %v5854_v39, 7  ;;  %v6586_v5 = vand.u32 4294901760, %v2596_v33 }
 0x30e   : > { %v2278_v58 = vsel %vm7504_vm3, %v2213_v2, 0.0  ;;  %v2477_v31 = vadd.f32 %v6164_v55, %v2456_v60  ;;  %v2350_v50 = vsel %vm7502_vm4, %v2213_v2, 0.0  ;;  %v7607_v20 = vrot.slane %v5900_v25, 1  ;;  %4557 = vmatpush3.xpose.msra.mxu1 %v6167_v15 }
 0x30f   : > { %v2294_v27 = vadd.f32 %v2278_v58, %v2254_v63  ;;  %v2156_v40 = vsel %vm2149_vm1, %v7602_v28, %v7601_v47  ;;  %7603 = vst [vmem:[#allocation28_spill] sm:$0xff] %v6586_v5  ;;  %v7604_v63 = vrot.slane %v7559_v48, 7  ;;  %v7605_v58 = vrot.slane %v7550_v13, 7  ;;  %4558 = vmatprep.subr.mxu1 %v6369_v24 }
 0x310   : > { %v2366_v46 = vadd.f32 %v2350_v50, %v2326_v8  ;;  %v7606_v28 = vrot.slane %v5887_v11, 1  ;;  %v7608_v2 = vrot.slane %v6362_v42, 1  ;;  %v7609_v44 = vrot.slane %v7559_v48, 1 }
 0x311   : > { %v6598_v39 = vsel %vm2149_vm1, %v7605_v58, %v7604_v63  ;;  %v2387_v47 = vmul.f32 %v6107_v57, %v2294_v27  ;;  %v6617_v8 = vsub.f32 %v6480_v43, %v6489_v38  ;;  %v2557_v27 = vmul.f32 %v2512_v37, %v2477_v31 }
 0x312   : > { %v2203_v60 = vsel %vm2198_vm2, %v7607_v20, %v7606_v28  ;;  %v6613_v13 = vsel %vm2198_vm2, %v7609_v44, %v7608_v2  ;;  %v6620_v50 = vadd.s32 4294967295, %v7559_v48  ;;  %v6623_v63 = vadd.s32 1, %v7559_v48  ;;  %4559 = vmatpush3.xpose.msra.mxu1 %v6369_v24 }
 0x313   : > { %v6627_v20 = vsub.f32 %v2596_v33, %v6586_v5  ;;  %v2424_v58 = vadd.f32 %v2408_v12, %v2387_v47  ;;  %v2445_v44 = vmul.f32 %v6133_v10, %v2366_v46  ;;  %v7610_v28 = vrot.slane %v5970_v56, 7  ;;  %v2522_v47 = vpop.permute.xlu0 %2521  ;;  %4616 = vmatprep.subr.mxu1 %v6022_v35 }
 0x314   : > { %v7611_v43 = vrot.slane %v6051_v32, 7  ;;  %v2587_v48 = vsel %vm191_vm0, %v2557_v27, 0  ;;  %vm2243_vm4 = vcmp.eq.s32.totalorder %v6598_v39, %v6620_v50  ;;  %vm2267_vm15 = vcmp.eq.s32.totalorder %v6613_v13, %v6620_v50 }
 0x315   : > { %vm2315_vm3 = vcmp.eq.s32.totalorder %v6598_v39, %v6623_v63  ;;  %v6644_v46 = vand.u32 4294901760, %v2587_v48  ;;  %v2461_v12 = vadd.f32 %v2445_v44, %v2424_v58  ;;  %v2251_v33 = vsel %vm2243_vm4, %v2156_v40, 0.0 }
 0x316   : > { %v2163_v37 = vsel %vm2149_vm1, %v7611_v43, %v7610_v28  ;;  %v2275_v31 = vsel %vm2267_vm15, %v2203_v60, 0.0  ;;  %v2323_v27 = vsel %vm2315_vm3, %v2156_v40, 0.0  ;;  %vm2339_vm5 = vcmp.eq.s32.totalorder %v6613_v13, %v6623_v63 }
 0x317   : > { %7612 = vst [vmem:[#allocation29_spill] sm:$0xff] %v6644_v46  ;;  %v2291_v2 = vadd.f32 %v2275_v31, %v2251_v33  ;;  %v7613_v28 = vrot.slane %v6179_v49, 1  ;;  %v7614_v58 = vrot.slane %v5970_v56, 1  ;;  %v6665_v43 = vsub.f32 %v2587_v48, %v6644_v46  ;;  %4499 = vmatprep.mubr.f32.mxu1 %v6644_v46 }
 0x318   : > { %v2482_v33 = vadd.f32 %v6164_v55, %v2461_v12  ;;  %v2347_v40 = vsel %vm2339_vm5, %v2203_v60, 0.0  ;;  %v2405_v31 = vmul.f32 %v6122_v0, %v5900_v25  ;;  %4500 = vmatmul.mubr.f32.gmra.mxu1 %v6386_v4  ;;  %v2256_v48 = vsel %vm2240_vm6, %v2163_v37, 0.0 }
 0x319   : > { %v2210_v44 = vsel %vm2198_vm2, %v7614_v58, %v7613_v28  ;;  %v2363_v38 = vadd.f32 %v2347_v40, %v2323_v27  ;;  %v2384_v28 = vmul.f32 %v6107_v57, %v2291_v2  ;;  %v2328_v25 = vsel %vm2312_vm7, %v2163_v37, 0.0 }
 0x31a   : > { %v2280_v60 = vsel %vm2264_vm8, %v2210_v44, 0.0  ;;  %v2562_v12 = vmul.f32 %v2522_v47, %v2482_v33  ;;  %v2352_v2 = vsel %vm2336_vm9, %v2210_v44, 0.0  ;;  %v7615_v46 = vrot.slane %v5951_v7, 7 }
 0x31b   : > { %v2296_v58 = vadd.f32 %v2280_v60, %v2256_v48  ;;  %v2421_v27 = vadd.f32 %v2405_v31, %v2384_v28  ;;  %v2442_v40 = vmul.f32 %v6133_v10, %v2363_v38  ;;  %v2368_v4 = vadd.f32 %v2352_v2, %v2328_v25  ;;  %v2516_v48 = vpop.permute.xlu1 %2515 }
 0x31c   : > { %v7616_v24 = vrot.slane %v5887_v11, 7  ;;  %v2602_v47 = vsel %vm191_vm0, %v2562_v12, 0  ;;  %v2410_v37 = vmul.f32 %v6122_v0, %v5970_v56  ;;  %v7617_v29 = vrot.slane %v5921_v41, 1 }
 0x31d   : > { %v2389_v6 = vmul.f32 %v6107_v57, %v2296_v58  ;;  %v7618_v62 = vrot.slane %v5951_v7, 1  ;;  %v6706_v44 = vand.u32 4294901760, %v2602_v47  ;;  %v2458_v11 = vadd.f32 %v2442_v40, %v2421_v27 }
 0x31e   : > { %v2152_v3 = vsel %vm2149_vm1, %v7616_v24, %v7615_v46  ;;  %v7619_v33 = vrot.slane %v6365_v53, 7  ;;  %v7620_v24 = vrot.slane %v6362_v42, 7  ;;  %v7621_v31 = vrot.slane %v6250_v21, 1 }
 0x31f   : > { %v2199_v38 = vsel %vm2198_vm2, %v7618_v62, %v7617_v29  ;;  %v7622_v41 = vrot.slane %v6365_v53, 1  ;;  %v2426_v60 = vadd.f32 %v2410_v37, %v2389_v6  ;;  %v2447_v12 = vmul.f32 %v6133_v10, %v2368_v4 }
 0x320   : > { %v6714_v46 = vsel %vm2149_vm1, %v7620_v24, %v7619_v33  ;;  %v6726_v58 = vadd.s32 4294967295, %v6365_v53  ;;  %v6729_v42 = vadd.s32 1, %v6365_v53  ;;  %v2479_v25 = vadd.f32 %v6164_v55, %v2458_v11  ;;  %v2526_v53 = vpop.permute.xlu0 %2525 }
 0x321   : > { %v6722_v28 = vsel %vm2198_vm2, %v7622_v41, %v7621_v31  ;;  %v2407_v21 = vmul.f32 %v6122_v0, %v5951_v7  ;;  %v7514_v2 = vand.u32 4294901760, %v6617_v8  ;;  %v7623_v27 = vrot.slane %v6150_v51, 7 }
 0x322   : > { %v7624_v40 = vrot.slane %v6179_v49, 7  ;;  %v2463_v6 = vadd.f32 %v2447_v12, %v2426_v60  ;;  %vm2245_vm6 = vcmp.eq.s32.totalorder %v6714_v46, %v6726_v58  ;;  %vm2269_vm7 = vcmp.eq.s32.totalorder %v6722_v28, %v6726_v58 }
 0x323   : > { %vm2317_vm8 = vcmp.eq.s32.totalorder %v6714_v46, %v6729_v42  ;;  %v2559_v7 = vmul.f32 %v2516_v48, %v2479_v25  ;;  %v2253_v37 = vsel %vm2245_vm6, %v2152_v3, 0.0  ;;  %v2277_v29 = vsel %vm2269_vm7, %v2199_v38, 0.0 }
 0x324   : > { %v2159_v4 = vsel %vm2149_vm1, %v7624_v40, %v7623_v27  ;;  %v2325_v62 = vsel %vm2317_vm8, %v2152_v3, 0.0  ;;  %v2484_v11 = vadd.f32 %v6164_v55, %v2463_v6  ;;  %v2293_v33 = vadd.f32 %v2277_v29, %v2253_v37 }
 0x325   : > { %vm2341_vm9 = vcmp.eq.s32.totalorder %v6722_v28, %v6729_v42  ;;  %v2712_v24 = vsub.f32 %v6617_v8, %v7514_v2  ;;  %v6763_v31 = vsub.f32 %v2602_v47, %v6706_v44  ;;  %v2593_v41 = vsel %vm191_vm0, %v2559_v7, 0 }
 0x326   : > { %v2349_v48 = vsel %vm2341_vm9, %v2199_v38, 0.0  ;;  %v7625_v3 = vrot.slane %v6245_v23, 1  ;;  %v7626_v60 = vrot.slane %v6150_v51, 1  ;;  %v6775_v25 = vand.u32 4294901760, %v2593_v41 }
 0x327   : > { %v2564_v27 = vmul.f32 %v2526_v53, %v2484_v11  ;;  %v2365_v40 = vadd.f32 %v2349_v48, %v2325_v62  ;;  %v2386_v47 = vmul.f32 %v6107_v57, %v2293_v33  ;;  %v2713_v6 = vand.u32 4294901760, %v2712_v24 }
 0x328   : > { %v2206_v12 = vsel %vm2198_vm2, %v7626_v60, %v7625_v3  ;;  %v2258_v7 = vsel %vm2242_vm10, %v2159_v4, 0.0  ;;  %4502 = vmatprep.mubr.f32.mxu1 %v6775_v25  ;;  %v2330_v62 = vsel %vm2314_vm12, %v2159_v4, 0.0  ;;  %v6794_v11 = vsub.f32 %v2593_v41, %v6775_v25 }
 0x329   : > { %v2282_v38 = vsel %vm2266_vm11, %v2206_v12, 0.0  ;;  %v2354_v37 = vsel %vm2338_vm13, %v2206_v12, 0.0  ;;  %v2608_v29 = vsel %vm191_vm0, %v2564_v27, 0  ;;  %v2423_v3 = vadd.f32 %v2407_v21, %v2386_v47  ;;  %4464 = vmatprep.mubr.f32.mxu0 %v2713_v6  ;;  %4503 = vmatmul.mubr.f32.gmra.mxu1 %v6586_v5  ;;  %v2520_v27 = vpop.permute.xlu1 %2519 }
 0x32a   : > { %v2444_v53 = vmul.f32 %v6133_v10, %v2365_v40  ;;  %v6796_v9 = vand.u32 4294901760, %v2608_v29  ;;  %v2298_v22 = vadd.f32 %v2282_v38, %v2258_v7  ;;  %v2370_v33 = vadd.f32 %v2354_v37, %v2330_v62  ;;  %v7632_v38 = vld [vmem:[#allocation6_spill] sm:$0xff]  ;;  %v7637_v62 = vld [vmem:[#allocation5_spill] sm:$0xff] }
 0x32b   : > { %v7627_v21 = vand.u32 4294901760, %v6266_v54  ;;  %v2412_v48 = vmul.f32 %v6122_v0, %v6150_v51  ;;  %v7628_v17 = vrot.slane %v6051_v32, 7  ;;  %v7629_v16 = vrot.slane %v6313_v1, 7 }
 0x32c   : > { %v2460_v24 = vadd.f32 %v2444_v53, %v2423_v3  ;;  %v7630_v41 = vrot.slane %v5970_v56, 1  ;;  %v7631_v60 = vrot.slane %v6051_v32, 1  ;;  %v2391_v54 = vmul.f32 %v6107_v57, %v2298_v22  ;;  %v7634_v3 = vld [vmem:[#allocation15_spill] sm:$0xff] }
 0x32d   : > { %4465 = vmatmul.mubr.f32.vlgmr.msra.gmra.mxu0 %v7627_v21  ;;  %v2165_v4 = vsel %vm2149_vm1, %v7629_v16, %v7628_v17  ;;  %v2449_v40 = vmul.f32 %v6133_v10, %v2370_v33  ;;  %v2409_v6 = vmul.f32 %v6122_v0, %v6051_v32  ;;  %vm7633_vm10 = vcmp.eq.s32.totalorder %v7632_v38, %v6310_v34  ;;  %v7638_v16 = vld [vmem:[#allocation22_spill] sm:$0xff]  ;;  %v7639_v34 = vld [vmem:[#allocation7_spill] sm:$0xff] }
 0x32e   : > { %v2212_v12 = vsel %vm2198_vm2, %v7631_v60, %v7630_v41  ;;  %4521 = vmatpush3.xpose.msra.mxu0 %v6036_v26  ;;  %v2255_v47 = vsel %vm2239_vm14, %v2165_v4, 0.0  ;;  %v2481_v7 = vadd.f32 %v6164_v55, %v2460_v24  ;;  %vm7635_vm11 = vcmp.eq.s32.totalorder %v6306_v36, %v7634_v3 }
 0x32f   : > { %v2279_v37 = vsel %vm7633_vm10, %v2212_v12, 0.0  ;;  %v2327_v26 = vsel %vm7635_vm11, %v2165_v4, 0.0  ;;  %vm7636_vm12 = vcmp.eq.s32.totalorder %v7632_v38, %v7634_v3  ;;  %4522 = vmatprep.subr.mxu0 %v7637_v62  ;;  %v2428_v22 = vadd.f32 %v2412_v48, %v2391_v54  ;;  %v7642_v4 = vld [vmem:[#allocation16_spill] sm:$0xff] }
 0x330   : > { %v2351_v53 = vsel %vm7636_vm12, %v2212_v12, 0.0  ;;  %v2295_v33 = vadd.f32 %v2279_v37, %v2255_v47  ;;  %v7516_v17 = vand.u32 4294901760, %v6665_v43  ;;  %v2561_v24 = vmul.f32 %v2520_v27, %v2481_v7  ;;  %v2530_v37 = vpop.permute.xlu0 %2529 }
 0x331   : > { %v2367_v21 = vadd.f32 %v2351_v53, %v2327_v26  ;;  %v7515_v41 = vand.u32 4294901760, %v7638_v16  ;;  %v7640_v60 = vrot.slane %v7639_v34, 7  ;;  %v7641_v2 = vrot.slane %v6245_v23, 7  ;;  %v7645_v26 = vld [vmem:[#allocation20_spill] sm:$0xff]  ;;  %v7646_v53 = vld [vmem:[#allocation21_spill] sm:$0xff] }
 0x332   : > { %v7643_v38 = vrot.slane %v7642_v4, 1  ;;  %v7644_v12 = vrot.slane %v7639_v34, 1  ;;  %v2465_v54 = vadd.f32 %v2449_v40, %v2428_v22  ;;  %v2388_v47 = vmul.f32 %v6107_v57, %v2295_v33  ;;  %4523 = vmatpush3.xpose.msra.mxu0 %v7637_v62  ;;  %v7649_v33 = vld [vmem:[#allocation13_spill] sm:$0xff] }
 0x333   : > { %v2155_v36 = vsel %vm2149_vm1, %v7641_v2, %v7640_v60  ;;  %v2446_v27 = vmul.f32 %v6133_v10, %v2367_v21  ;;  %v2732_v7 = vsub.f32 %v6665_v43, %v7516_v17  ;;  %v2599_v2 = vsel %vm191_vm0, %v2561_v24, 0  ;;  %4524 = vmatprep.subr.mxu0 %v7649_v33 }
 0x334   : > { %v2202_v48 = vsel %vm2198_vm2, %v7644_v12, %v7643_v38  ;;  %v2742_v3 = vsub.f32 %v7638_v16, %v7515_v41  ;;  %vm7647_vm13 = vcmp.eq.s32.totalorder %v7645_v26, %v7646_v53  ;;  %vm7648_vm14 = vcmp.eq.s32.totalorder %v6423_v59, %v7646_v53 }
 0x335   : > { %v2260_v40 = vsel %vm7647_vm13, %v2155_v36, 0.0  ;;  %v2284_v22 = vsel %vm7648_vm14, %v2202_v48, 0.0  ;;  %v6865_v21 = vand.u32 4294901760, %v2599_v2  ;;  %v2486_v62 = vadd.f32 %v6164_v55, %v2465_v54 }
 0x336   : > { %v2425_v24 = vadd.f32 %v2409_v6, %v2388_v47  ;;  %v2733_v60 = vand.u32 4294901760, %v2732_v7  ;;  %v6869_v38 = vsub.f32 %v2608_v29, %v6796_v9  ;;  %v2743_v12 = vand.u32 4294901760, %v2742_v3  ;;  %v2524_v47 = vpop.permute.xlu1 %2523  ;;  %4525 = vmatpush3.xpose.msra.mxu0 %v7649_v33 }
 0x337   : > { %v2300_v41 = vadd.f32 %v2284_v22, %v2260_v40  ;;  %vm7650_vm10 = vcmp.eq.s32.totalorder %v6423_v59, %v6406_v19  ;;  %v2566_v5 = vmul.f32 %v2530_v37, %v2486_v62  ;;  %4505 = vmatprep.mubr.f32.mxu1 %v6865_v21  ;;  %vm7651_vm11 = vcmp.eq.s32.totalorder %v7645_v26, %v6406_v19  ;;  %v7657_v62 = vld [vmem:[#allocation19_spill] sm:$0xff] }
 0x338   : > { %v2356_v17 = vsel %vm7650_vm10, %v2202_v48, 0.0  ;;  %v2462_v53 = vadd.f32 %v2446_v27, %v2425_v24  ;;  %4467 = vmatprep.mubr.f32.mxu0 %v2733_v60  ;;  %v2332_v54 = vsel %vm7651_vm11, %v2155_v36, 0.0  ;;  %v2751_v6 = vand.u32 4294901760, %v6794_v11  ;;  %4506 = vmatmul.mubr.f32.gmra.mxu1 %v6706_v44 }
 0x339   : > { %4468 = vmatmul.mubr.f32.gmra.mxu0 %v2743_v12  ;;  %v2372_v29 = vadd.f32 %v2356_v17, %v2332_v54  ;;  %v2393_v7 = vmul.f32 %v6107_v57, %v2300_v41  ;;  %v2414_v59 = vmul.f32 %v6122_v0, %v7639_v34  ;;  %v2761_v48 = vand.u32 4294901760, %v6627_v20  ;;  %4526 = vmatprep.subr.mxu0 %v7657_v62 }
 0x33a   : > { %v2614_v27 = vsel %vm191_vm0, %v2566_v5, 0  ;;  %v2483_v37 = vadd.f32 %v6164_v55, %v2462_v53  ;;  %v7652_v19 = vrot.slane %v6179_v49, 7  ;;  %v7653_v36 = vrot.slane %v5970_v56, 7  ;;  %4527 = vmatpush3.xpose.msra.mxu0 %v7657_v62 }
 0x33b   : > { %v7654_v17 = vrot.slane %v6150_v51, 1  ;;  %v7655_v41 = vrot.slane %v6179_v49, 1  ;;  %v6899_v40 = vand.u32 4294901760, %v2614_v27  ;;  %v2430_v5 = vadd.f32 %v2414_v59, %v2393_v7  ;;  %v2534_v59 = vpop.permute.xlu0 %2533 }
 0x33c   : > { %v2161_v3 = vsel %vm2149_vm1, %v7653_v36, %v7652_v19  ;;  %v2451_v22 = vmul.f32 %v6133_v10, %v2372_v29  ;;  %vm7656_vm12 = vcmp.eq.s32.totalorder %v6457_v45, %v6477_v52  ;;  %v2563_v24 = vmul.f32 %v2524_v47, %v2483_v37  ;;  %v7661_v19 = vld [vmem:[#allocation9_spill] sm:$0xff] }
 0x33d   : > { %v2208_v26 = vsel %vm2198_vm2, %v7655_v41, %v7654_v17  ;;  %v2257_v56 = vsel %vm7656_vm12, %v2161_v3, 0.0  ;;  %vm7658_vm13 = vcmp.eq.s32.totalorder %v6474_v18, %v6477_v52  ;;  %vm7659_vm14 = vcmp.eq.s32.totalorder %v6457_v45, %v6486_v30  ;;  %4584 = vmatprep.subr.mxu0 %v7661_v19 }
 0x33e   : > { %v2281_v60 = vsel %vm7658_vm13, %v2208_v26, 0.0  ;;  %v2329_v33 = vsel %vm7659_vm14, %v2161_v3, 0.0  ;;  %vm7660_vm10 = vcmp.eq.s32.totalorder %v6474_v18, %v6486_v30  ;;  %v6916_v53 = vsub.f32 %v2599_v2, %v6865_v21 }
 0x33f   : > { %v2353_v12 = vsel %vm7660_vm10, %v2208_v26, 0.0  ;;  %v2467_v54 = vadd.f32 %v2451_v22, %v2430_v5  ;;  %v2297_v29 = vadd.f32 %v2281_v60, %v2257_v56  ;;  %v6919_v47 = vsub.f32 %v2614_v27, %v6899_v40  ;;  %v7666_v60 = vld [vmem:[#allocation25_spill] sm:$0xff] }
 0x340   : > { %v2369_v7 = vadd.f32 %v2353_v12, %v2329_v33  ;;  %v2605_v52 = vsel %vm191_vm0, %v2563_v24, 0  ;;  %v2752_v45 = vsub.f32 %v6794_v11, %v2751_v6  ;;  %v2762_v18 = vsub.f32 %v6627_v20, %v2761_v48  ;;  %v7667_v33 = vld [vmem:[#allocation26_spill] sm:$0xff] }
 0x341   : > { %v6929_v30 = vand.u32 4294901760, %v2605_v52  ;;  %v2488_v2 = vadd.f32 %v6164_v55, %v2467_v54  ;;  %v2390_v27 = vmul.f32 %v6107_v57, %v2297_v29  ;;  %v2411_v37 = vmul.f32 %v6122_v0, %v6179_v49  ;;  %v7670_v29 = vld [vmem:[#allocation27_spill] sm:$0xff] }
 0x342   : > { %v2448_v36 = vmul.f32 %v6133_v10, %v2369_v7  ;;  %v2753_v3 = vand.u32 4294901760, %v2752_v45  ;;  %v7662_v17 = vrot.slane %v6313_v1, 7  ;;  %v7663_v41 = vrot.slane %v7642_v4, 7 }
 0x343   : > { %v7664_v5 = vrot.slane %v6051_v32, 1  ;;  %v7665_v22 = vrot.slane %v6313_v1, 1  ;;  %v2568_v49 = vmul.f32 %v2534_v59, %v2488_v2  ;;  %v2427_v62 = vadd.f32 %v2411_v37, %v2390_v27  ;;  %4508 = vmatprep.mubr.f32.mxu1 %v6929_v30  ;;  %v2528_v37 = vpop.permute.xlu1 %2527 }
 0x344   : > { %v2151_v26 = vsel %vm2149_vm1, %v7663_v41, %v7662_v17  ;;  %v2763_v24 = vand.u32 4294901760, %v2762_v18  ;;  %vm7668_vm11 = vcmp.eq.s32.totalorder %v7666_v60, %v7667_v33  ;;  %v6954_v54 = vsub.f32 %v2605_v52, %v6929_v30  ;;  %4470 = vmatprep.mubr.f32.mxu0 %v2753_v3  ;;  %4509 = vmatmul.mubr.f32.gmra.mxu1 %v6796_v9 }
 0x345   : > { %v2214_v56 = vsel %vm2198_vm2, %v7665_v22, %v7664_v5  ;;  %v2262_v12 = vsel %vm7668_vm11, %v2151_v26, 0.0  ;;  %vm7669_vm12 = vcmp.eq.s32.totalorder %v6556_v61, %v7667_v33  ;;  %vm7671_vm13 = vcmp.eq.s32.totalorder %v7666_v60, %v7670_v29 }
 0x346   : > { %v2286_v32 = vsel %vm7669_vm12, %v2214_v56, 0.0  ;;  %v2334_v7 = vsel %vm7671_vm13, %v2151_v26, 0.0  ;;  %vm7672_vm14 = vcmp.eq.s32.totalorder %v6556_v61, %v7670_v29  ;;  %v6967_v45 = vsel %vm191_vm0, %v2568_v49, 0  ;;  %4471 = vmatmul.mubr.f32.gmra.mxu0 %v2763_v24 }
 0x347   : > { %v2358_v59 = vsel %vm7672_vm14, %v2214_v56, 0.0  ;;  %v2464_v52 = vadd.f32 %v2448_v36, %v2427_v62  ;;  %v2302_v18 = vadd.f32 %v2286_v32, %v2262_v12  ;;  %v6970_v27 = vand.u32 4294901760, %v6967_v45 }
 0x348   : > { %v2374_v2 = vadd.f32 %v2358_v59, %v2334_v7  ;;  %v2416_v3 = vmul.f32 %v6122_v0, %v6313_v1  ;;  %v7673_v17 = vrot.slane %v6245_v23, 7  ;;  %v7674_v41 = vrot.slane %v6150_v51, 7 }
 0x349   : > { %v7675_v26 = vrot.slane %v7639_v34, 1  ;;  %v7676_v36 = vrot.slane %v6245_v23, 1  ;;  %v2485_v22 = vadd.f32 %v6164_v55, %v2464_v52  ;;  %v2395_v56 = vmul.f32 %v6107_v57, %v2302_v18 }
 0x34a   : > { %v2157_v61 = vsel %vm2149_vm1, %v7674_v41, %v7673_v17  ;;  %v2413_v51 = vmul.f32 %v6122_v0, %v6245_v23  ;;  %v2453_v62 = vmul.f32 %v6133_v10, %v2374_v2  ;;  %v2771_v23 = vand.u32 4294901760, %v6916_v53 }
 0x34b   : > { %v2204_v5 = vsel %vm2198_vm2, %v7676_v36, %v7675_v26  ;;  %v2259_v49 = vsel %vm2243_vm4, %v2157_v61, 0.0  ;;  %v2331_v60 = vsel %vm2315_vm3, %v2157_v61, 0.0  ;;  %v2565_v12 = vmul.f32 %v2528_v37, %v2485_v22 }
 0x34c   : > { %v2283_v24 = vsel %vm2267_vm15, %v2204_v5, 0.0  ;;  %v2355_v33 = vsel %vm2339_vm5, %v2204_v5, 0.0  ;;  %v2432_v32 = vadd.f32 %v2416_v3, %v2395_v56  ;;  %v2781_v59 = vand.u32 4294901760, %v6763_v31 }
 0x34d   : > { %v2299_v29 = vadd.f32 %v2283_v24, %v2259_v49  ;;  %v2371_v7 = vadd.f32 %v2355_v33, %v2331_v60  ;;  %v7677_v52 = vrot.slane %v7642_v4, 7  ;;  %v7678_v50 = vrot.slane %v7639_v34, 7  ;;  %v2538_v34 = vpop.permute.xlu0 %2537  ;;  %v2532_v33 = vpop.permute.xlu1 %2531 }
 0x34e   : > { %v7679_v18 = vrot.slane %v6313_v1, 1  ;;  %v7680_v13 = vrot.slane %v7642_v4, 1  ;;  %v2611_v2 = vsel %vm191_vm0, %v2565_v12, 0  ;;  %v2469_v37 = vadd.f32 %v2453_v62, %v2432_v32  ;;  %v4789_v12 = vld [vmem:[%s7406_s1] ss:$0 sm:$0xff] }
 0x34f   : > { %v2153_v39 = vsel %vm2149_vm1, %v7678_v50, %v7677_v52  ;;  %v2392_v3 = vmul.f32 %v6107_v57, %v2299_v29  ;;  %v2450_v17 = vmul.f32 %v6133_v10, %v2371_v7  ;;  %v7020_v41 = vand.u32 4294901760, %v2611_v2 }
 0x350   : > { %v2200_v63 = vsel %vm2198_vm2, %v7680_v13, %v7679_v18  ;;  %v2772_v61 = vsub.f32 %v6916_v53, %v2771_v23  ;;  %v2782_v1 = vsub.f32 %v6763_v31, %v2781_v59  ;;  %v2261_v14 = vsel %vm2245_vm6, %v2153_v39, 0.0 }
 0x351   : > { %v2490_v26 = vadd.f32 %v6164_v55, %v2469_v37  ;;  %v2429_v57 = vadd.f32 %v2413_v51, %v2392_v3  ;;  %v2285_v36 = vsel %vm2269_vm7, %v2200_v63, 0.0  ;;  %v2333_v5 = vsel %vm2317_vm8, %v2153_v39, 0.0  ;;  %4511 = vmatprep.mubr.f32.mxu1 %v7020_v41 }
 0x352   : > { %v7039_v22 = vsub.f32 %v2611_v2, %v7020_v41  ;;  %v2773_v56 = vand.u32 4294901760, %v2772_v61  ;;  %v2783_v49 = vand.u32 4294901760, %v2782_v1  ;;  %v2301_v62 = vadd.f32 %v2285_v36, %v2261_v14  ;;  %4512 = vmatmul.mubr.f32.gmra.mxu1 %v6899_v40 }
 0x353   : > { %v2570_v24 = vmul.f32 %v2538_v34, %v2490_v26  ;;  %v2466_v60 = vadd.f32 %v2450_v17, %v2429_v57  ;;  %v2357_v58 = vsel %vm2341_vm9, %v2200_v63, 0.0  ;;  %v2415_v46 = vmul.f32 %v6122_v0, %v7642_v4  ;;  %v2536_v34 = vpop.permute.xlu1 %2535 }
 0x354   : > { %4473 = vmatprep.mubr.f32.mxu0 %v2773_v56  ;;  %v2373_v51 = vadd.f32 %v2357_v58, %v2333_v5  ;;  %v2394_v32 = vmul.f32 %v4789_v12, %v2301_v62  ;;  %v2791_v29 = vand.u32 4294901760, %v6954_v54  ;;  %v2801_v7 = vand.u32 4294901760, %v6869_v38 }
 0x355   : > { %v2626_v52 = vsel %vm191_vm0, %v2570_v24, 0  ;;  %v2487_v50 = vadd.f32 %v6164_v55, %v2466_v60  ;;  %4474 = vmatmul.mubr.f32.gmra.mxu0 %v2783_v49  ;;  %v2811_v28 = vand.u32 4294901760, %v7039_v22  ;;  %v2821_v0 = vand.u32 4294901760, %v6919_v47 }
 0x356   : > { %v2431_v42 = vadd.f32 %v2415_v46, %v2394_v32  ;;  %v2452_v4 = vmul.f32 %v6133_v10, %v2373_v51  ;;  %v2792_v39 = vsub.f32 %v6954_v54, %v2791_v29  ;;  %v7063_v18 = vsub.f32 %v6967_v45, %v6970_v27 }
 0x357   : > { %v2567_v13 = vmul.f32 %v2532_v33, %v2487_v50  ;;  %v2802_v63 = vsub.f32 %v6869_v38, %v2801_v7  ;;  %v2812_v2 = vsub.f32 %v7039_v22, %v2811_v28  ;;  %v7071_v37 = vand.u32 4294901760, %v2626_v52 }
 0x358   : > { %v2468_v10 = vadd.f32 %v2452_v4, %v2431_v42  ;;  %v2793_v3 = vand.u32 4294901760, %v2792_v39  ;;  %v2822_v45 = vsub.f32 %v6919_v47, %v2821_v0  ;;  %v2841_v57 = vand.u32 4294901760, %v7063_v18  ;;  %v7682_v4 = vld [vmem:[#allocation12_spill] sm:$0xff] }
 0x359   : > { %v2617_v17 = vsel %vm191_vm0, %v2567_v13, 0  ;;  %v2803_v61 = vand.u32 4294901760, %v2802_v63  ;;  %v2813_v1 = vand.u32 4294901760, %v2812_v2  ;;  %v7082_v36 = vsub.f32 %v2626_v52, %v7071_v37 }
 0x35a   : > { %v7077_v14 = vand.u32 4294901760, %v2617_v17  ;;  %v2489_v26 = vadd.f32 %v6164_v55, %v2468_v10  ;;  %4476 = vmatprep.mubr.f32.mxu0 %v2793_v3  ;;  %v2823_v49 = vand.u32 4294901760, %v2822_v45  ;;  %v2842_v60 = vsub.f32 %v7063_v18, %v2841_v57  ;;  %v7685_v10 = vld [vmem:[#allocation10_spill] sm:$0xff] }
 0x35b   : > { %4477 = vmatmul.mubr.f32.gmra.mxu0 %v2803_v61  ;;  %v2861_v58 = vand.u32 4294901760, %v7082_v36  ;;  %v7681_v12 = vand.u32 4294901760, %v6617_v8  ;;  %v7683_v39 = vand.u32 4294901760, %v7682_v4  ;;  %v7684_v13 = vand.u32 4294901760, %v6665_v43 }
 0x35c   : > { %v7085_v5 = vsub.f32 %v2617_v17, %v7077_v14  ;;  %v2569_v56 = vmul.f32 %v2536_v34, %v2489_v26  ;;  %4514 = vmatprep.mubr.f32.mxu1 %v7077_v14  ;;  %4479 = vmatprep.mubr.f32.mxu0 %v2813_v1  ;;  %v2843_v32 = vand.u32 4294901760, %v2842_v60  ;;  %v7686_v3 = vand.u32 4294901760, %v7638_v16 }
 0x35d   : > { %4515 = vmatmul.mubr.f32.gmra.mxu1 %v6970_v27  ;;  %v2862_v50 = vsub.f32 %v7082_v36, %v2861_v58 }
 0x35e   : > { %v2623_v62 = vsel %vm191_vm0, %v2569_v56, 0  ;;  %v2831_v55 = vand.u32 4294901760, %v7085_v5  ;;  %vm3834_vm0 = vcmask 523264  }
 0x35f   : > { %v7091_v24 = vand.u32 4294901760, %v2623_v62  ;;  %4480 = vmatmul.mubr.f32.gmra.mxu0 %v2823_v49  ;;  %v2863_v2 = vand.u32 4294901760, %v2862_v50 }
 0x360   : > { %v2832_v33 = vsub.f32 %v7085_v5, %v2831_v55 }
 0x361   : > { %v2850_v46 = vsub.f32 %v2623_v62, %v7091_v24  ;;  %4517 = vmatprep.mubr.f32.mxu1 %v7091_v24 }
 0x362   : > { %4518 = vmatmul.mubr.f32.gmra.mxu1 %v7071_v37  ;;  %v2833_v51 = vand.u32 4294901760, %v2832_v33 }
 0x363   : > { %4560 = vmatprep.mubr.f32.mxu1 %v7681_v12  ;;  %v2851_v52 = vand.u32 4294901760, %v2850_v46 }
 0x364   : > { %4482 = vmatprep.mubr.f32.mxu0 %v2833_v51 }
 0x365   : > { %4483 = vmatmul.mubr.f32.gmra.mxu0 %v2843_v32  ;;  %v2852_v42 = vsub.f32 %v2850_v46, %v2851_v52 }
 0x366   : > { %4561 = vmatmul.mubr.f32.vlgmr.msra.gmra.mxu1 %v7683_v39 }
 0x367   : > { %4563 = vmatprep.mubr.f32.mxu1 %v7684_v13  ;;  %v2853_v63 = vand.u32 4294901760, %v2852_v42  ;;  %4617 = vmatpush3.xpose.msra.mxu1 %v6022_v35  ;;  %v7687_v35 = vld [vmem:[#allocation11_spill] sm:$0xff] }
 0x368   : > { %4618 = vmatprep.subr.mxu1 %v7685_v10 }
 0x369   : > { %4485 = vmatprep.mubr.f32.mxu0 %v2853_v63 }
 0x36a   : > { %4486 = vmatmul.mubr.f32.gmra.mxu0 %v2863_v2  ;;  %4564 = vmatmul.mubr.f32.gmra.mxu1 %v7686_v3 }
 0x36b   : > { %4528 = vmatprep.mubr.f32.mxu0 %v6617_v8  ;;  %4566 = vmatprep.mubr.f32.mxu1 %v2751_v6  ;;  %v7688_v8 = vld [vmem:[#allocation17_spill] sm:$0xff] }
 0x36c   : > { %4619 = vmatpush3.xpose.msra.mxu1 %v7685_v10 }
 0x36d   : > { %4620 = vmatprep.subr.mxu1 %v6167_v15 }
 0x36e   : > { %4529 = vmatmul.mubr.f32.vlgmr.msra.gmra.mxu0 %v7682_v4  ;;  %4567 = vmatmul.mubr.f32.gmra.mxu1 %v2761_v48 }
 0x36f   : > { %4585 = vmatpush3.xpose.msra.mxu0 %v7661_v19  ;;  %4531 = vmatprep.mubr.f32.mxu0 %v6665_v43  ;;  %v7689_v43 = vld [vmem:[#allocation8_spill] sm:$0xff] }
 0x370   : > { %4569 = vmatprep.mubr.f32.mxu1 %v2771_v23  ;;  %4586 = vmatprep.subr.mxu0 %v7687_v35 }
 0x371   : > { %4621 = vmatpush3.xpose.msra.mxu1 %v6167_v15  ;;  %v7690_v15 = vld [vmem:[#allocation23_spill] sm:$0xff] }
 0x372   : > { %4532 = vmatmul.mubr.f32.gmra.mxu0 %v7638_v16  ;;  %4570 = vmatmul.mubr.f32.gmra.mxu1 %v2781_v59  ;;  %v7694_v16 = vld [vmem:[#allocation18_spill] sm:$0xff] }
 0x373   : > { %4534 = vmatprep.mubr.f32.mxu0 %v6794_v11  ;;  %4572 = vmatprep.mubr.f32.mxu1 %v2791_v29  ;;  %v7693_v11 = vld [vmem:[#allocation29_spill] sm:$0xff] }
 0x374   : > { %4587 = vmatpush3.xpose.msra.mxu0 %v7687_v35  ;;  %4622 = vmatprep.subr.mxu1 %v7688_v8 }
 0x375   : > { %4588 = vmatprep.subr.mxu0 %v7689_v43  ;;  %4623 = vmatpush3.xpose.msra.mxu1 %v7688_v8 }
 0x376   : > { %4535 = vmatmul.mubr.f32.gmra.mxu0 %v6627_v20  ;;  %4573 = vmatmul.mubr.f32.gmra.mxu1 %v2801_v7  ;;  %v7691_v20 = vld [vmem:[#allocation24_spill] sm:$0xff] }
 0x377   : > { %4537 = vmatprep.mubr.f32.mxu0 %v6916_v53  ;;  %4575 = vmatprep.mubr.f32.mxu1 %v2811_v28  ;;  %v7202_v53 = vld [vmem:[%s7406_s1 + $0x6] ss:$0 sm:$0xff] }
 0x378   : > { %4589 = vmatpush3.xpose.msra.mxu0 %v7689_v43 }
 0x379   : > { %4590 = vmatprep.subr.mxu0 %v7690_v15 }
 0x37a   : > { %4538 = vmatmul.mubr.f32.gmra.mxu0 %v6763_v31  ;;  %4576 = vmatmul.mubr.f32.gmra.mxu1 %v2821_v0  ;;  %v7692_v31 = vld [vmem:[#allocation14_spill] sm:$0xff] }
 0x37b   : > { %4540 = vmatprep.mubr.f32.mxu0 %v6954_v54  ;;  %4578 = vmatprep.mubr.f32.mxu1 %v2831_v55 }
 0x37c   : > { %4591 = vmatpush3.xpose.msra.mxu0 %v7690_v15 }
 0x37e   : > { %4541 = vmatmul.mubr.f32.gmra.mxu0 %v6869_v38  ;;  %4579 = vmatmul.mubr.f32.gmra.mxu1 %v2841_v57  ;;  %v7695_v38 = vld [vmem:[#allocation28_spill] sm:$0xff] }
 0x37f   : > { %4543 = vmatprep.mubr.f32.mxu0 %v7039_v22  ;;  %4581 = vmatprep.mubr.f32.mxu1 %v2851_v52 }
 0x382   : > { %4544 = vmatmul.mubr.f32.gmra.mxu0 %v6919_v47  ;;  %4582 = vmatmul.mubr.f32.gmra.mxu1 %v2861_v58 }
 0x383   : > { %4546 = vmatprep.mubr.f32.mxu0 %v7085_v5  ;;  %4624 = vmatprep.mubr.f32.mxu1 %v7691_v20 }
 0x386   : > { %4547 = vmatmul.mubr.f32.gmra.mxu0 %v7063_v18  ;;  %4625 = vmatmul.mubr.f32.vlgmr.msra.gmra.mxu1 %v7692_v31 }
 0x387   : > { %4549 = vmatprep.mubr.f32.mxu0 %v2850_v46  ;;  %4627 = vmatprep.mubr.f32.mxu1 %v7693_v11 }
 0x38a   : > { %4550 = vmatmul.mubr.f32.gmra.mxu0 %v7082_v36  ;;  %4628 = vmatmul.mubr.f32.gmra.mxu1 %v7694_v16 }
 0x38b   : > { %4592 = vmatprep.mubr.f32.mxu0 %v7691_v20  ;;  %4630 = vmatprep.mubr.f32.mxu1 %v6775_v25 }
 0x38e   : > { %4593 = vmatmul.mubr.f32.vlgmr.msra.gmra.mxu0 %v7692_v31  ;;  %4631 = vmatmul.mubr.f32.gmra.mxu1 %v7695_v38 }
 0x38f   : > { %4595 = vmatprep.mubr.f32.mxu0 %v7693_v11  ;;  %4633 = vmatprep.mubr.f32.mxu1 %v6865_v21 }
 0x392   : > { %4596 = vmatmul.mubr.f32.gmra.mxu0 %v7694_v16  ;;  %4634 = vmatmul.mubr.f32.gmra.mxu1 %v6706_v44 }
 0x393   : > { %4598 = vmatprep.mubr.f32.mxu0 %v6775_v25  ;;  %4636 = vmatprep.mubr.f32.mxu1 %v6929_v30 }
 0x396   : > { %4599 = vmatmul.mubr.f32.gmra.mxu0 %v7695_v38  ;;  %4637 = vmatmul.mubr.f32.gmra.mxu1 %v6796_v9 }
 0x397   : > { %4601 = vmatprep.mubr.f32.mxu0 %v6865_v21  ;;  %4639 = vmatprep.mubr.f32.mxu1 %v7020_v41 }
 0x39a   : > { %4602 = vmatmul.mubr.f32.gmra.mxu0 %v6706_v44  ;;  %4640 = vmatmul.mubr.f32.gmra.mxu1 %v6899_v40 }
 0x39b   : > { %4604 = vmatprep.mubr.f32.mxu0 %v6929_v30  ;;  %4642 = vmatprep.mubr.f32.mxu1 %v7077_v14 }
 0x39e   : > { %4605 = vmatmul.mubr.f32.gmra.mxu0 %v6796_v9  ;;  %4643 = vmatmul.mubr.f32.gmra.mxu1 %v6970_v27 }
 0x39f   : > { %4607 = vmatprep.mubr.f32.mxu0 %v7020_v41  ;;  %4645 = vmatprep.mubr.f32.mxu1 %v7091_v24 }
 0x3a2   : > { %4608 = vmatmul.mubr.f32.gmra.mxu0 %v6899_v40  ;;  %4646 = vmatmul.mubr.f32.gmra.mxu1 %v7071_v37 }
 0x3a3   : > { %4610 = vmatprep.mubr.f32.mxu0 %v7077_v14 }
 0x3a6   : > { %4611 = vmatmul.mubr.f32.gmra.mxu0 %v6970_v27 }
 0x3a7   : > { %4613 = vmatprep.mubr.f32.mxu0 %v7091_v24 }
 0x3aa   : > { %4614 = vmatmul.mubr.f32.gmra.mxu0 %v7071_v37 }
 0x3c5   : > { %v7189_v44 = vpop.f32.mrf.mxu1 }
 0x3c7   : > { %v7191_v25 = vpop.f32.mrf.mxu1 }
 0x3d8   : > { %v4501_v9 = vpop.f32.mrf.mxu1 }
 0x3da   : > { %v7195_v6 = vpop.f32.mrf.mxu1 }
 0x3e9   : > { %v4504_v40 = vpop.f32.mrf.mxu1 }
 0x3eb   : > { %v2980_v19 = vpop.f32.mrf.mxu1 }
 0x3ed   : > { %v7193_v21 = vpop.f32.mrf.mxu0 }
 0x3ef   : > { %v7197_v48 = vpop.f32.mrf.mxu0 }
 0x3f8   : > { %v4507_v27 = vpop.f32.mrf.mxu1 }
 0x3f9   : > { %v4469_v47 = vpop.f32.mrf.mxu0 }
 0x3fa   : > { %v2746_v30 = vadd.f32 %v4469_v47, %v7202_v53  ;;  %v2992_v59 = vpop.f32.mrf.mxu1 }
 0x3fb   : > { %v7207_v23 = vpop.f32.mrf.mxu0 }
 0x3fc   : > { %v7205_v54 = vadd.f32 %v4501_v9, %v2746_v30 }
 0x404   : > { %v7213_v0 = vpop.f32.mrf.mxu1 }
 0x406   : > { %v4472_v41 = vpop.f32.mrf.mxu0  ;;  %v7217_v37 = vpop.f32.mrf.mxu1 }
 0x407   : > { %v2766_v22 = vadd.f32 %v4472_v41, %v7202_v53 }
 0x408   : > { %v2755_v29 = vpop.f32.mrf.mxu0 }
 0x409   : > { %v2756_v7 = vadd.f32 %v7202_v53, %v2755_v29  ;;  %v7211_v28 = vadd.f32 %v4504_v40, %v2766_v22 }
 0x40b   : > { %v7215_v18 = vadd.f32 %v2980_v19, %v2756_v7 }
 0x412   : > { %v4513_v34 = vpop.f32.mrf.mxu1 }
 0x414   : > { %v7223_v26 = vpop.f32.mrf.mxu1 }
 0x415   : > { %v4475_v17 = vpop.f32.mrf.mxu0 }
 0x416   : > { %v2786_v61 = vadd.f32 %v4475_v17, %v7202_v53 }
 0x417   : > { %v2775_v1 = vpop.f32.mrf.mxu0 }
 0x418   : > { %v2776_v45 = vadd.f32 %v7202_v53, %v2775_v1  ;;  %v7221_v14 = vadd.f32 %v4507_v27, %v2786_v61 }
 0x41a   : > { %v7225_v57 = vadd.f32 %v2992_v59, %v2776_v45 }
 0x41b   : > { %v7227_v36 = vpop.f32.mrf.mxu0 }
 0x41d   : > { %v4516_v5 = vpop.f32.mrf.mxu1  ;;  %v7229_v56 = vpop.f32.mrf.mxu0 }
 0x41f   : > { %v3028_v49 = vpop.f32.mrf.mxu1  ;;  %v4481_v62 = vpop.f32.mrf.mxu0 }
 0x420   : > { %v2826_v55 = vadd.f32 %v4481_v62, %v7202_v53 }
 0x421   : > { %v7232_v24 = vpop.f32.mrf.mxu0 }
 0x422   : > { %v4519_v60 = vpop.f32.mrf.mxu1  ;;  %v7234_v33 = vadd.f32 %v4513_v34, %v2826_v55 }
 0x424   : > { %v3040_v58 = vpop.f32.mrf.mxu1 }
 0x425   : > { %v4484_v46 = vpop.f32.mrf.mxu0 }
 0x426   : > { %v2846_v51 = vadd.f32 %v4484_v46, %v7202_v53  ;;  %v4562_v12 = vpop.f32.mrf.mxu1 }
 0x427   : > { %v2835_v32 = vpop.f32.mrf.mxu0 }
 0x428   : > { %v2836_v52 = vadd.f32 %v7202_v53, %v2835_v32  ;;  %v3308_v50 = vpop.f32.mrf.mxu1  ;;  %v7238_v42 = vadd.f32 %v4516_v5, %v2846_v51 }
 0x42a   : > { %7696 = vst [vmem:[#allocation6_spill] sm:$0xff] %v7238_v42  ;;  %v4487_v4 = vpop.f32.mrf.mxu0  ;;  %v7240_v39 = vpop.f32.mrf.mxu1  ;;  %v7242_v13 = vadd.f32 %v3028_v49, %v2836_v52  ;;  %v2716_v49 = vadd.f32 %v7202_v53, %v7197_v48 }
 0x42b   : > { %v2866_v63 = vadd.f32 %v4487_v4, %v7202_v53  ;;  %v2736_v4 = vadd.f32 %v7202_v53, %v7207_v23 }
 0x42c   : > { %v2855_v2 = vpop.f32.mrf.mxu0  ;;  %v3324_v10 = vpop.f32.mrf.mxu1  ;;  %v2957_v51 = vadd.f32 %v7191_v25, %v2716_v49 }
 0x42d   : > { %v2856_v3 = vadd.f32 %v7202_v53, %v2855_v2  ;;  %v7246_v35 = vadd.f32 %v4519_v60, %v2866_v63  ;;  %v2726_v60 = vadd.f32 %v7193_v21, %v7202_v53 }
 0x42e   : > { %v4530_v8 = vpop.f32.mrf.mxu0  ;;  %v7248_v43 = vpop.f32.mrf.mxu1 }
 0x42f   : > { %7697 = vst [vmem:[#allocation15_spill] sm:$0xff] %v7246_v35  ;;  %v7250_v15 = vadd.f32 %v3040_v58, %v2856_v3  ;;  %v2963_v63 = vadd.f32 %v7189_v44, %v2726_v60  ;;  %v2969_v35 = vadd.f32 %v7195_v6, %v2736_v4  ;;  %v2806_v6 = vadd.f32 %v7227_v36, %v7202_v53 }
 0x430   : > { %v3126_v20 = vpop.f32.mrf.mxu0  ;;  %v7252_v31 = vpop.f32.mrf.mxu1  ;;  %v2816_v36 = vadd.f32 %v7202_v53, %v7232_v24 }
 0x431   : > { %7698 = vst [vmem:[#allocation5_spill] sm:$0xff] %v7250_v15  ;;  %v3127_v48 = vadd.f32 %v3126_v20, %v2957_v51  ;;  %v2796_v20 = vadd.f32 %v7202_v53, %v7229_v56 }
 0x432   : > { %v4533_v11 = vpop.f32.mrf.mxu0  ;;  %v7254_v16 = vpop.f32.mrf.mxu1 }
 0x434   : > { %v3140_v38 = vpop.f32.mrf.mxu0  ;;  %v7256_v9 = vpop.f32.mrf.mxu1 }
 0x435   : > { %v3141_v49 = vadd.f32 %v3140_v38, %v2969_v35 }
 0x436   : > { %v7258_v40 = vpop.f32.mrf.mxu0  ;;  %v7260_v47 = vpop.f32.mrf.mxu1 }
 0x437   : > { %v3325_v60 = vadd.f32 %v3324_v10, %v3141_v49 }
 0x438   : > { %v3154_v30 = vpop.f32.mrf.mxu0  ;;  %v7262_v19 = vpop.f32.mrf.mxu1 }
 0x43a   : > { %v7264_v27 = vpop.f32.mrf.mxu0  ;;  %v7266_v59 = vpop.f32.mrf.mxu1 }
 0x43c   : > { %v7268_v41 = vpop.f32.mrf.mxu0  ;;  %v7270_v22 = vpop.f32.mrf.mxu1 }
 0x43e   : > { %v4542_v29 = vpop.f32.mrf.mxu0  ;;  %v7272_v7 = vpop.f32.mrf.mxu1 }
 0x43f   : > { %7699 = vst [vmem:[#allocation22_spill] sm:$0xff] %v7272_v7  ;;  %v3309_v7 = vadd.f32 %v3308_v50, %v3127_v48 }
 0x440   : > { %v3182_v17 = vpop.f32.mrf.mxu0  ;;  %v7274_v34 = vpop.f32.mrf.mxu1 }
 0x441   : > { %7700 = vst [vmem:[#allocation7_spill] sm:$0xff] %v7274_v34 }
 0x442   : > { %v7276_v61 = vpop.f32.mrf.mxu0  ;;  %v7278_v1 = vpop.f32.mrf.mxu1 }
 0x443   : > { %7701 = vst [vmem:[#allocation16_spill] sm:$0xff] %v7278_v1  ;;  %v3134_v1 = vadd.f32 %v4530_v8, %v2963_v63  ;;  %v3148_v8 = vadd.f32 %v4533_v11, %v7205_v54  ;;  %v3011_v54 = vadd.f32 %v7213_v0, %v2806_v6  ;;  %v3017_v0 = vadd.f32 %v7223_v26, %v2816_v36 }
 0x444   : > { %v7280_v45 = vpop.f32.mrf.mxu0  ;;  %v7282_v5 = vpop.f32.mrf.mxu1 }
 0x445   : > { %7702 = vst [vmem:[#allocation20_spill] sm:$0xff] %v7282_v5 }
 0x446   : > { %v7286_v62 = vpop.f32.mrf.mxu0  ;;  %v4626_v55 = vpop.f32.mrf.mxu1 }
 0x447   : > { %7703 = vst [vmem:[#allocation21_spill] sm:$0xff] %v7286_v62 }
 0x448   : > { %v7290_v58 = vpop.f32.mrf.mxu0  ;;  %v3676_v46 = vpop.f32.mrf.mxu1 }
 0x44a   : > { %v7293_v32 = vpop.f32.mrf.mxu0  ;;  %v4629_v52 = vpop.f32.mrf.mxu1 }
 0x44b   : > { %7704 = vst [vmem:[#allocation13_spill] sm:$0xff] %v7293_v32  ;;  %v3317_v32 = vadd.f32 %v4562_v12, %v3134_v1  ;;  %v3155_v1 = vadd.f32 %v3154_v30, %v7215_v18  ;;  %v3190_v18 = vadd.f32 %v4542_v29, %v3011_v54 }
 0x44c   : > { %v7298_v2 = vpop.f32.mrf.mxu0  ;;  %v3688_v3 = vpop.f32.mrf.mxu1 }
 0x44e   : > { %v4594_v5 = vpop.f32.mrf.mxu0  ;;  %v7300_v21 = vpop.f32.mrf.mxu1  ;;  %v7706_v6 = vld [vmem:[#allocation21_spill] sm:$0xff] }
 0x44f   : > { %v3518_v23 = vadd.f32 %v4594_v5, %v3317_v32  ;;  %v3333_v5 = vadd.f32 %v7240_v39, %v3148_v8 }
 0x450   : > { %v3511_v25 = vpop.f32.mrf.mxu0  ;;  %v3700_v34 = vpop.f32.mrf.mxu1 }
 0x451   : > { %v3512_v15 = vadd.f32 %v3511_v25, %v3309_v7  ;;  %v3683_v12 = vadd.f32 %v4626_v55, %v3518_v23  ;;  %v3162_v55 = vadd.f32 %v7258_v40, %v7211_v28  ;;  %v3197_v28 = vadd.f32 %v7280_v45, %v3017_v0 }
 0x452   : > { %v4597_v62 = vpop.f32.mrf.mxu0  ;;  %v7308_v50 = vpop.f32.mrf.mxu1  ;;  %v3381_v40 = vadd.f32 %v7260_v47, %v3190_v18  ;;  %v3204_v25 = vadd.f32 %v7276_v61, %v7234_v33 }
 0x453   : > { %v3677_v42 = vadd.f32 %v3676_v46, %v3512_v15  ;;  %v3005_v15 = vadd.f32 %v7217_v37, %v2796_v20  ;;  %v3530_v11 = vadd.f32 %v4597_v62, %v3333_v5  ;;  %v3341_v37 = vadd.f32 %v7252_v31, %v3155_v1  ;;  %v7708_v1 = vld [vmem:[#allocation5_spill] sm:$0xff]  ;;  %v7709_v5 = vld [vmem:[#allocation22_spill] sm:$0xff] }
 0x454   : > { %v3523_v44 = vpop.f32.mrf.mxu0  ;;  %v3712_v56 = vpop.f32.mrf.mxu1  ;;  %v3349_v53 = vadd.f32 %v7248_v43, %v3162_v55  ;;  %v3397_v33 = vadd.f32 %v7266_v59, %v3204_v25 }
 0x455   : > { %3770 = vxpose.xlu1.b32.start [1/8] (short) (narrow) %v3677_v42, 32  ;;  %v3524_v38 = vadd.f32 %v3523_v44, %v3325_v60  ;;  %v3183_v10 = vadd.f32 %v3182_v17, %v3005_v15  ;;  %v3695_v32 = vadd.f32 %v4629_v52, %v3530_v11  ;;  %v3169_v17 = vadd.f32 %v7268_v41, %v7225_v57  ;;  %v7710_v11 = vld [vmem:[#allocation15_spill] sm:$0xff] }
 0x456   : > { %v4600_v35 = vpop.f32.mrf.mxu0  ;;  %v4638_v39 = vpop.f32.mrf.mxu1  ;;  %v3389_v41 = vadd.f32 %v7270_v22, %v3197_v28  ;;  %v3225_v15 = vadd.f32 %v7298_v2, %v7708_v1 }
 0x457   : > { %v3689_v46 = vadd.f32 %v3688_v3, %v3524_v38  ;;  %v3373_v63 = vadd.f32 %v7262_v19, %v3183_v10  ;;  %v3542_v48 = vadd.f32 %v4600_v35, %v3349_v53  ;;  %v3176_v19 = vadd.f32 %v7264_v27, %v7221_v14 }
 0x458   : > { %v3535_v7 = vpop.f32.mrf.mxu0  ;;  %v3724_v29 = vpop.f32.mrf.mxu1  ;;  %v3357_v57 = vadd.f32 %v7256_v9, %v3169_v17  ;;  %v3211_v14 = vadd.f32 %v7290_v58, %v7242_v13 }
 0x459   : > { %3771 = vxpose.xlu1.b32.cont [2/8] (short) (narrow) %v3683_v12, 32  ;;  %v3536_v4 = vadd.f32 %v3535_v7, %v3341_v37  ;;  %v3707_v45 = vadd.f32 %v7300_v21, %v3542_v48  ;;  %v3365_v27 = vadd.f32 %v7254_v16, %v3176_v19  ;;  %v7705_v21 = vld [vmem:[#allocation6_spill] sm:$0xff]  ;;  %v7707_v12 = vld [vmem:[#allocation7_spill] sm:$0xff] }
 0x45a   : > { %v4603_v42 = vpop.f32.mrf.mxu0  ;;  %v4641_v47 = vpop.f32.mrf.mxu1  ;;  %v3218_v35 = vadd.f32 %v7706_v6, %v7705_v21  ;;  %v3405_v38 = vadd.f32 %v7707_v12, %v3211_v14 }
 0x45b   : > { %v3701_v26 = vadd.f32 %v3700_v34, %v3536_v4  ;;  %v3554_v22 = vadd.f32 %v4603_v42, %v3365_v27 }
 0x45c   : > { %v3547_v51 = vpop.f32.mrf.mxu0  ;;  %v3736_v9 = vpop.f32.mrf.mxu1  ;;  %v3413_v54 = vadd.f32 %v7709_v5, %v3218_v35 }
 0x45d   : > { %3772 = vxpose.xlu1.b32.cont [3/8] (short) (narrow) %v3689_v46, 32  ;;  %v3548_v49 = vadd.f32 %v3547_v51, %v3357_v57  ;;  %v3719_v16 = vadd.f32 %v7308_v50, %v3554_v22  ;;  %v7711_v46 = vld [vmem:[#allocation13_spill] sm:$0xff]  ;;  %v7712_v51 = vld [vmem:[#allocation20_spill] sm:$0xff] }
 0x45e   : > { %v4606_v30 = vpop.f32.mrf.mxu0  ;;  %v4644_v13 = vpop.f32.mrf.mxu1  ;;  %v3232_v55 = vadd.f32 %v7711_v46, %v7710_v11  ;;  %v3421_v50 = vadd.f32 %v7712_v51, %v3225_v15 }
 0x45f   : > { %v3566_v52 = vadd.f32 %v4606_v30, %v3381_v40  ;;  %v3713_v61 = vadd.f32 %v3712_v56, %v3548_v49  ;;  %v7713_v30 = vld [vmem:[#allocation16_spill] sm:$0xff] }
 0x460   : > { %v3559_v24 = vpop.f32.mrf.mxu0  ;;  %v3748_v56 = vpop.f32.mrf.mxu1  ;;  %v3429_v2 = vadd.f32 %v7713_v30, %v3232_v55 }
 0x461   : > { %v3560_v31 = vadd.f32 %v3559_v24, %v3373_v63  ;;  %3773 = vxpose.xlu1.b32.cont [4/8] (short) (narrow) %v3695_v32, 32  ;;  %v3731_v34 = vadd.f32 %v4638_v39, %v3566_v52 }
 0x462   : > { %v4609_v62 = vpop.f32.mrf.mxu0  ;;  %v4647_v18 = vpop.f32.mrf.mxu1 }
 0x463   : > { %v3725_v3 = vadd.f32 %v3724_v29, %v3560_v31  ;;  %v3578_v20 = vadd.f32 %v4609_v62, %v3397_v33 }
 0x464   : > { %v3571_v43 = vpop.f32.mrf.mxu0  ;;  %v3760_v0 = vpop.f32.mrf.mxu1 }
 0x465   : > { %3802 = vxpose.xlu0.b32.start [1/8] (short) (narrow) %v3725_v3, 32  ;;  %3774 = vxpose.xlu1.b32.cont [5/8] (short) (narrow) %v3701_v26, 32  ;;  %v3572_v23 = vadd.f32 %v3571_v43, %v3389_v41  ;;  %v3743_v58 = vadd.f32 %v4641_v47, %v3578_v20 }
 0x466   : > { %v4612_v44 = vpop.f32.mrf.mxu0 }
 0x467   : > { %v3737_v8 = vadd.f32 %v3736_v9, %v3572_v23  ;;  %v3590_v42 = vadd.f32 %v4612_v44, %v3413_v54 }
 0x468   : > { %v3583_v60 = vpop.f32.mrf.mxu0 }
 0x469   : > { %3803 = vxpose.xlu0.b32.cont [2/8] (short) (narrow) %v3731_v34, 32  ;;  %3775 = vxpose.xlu1.b32.cont [6/8] (short) (narrow) %v3707_v45, 32  ;;  %v3584_v59 = vadd.f32 %v3583_v60, %v3405_v38  ;;  %v3755_v37 = vadd.f32 %v4644_v13, %v3590_v42 }
 0x46a   : > { %v4615_v7 = vpop.f32.mrf.mxu0 }
 0x46b   : > { %v3749_v36 = vadd.f32 %v3748_v56, %v3584_v59  ;;  %v3602_v32 = vadd.f32 %v4615_v7, %v3429_v2 }
 0x46c   : > { %v3595_v10 = vpop.f32.mrf.mxu0 }
 0x46d   : > { %3804 = vxpose.xlu0.b32.cont [3/8] (short) (narrow) %v3737_v8, 32  ;;  %3776 = vxpose.xlu1.b32.cont [7/8] (short) (narrow) %v3713_v61, 32  ;;  %v3596_v39 = vadd.f32 %v3595_v10, %v3421_v50  ;;  %v3767_v63 = vadd.f32 %v4647_v18, %v3602_v32 }
 0x46f   : > { %v3761_v4 = vadd.f32 %v3760_v0, %v3596_v39 }
 0x471   : > { %3805 = vxpose.xlu0.b32.cont [4/8] (short) (narrow) %v3743_v58, 32  ;;  %3777 = vxpose.xlu1.b32.end [8/8] (short) (narrow) %v3719_v16, 32 }
 0x475   : > { %3806 = vxpose.xlu0.b32.cont [5/8] (short) (narrow) %v3749_v36, 32 }
 0x479   : > { %3807 = vxpose.xlu0.b32.cont [6/8] (short) (narrow) %v3755_v37, 32 }
 0x47d   : > { %3808 = vxpose.xlu0.b32.cont [7/8] (short) (narrow) %v3761_v4, 32 }
 0x481   : > { %3809 = vxpose.xlu0.b32.end [8/8] (short) (narrow) %v3767_v63, 32 }
 0x4d1   : > { %v3786_v53 = vpop.trf.xlu1 }
 0x4d2   : > { %3835 = vst.msk [vmem:[%s166_s10] sm:$0xff] %vm3834_vm0, %v3786_v53 }
 0x4d5   : > { %v3787_v24 = vpop.trf.xlu1 }
 0x4d6   : > { %3836 = vst.msk [vmem:[%s166_s10 + $0x8] sm:$0xff] %vm3834_vm0, %v3787_v24 }
 0x4d9   : > { %v3788_v17 = vpop.trf.xlu1 }
 0x4da   : > { %3837 = vst.msk [vmem:[%s166_s10 + $0x10] sm:$0xff] %vm3834_vm0, %v3788_v17 }
 0x4dd   : > { %v3789_v28 = vpop.trf.xlu1 }
 0x4de   : > { %3838 = vst.msk [vmem:[%s166_s10 + $0x18] sm:$0xff] %vm3834_vm0, %v3789_v28 }
 0x4e1   : > { %v3818_v40 = vpop.trf.xlu0 }
 0x4e2   : > { %3839 = vst.msk [vmem:[%s166_s10 + $0x20] sm:$0xff] %vm3834_vm0, %v3818_v40 }
 0x4e5   : > { %v3819_v31 = vpop.trf.xlu0 }
 0x4e6   : > { %3840 = vst.msk [vmem:[%s166_s10 + $0x28] sm:$0xff] %vm3834_vm0, %v3819_v31 }
 0x4e9   : > { %v3820_v29 = vpop.trf.xlu0 }
 0x4ea   : > { %3841 = vst.msk [vmem:[%s166_s10 + $0x30] sm:$0xff] %vm3834_vm0, %v3820_v29 }
 0x4ed   : > { %v3821_v62 = vpop.trf.xlu0 }
 0x4ee   : > { %3842 = vst.msk [vmem:[%s166_s10 + $0x38] sm:$0xff] %vm3834_vm0, %v3821_v62 }
 0x4ef   : > { %4803 = shalt.err (!%p4800_p3)
}
 0x4f0   : > { %s4804_s29 = scalar_lea.hbm %s7360_s24, 1024  ;;  %s4808_s5 = scalar_lea.hbm %s7408_s3, 4096 }
 0x4f1   : > { %p4805_p4 = scmp.ne.s32.totalorder %s7360_s24, %s4804_s29  ;;  %p4809_p9 = scmp.lt.s32.totalorder %s7360_s24, %s7408_s3 }
 0x4f2   : > { %p4810_p10 = scmp.lt.s32.totalorder %s4808_s5, %s4804_s29 }
 0x4f3   : > { %p4806_p7 = pnand %p4805_p4, %p4916_p5 }
 0x4f4   : > { %p4811_p11 = por %p4810_p10, %p4809_p9 }
 0x4f5   : > { %p4807_p8 = pneg %p4806_p7 }
 0x4f7   : > { %p4812_p12 = pnand %p4811_p11, %p4807_p8 }
 0x4f9   : > { %4815 = shalt.err (!%p4812_p12)
}
 0x4fa   : > { %s4856_s8 = smov 128   ;;  %s4857_s9 = smov 8  }
 0x4fb   : > { %4648 = dma.vmem_to_hbm [thread:$0]  (%p4916_p5), %s7362_s17, 1024, %s7360_s24, %s7365_s25, %s4856_s8, %s4856_s8, %s4857_s9  }
 0x4fc PF: > { %p4654_p13 = scmp.ge.s32.totalorder %s4850_s15, 2  ;;  %s3873_s10 = sand.u32 1, %s4838_s12  }
 0x4fd   : > { %s3874_s11 = scalar_lea.sflag [#allocation3], %s3873_s10 }
 0x4fe   : > { %p4651_p0 = pnand %p4654_p13, %p4920_p6 }
 0x500   : > { %p4652_p1 = pneg %p4651_p0 }
 0x502   : > { %4833 = dma.done.wait (%p4652_p1), %s3874_s11, 1024  }
 0x503   : > { %4835 = vsyncadd (%p4652_p1), %s3874_s11, 4294966272  ;;  %p13_p2 = scmp.ge.s32.totalorder %s4903_s18, 6   ;;  %s7714_s12 = smov %s4842_s13 }
 0x504   : > { %s7715_s13 = smov %s4846_s14  ;;  %s7716_s14 = smov %s4914_s21 }
 0x505   : > { %s7717_s15 = smov %s4903_s18  ;;  %15 = sbr.rel (!%p13_p2) target bundleno = 3 (0x3), region = 67 }
 0x50a   :  { %3879 = vsyncpa [#allocation3], 1 }
 0x50b   :  { %3881 = vsyncpa [#allocation3 + $0x1], 1 }

</bundles_post_ra>
